<compile_context>
chip_gen: v7x
topology: tpu7x:2x2x1
jax: 0.10.0
libtpu: 0.0.40
codegen_flags: <defaults>
</compile_context>

<pallas_src>
import functools

import numpy as np

import jax
import jax.numpy as jnp
from jax.experimental import pallas as pl
from jax.experimental.pallas import tpu as pltpu


# ----------------------------- fused kernel --------------------------------


def _lenet_kernel(
    x_ref,      # (TB, 32, 32)  input tile (TB images), f32
    m1_ref,     # (160, 168)    conv1 merged-K banded weights, lanes = ow*6+co (bf16)
    p1r_ref,    # (2, 14, 28)   even/odd row-pool selectors, stage 1 (bf16)
    p1c_ref,    # (2, 168, 84)  even/odd lane-pool selectors, stage 1 (bf16)
    b1l_ref,    # (1, 84)       conv1 bias per lane (f32)
    m2_ref,     # (420, 160)    conv2 merged-K banded weights, lanes = ow*16+co (bf16)
    p2r_ref,    # (2, 5, 10)
    p2c_ref,    # (2, 160, 80)
    b2l_ref,    # (1, 80)
    w1f_ref,    # (400, 120)    fc1 weight, rows = ph*80 + pw*16 + co (bf16)
    b1f_ref,    # (1, 120)
    w2f_ref,    # (120, 84)
    b2f_ref,    # (1, 84)
    w3f_ref,    # (84, 10)
    b3f_ref,    # (1, 10)
    out_ref,    # (1, TB, 10)
):
    dot = functools.partial(jnp.dot, preferred_element_type=jnp.float32)
    bf16 = jnp.bfloat16
    TB = x_ref.shape[0]

    flat_rows = []
    for t in range(TB):                       # unrolled per-image conv path
        x = x_ref[t]                                          # (32, 32) f32

        # conv1 (1->6, k=5): merged-K banded matmul, K = 5*32 = 160.
        lhs1 = jnp.concatenate([x[kh:kh + 28, :] for kh in range(5)],
                               axis=1).astype(bf16)           # (28, 160)
        c1 = dot(lhs1, m1_ref[...])                           # (28, 168) f32

        # 2x2 max-pool via 0/1 selector matmuls (exact selection in bf16),
        # then bias + relu.  Bias-after-pool is valid because the bias is a
        # per-channel constant and pooling stays within a channel.
        c1b = c1.astype(bf16)
        t1 = jnp.maximum(dot(p1r_ref[0], c1b), dot(p1r_ref[1], c1b))  # (14,168)
        t1b = t1.astype(bf16)
        a1 = jnp.maximum(dot(t1b, p1c_ref[0]), dot(t1b, p1c_ref[1]))  # (14, 84)
        a1 = jnp.maximum(a1 + b1l_ref[...], 0.0)              # lanes = w*6 + c

        # conv2 (6->16, k=5): merged-K banded matmul, K = 5*84 = 420.
        lhs2 = jnp.concatenate([a1[kh:kh + 10, :] for kh in range(5)],
                               axis=1).astype(bf16)           # (10, 420)
        c2 = dot(lhs2, m2_ref[...])                           # (10, 160) f32

        c2b = c2.astype(bf16)
        t2 = jnp.maximum(dot(p2r_ref[0], c2b), dot(p2r_ref[1], c2b))  # (5, 160)
        t2b = t2.astype(bf16)
        a2 = jnp.maximum(dot(t2b, p2c_ref[0]), dot(t2b, p2c_ref[1]))  # (5, 80)
        a2 = jnp.maximum(a2 + b2l_ref[...], 0.0)              # lanes = pw*16+co

        # Flatten to one 400-lane row (lane = ph*80 + pw*16 + co) so the whole
        # FC tail below runs batched with M = TB instead of M = 1.
        flat_rows.append(
            jnp.concatenate([a2[ph:ph + 1, :] for ph in range(5)], axis=1))

    f = jnp.concatenate(flat_rows, axis=0).astype(bf16)       # (TB, 400)

    # ---- batched FC tail (fc1 rows pre-permuted for NCHW .view(-1, 400)) ----
    h = jnp.maximum(dot(f, w1f_ref[...]) + b1f_ref[...], 0.0)           # (TB,120)
    # dropout == identity at inference
    h = jnp.maximum(dot(h.astype(bf16), w2f_ref[...]) + b2f_ref[...], 0.0)  # (TB,84)
    # dropout == identity at inference
    logits = dot(h.astype(bf16), w3f_ref[...]) + b3f_ref[...]           # (TB, 10)

    # ---- log_softmax (fused, f32) ----
    m = jnp.max(logits, axis=-1, keepdims=True)
    s = logits - m
    lse = jnp.log(jnp.sum(jnp.exp(s), axis=-1, keepdims=True))
    out_ref[0] = s - lse


def _const_spec(shape):
    # Full-array block with a constant block index: fetched once, resident in
    # VMEM across all grid steps.
    nd = len(shape)
    return pl.BlockSpec(shape, lambda b, _nd=nd: (0,) * _nd)


def lenet_forward(x_nchw, packed, block_b=None):
    """x_nchw: (B, 1, 32, 32) float32 -> (B, 10) log-probabilities."""
    B = x_nchw.shape[0]
    if block_b is None:
        # Keep the grid length >= 2 so both v7x TensorCores get work, while
        # batching enough images per step to amortize per-step overhead.
        block_b = max(1, min(8, B // 2)) if B >= 2 else 1
    TB = int(block_b)
    G = pl.cdiv(B, TB)
    Bp = G * TB

    x3 = x_nchw.reshape(B, 32, 32).astype(jnp.float32)
    if Bp != B:                               # pad the tail batch block
        x3 = jnp.concatenate(
            [x3, jnp.zeros((Bp - B, 32, 32), jnp.float32)], axis=0)

    consts = packed
    in_specs = [pl.BlockSpec((TB, 32, 32), lambda i: (i, 0, 0))]
    in_specs += [_const_spec(c.shape) for c in consts]

    out = pl.pallas_call(
        _lenet_kernel,
        grid=(G,),
        in_specs=in_specs,
        out_specs=pl.BlockSpec((1, TB, 10), lambda i: (i, 0, 0)),
        out_shape=jax.ShapeDtypeStruct((G, TB, 10), jnp.float32),
        compiler_params=pltpu.CompilerParams(
            dimension_semantics=("parallel",)),
    )(x3, *consts)
    return out.reshape(Bp, 10)[:B]


# --------------------- one-time host-side weight packing -------------------


def prepack_params(params):
    """Pack PyTorch-layout weights into the kernel's matmul operands (once)."""
    (w1, b1, w2, b2, fw1, fb1, fw2, fb2, fw3, fb3) = [
        np.asarray(p, np.float32) for p in params]

    # conv1 merged-K banded matrix: M1[kh*32 + i, ow*6 + co] = w1[co, 0, kh, i-ow]
    m1 = np.zeros((5, 32, 28 * 6), np.float32)
    for kh in range(5):
        for co in range(6):
            for ow in range(28):
                for kw in range(5):
                    m1[kh, ow + kw, ow * 6 + co] = w1[co, 0, kh, kw]
    m1k = m1.reshape(5 * 32, 28 * 6)

    # stage-1 pool selectors: rows 28 -> 14, lanes (w*6+c): 168 -> 84
    p1r = np.zeros((2, 14, 28), np.float32)
    for r in range(14):
        p1r[0, r, 2 * r] = 1.0
        p1r[1, r, 2 * r + 1] = 1.0
    p1c = np.zeros((2, 168, 84), np.float32)
    for pw in range(14):
        for c in range(6):
            p1c[0, (2 * pw) * 6 + c, pw * 6 + c] = 1.0
            p1c[1, (2 * pw + 1) * 6 + c, pw * 6 + c] = 1.0
    b1l = np.tile(b1, 14)[None, :]                    # lane w*6+c -> b1[c]

    # conv2 merged-K banded matrix: M2[kh*84 + wi*6+ci, ow*16+co] = w2[co,ci,kh,wi-ow]
    m2 = np.zeros((5, 84, 160), np.float32)
    for kh in range(5):
        for co in range(16):
            for ci in range(6):
                for ow in range(10):
                    for kw in range(5):
                        m2[kh, (ow + kw) * 6 + ci, ow * 16 + co] = w2[co, ci, kh, kw]
    m2k = m2.reshape(5 * 84, 160)

    # stage-2 pool selectors: rows 10 -> 5, lanes (ow*16+co): 160 -> 80
    p2r = np.zeros((2, 5, 10), np.float32)
    for r in range(5):
        p2r[0, r, 2 * r] = 1.0
        p2r[1, r, 2 * r + 1] = 1.0
    p2c = np.zeros((2, 160, 80), np.float32)
    for pw in range(5):
        for co in range(16):
            p2c[0, (2 * pw) * 16 + co, pw * 16 + co] = 1.0
            p2c[1, (2 * pw + 1) * 16 + co, pw * 16 + co] = 1.0
    b2l = np.tile(b2, 5)[None, :]                     # lane pw*16+co -> b2[co]

    # fc1 weights permuted to the kernel's flattened activation layout:
    # W1f[ph*80 + pw*16 + co, j] = fc1.weight[j, co*25 + ph*5 + pw]  (NCHW flatten)
    w1f = np.zeros((400, 120), np.float32)
    for ph in range(5):
        for pw in range(5):
            for co in range(16):
                w1f[ph * 80 + pw * 16 + co, :] = fw1[:, co * 25 + ph * 5 + pw]
    b1f = fb1[None, :]
    w2f = np.ascontiguousarray(fw2.T)
    b2f = fb2[None, :]
    w3f = np.ascontiguousarray(fw3.T)
    b3f = fb3[None, :]

    bfl = lambda a: jnp.asarray(a, jnp.bfloat16)      # MXU operands
    f32 = lambda a: jnp.asarray(a, jnp.float32)       # biases stay f32 (VPU)
    return (bfl(m1k), bfl(p1r), bfl(p1c), f32(b1l),
            bfl(m2k), bfl(p2r), bfl(p2c), f32(b2l),
            bfl(w1f), f32(b1f), bfl(w2f), f32(b2f), bfl(w3f), f32(b3f))


# ------------------------------ reference ----------------------------------


def reference_forward(x_nchw, params):
    """Pure-JAX reference with PyTorch semantics (for correctness check)."""
    (w1, b1, w2, b2, fw1, fb1, fw2, fb2, fw3, fb3) = params
    dn = ("NCHW", "OIHW", "NCHW")
    hp = jax.lax.Precision.HIGHEST

    y = jax.lax.conv_general_dilated(x_nchw, w1, (1, 1), "VALID",
                                     dimension_numbers=dn, precision=hp)
    y = y + b1.reshape(1, -1, 1, 1)
    y = jax.lax.reduce_window(y, -jnp.inf, jax.lax.max,
                              (1, 1, 2, 2), (1, 1, 2, 2), "VALID")
    y = jnp.maximum(y, 0.0)

    y = jax.lax.conv_general_dilated(y, w2, (1, 1), "VALID",
                                     dimension_numbers=dn, precision=hp)
    y = y + b2.reshape(1, -1, 1, 1)
    y = jax.lax.reduce_window(y, -jnp.inf, jax.lax.max,
                              (1, 1, 2, 2), (1, 1, 2, 2), "VALID")
    y = jnp.maximum(y, 0.0)

    f = y.reshape(y.shape[0], -1)                      # NCHW .view(-1, 400)
    h = jnp.maximum(jnp.dot(f, fw1.T, precision=hp) + fb1, 0.0)
    h = jnp.maximum(jnp.dot(h, fw2.T, precision=hp) + fb2, 0.0)
    logits = jnp.dot(h, fw3.T, precision=hp) + fb3
    return jax.nn.log_softmax(logits, axis=-1)


def init_params(key):
    ks = jax.random.split(key, 10)
    scale = 0.1
    w1 = scale * jax.random.normal(ks[0], (6, 1, 5, 5), jnp.float32)
    b1 = scale * jax.random.normal(ks[1], (6,), jnp.float32)
    w2 = scale * jax.random.normal(ks[2], (16, 6, 5, 5), jnp.float32)
    b2 = scale * jax.random.normal(ks[3], (16,), jnp.float32)
    fw1 = scale * jax.random.normal(ks[4], (120, 400), jnp.float32)
    fb1 = scale * jax.random.normal(ks[5], (120,), jnp.float32)
    fw2 = scale * jax.random.normal(ks[6], (84, 120), jnp.float32)
    fb2 = scale * jax.random.normal(ks[7], (84,), jnp.float32)
    fw3 = scale * jax.random.normal(ks[8], (10, 84), jnp.float32)
    fb3 = scale * jax.random.normal(ks[9], (10,), jnp.float32)
    return (w1, b1, w2, b2, fw1, fb1, fw2, fb2, fw3, fb3)


if __name__ == "__main__":
    key = jax.random.PRNGKey(0)
    k_x, k_p = jax.random.split(key)

    B = 8
    x = jax.random.normal(k_x, (B, 1, 32, 32), jnp.float32)   # NCHW like PyTorch
    params = init_params(k_p)
    packed = prepack_params(params)                           # one-time packing

    fwd = jax.jit(lenet_forward)                              # TB=4 -> grid=(2,)
    out = jax.block_until_ready(fwd(x, packed))

    assert out.shape == (B, 10), out.shape
    assert out.dtype == jnp.float32
    # log_softmax rows should (log-)sum to ~1
    assert jnp.allclose(jnp.sum(jnp.exp(out), axis=-1), 1.0, atol=1e-4)

    # Check against a pure-JAX reference of the PyTorch module.
    # (bf16 MXU operands with f32 accumulation vs a Precision.HIGHEST reference.)
    ref = reference_forward(x, params)
    err = float(jnp.max(jnp.abs(out - ref)))
    assert err < 5e-2, f"max |pallas - reference| = {err}"

    print("KERNEL_OK")
</pallas_src>

<mosaic_0001>
module attributes {stable_mosaic.version = 11 : i64} {
  func.func @_lenet_kernel(%arg0: i32, %arg1: memref<4x32x32xf32, #tpu.memory_space<vmem>>, %arg2: memref<160x168xbf16, #tpu.memory_space<vmem>>, %arg3: memref<2x14x28xbf16, #tpu.memory_space<vmem>>, %arg4: memref<2x168x84xbf16, #tpu.memory_space<vmem>>, %arg5: memref<1x84xf32, #tpu.memory_space<vmem>>, %arg6: memref<420x160xbf16, #tpu.memory_space<vmem>>, %arg7: memref<2x5x10xbf16, #tpu.memory_space<vmem>>, %arg8: memref<2x160x80xbf16, #tpu.memory_space<vmem>>, %arg9: memref<1x80xf32, #tpu.memory_space<vmem>>, %arg10: memref<400x120xbf16, #tpu.memory_space<vmem>>, %arg11: memref<1x120xf32, #tpu.memory_space<vmem>>, %arg12: memref<120x84xbf16, #tpu.memory_space<vmem>>, %arg13: memref<1x84xf32, #tpu.memory_space<vmem>>, %arg14: memref<84x10xbf16, #tpu.memory_space<vmem>>, %arg15: memref<1x10xf32, #tpu.memory_space<vmem>>, %arg16: memref<1x4x10xf32, #tpu.memory_space<vmem>>) attributes {dimension_semantics = [#tpu.dimension_semantics<parallel>], iteration_bounds = array<i64: 2>, scalar_prefetch = 0 : i64, scratch_operands = 0 : i64, tpu.core_type = #tpu.core_type<tc>, window_params = [{transform_indices = @transform_0, window_bounds = array<i64: 4, 32, 32>}, {pipeline_mode = #tpu.pipeline_mode<synchronous>, transform_indices = @transform_1, window_bounds = array<i64: 160, 168>}, {pipeline_mode = #tpu.pipeline_mode<synchronous>, transform_indices = @transform_2, window_bounds = array<i64: 2, 14, 28>}, {pipeline_mode = #tpu.pipeline_mode<synchronous>, transform_indices = @transform_3, window_bounds = array<i64: 2, 168, 84>}, {pipeline_mode = #tpu.pipeline_mode<synchronous>, transform_indices = @transform_4, window_bounds = array<i64: 1, 84>}, {pipeline_mode = #tpu.pipeline_mode<synchronous>, transform_indices = @transform_5, window_bounds = array<i64: 420, 160>}, {pipeline_mode = #tpu.pipeline_mode<synchronous>, transform_indices = @transform_6, window_bounds = array<i64: 2, 5, 10>}, {pipeline_mode = #tpu.pipeline_mode<synchronous>, transform_indices = @transform_7, window_bounds = array<i64: 2, 160, 80>}, {pipeline_mode = #tpu.pipeline_mode<synchronous>, transform_indices = @transform_8, window_bounds = array<i64: 1, 80>}, {pipeline_mode = #tpu.pipeline_mode<synchronous>, transform_indices = @transform_9, window_bounds = array<i64: 400, 120>}, {pipeline_mode = #tpu.pipeline_mode<synchronous>, transform_indices = @transform_10, window_bounds = array<i64: 1, 120>}, {pipeline_mode = #tpu.pipeline_mode<synchronous>, transform_indices = @transform_11, window_bounds = array<i64: 120, 84>}, {pipeline_mode = #tpu.pipeline_mode<synchronous>, transform_indices = @transform_12, window_bounds = array<i64: 1, 84>}, {pipeline_mode = #tpu.pipeline_mode<synchronous>, transform_indices = @transform_13, window_bounds = array<i64: 84, 10>}, {pipeline_mode = #tpu.pipeline_mode<synchronous>, transform_indices = @transform_14, window_bounds = array<i64: 1, 10>}, {transform_indices = @transform_15, window_bounds = array<i64: 1, 4, 10>}]} {
    %c0 = arith.constant 0 : index
    %c0_0 = arith.constant 0 : index
    %c0_1 = arith.constant 0 : index
    %0 = vector.load %arg1[%c0, %c0_0, %c0_1] : memref<4x32x32xf32, #tpu.memory_space<vmem>>, vector<1x32x32xf32>
    %1 = vector.shape_cast %0 : vector<1x32x32xf32> to vector<32x32xf32>
    %2 = vector.extract_strided_slice %1 {offsets = [0, 0], sizes = [28, 32], strides = [1, 1]} : vector<32x32xf32> to vector<28x32xf32>
    %3 = vector.extract_strided_slice %1 {offsets = [1, 0], sizes = [28, 32], strides = [1, 1]} : vector<32x32xf32> to vector<28x32xf32>
    %4 = vector.extract_strided_slice %1 {offsets = [2, 0], sizes = [28, 32], strides = [1, 1]} : vector<32x32xf32> to vector<28x32xf32>
    %5 = vector.extract_strided_slice %1 {offsets = [3, 0], sizes = [28, 32], strides = [1, 1]} : vector<32x32xf32> to vector<28x32xf32>
    %6 = vector.extract_strided_slice %1 {offsets = [4, 0], sizes = [28, 32], strides = [1, 1]} : vector<32x32xf32> to vector<28x32xf32>
    %7 = tpu.concatenate %2, %3, %4, %5, %6 in 1 : vector<28x32xf32>, vector<28x32xf32>, vector<28x32xf32>, vector<28x32xf32>, vector<28x32xf32> -> vector<28x160xf32>
    %8 = arith.truncf %7 : vector<28x160xf32> to vector<28x160xbf16>
    %c0_2 = arith.constant 0 : index
    %c0_3 = arith.constant 0 : index
    %9 = vector.load %arg2[%c0_2, %c0_3] : memref<160x168xbf16, #tpu.memory_space<vmem>>, vector<160x168xbf16>
    %cst = arith.constant dense<0.000000e+00> : vector<28x168xf32>
    %10 = tpu.matmul %8, %9, %cst {dimension_numbers = #tpu.dot_dimension_numbers<[1], [0], [0], [1], [0, 0, 1, 1], [], []>} : vector<28x160xbf16>, vector<160x168xbf16>, vector<28x168xf32> -> vector<28x168xf32>
    %11 = arith.truncf %10 : vector<28x168xf32> to vector<28x168xbf16>
    %c0_4 = arith.constant 0 : index
    %c0_5 = arith.constant 0 : index
    %c0_6 = arith.constant 0 : index
    %12 = vector.load %arg3[%c0_4, %c0_5, %c0_6] : memref<2x14x28xbf16, #tpu.memory_space<vmem>>, vector<1x14x28xbf16>
    %13 = vector.shape_cast %12 : vector<1x14x28xbf16> to vector<14x28xbf16>
    %cst_7 = arith.constant dense<0.000000e+00> : vector<14x168xf32>
    %14 = tpu.matmul %13, %11, %cst_7 {dimension_numbers = #tpu.dot_dimension_numbers<[1], [0], [0], [1], [0, 0, 1, 1], [], []>} : vector<14x28xbf16>, vector<28x168xbf16>, vector<14x168xf32> -> vector<14x168xf32>
    %c1 = arith.constant 1 : index
    %c0_8 = arith.constant 0 : index
    %c0_9 = arith.constant 0 : index
    %15 = vector.load %arg3[%c1, %c0_8, %c0_9] : memref<2x14x28xbf16, #tpu.memory_space<vmem>>, vector<1x14x28xbf16>
    %16 = vector.shape_cast %15 : vector<1x14x28xbf16> to vector<14x28xbf16>
    %cst_10 = arith.constant dense<0.000000e+00> : vector<14x168xf32>
    %17 = tpu.matmul %16, %11, %cst_10 {dimension_numbers = #tpu.dot_dimension_numbers<[1], [0], [0], [1], [0, 0, 1, 1], [], []>} : vector<14x28xbf16>, vector<28x168xbf16>, vector<14x168xf32> -> vector<14x168xf32>
    %18 = arith.maximumf %14, %17 : vector<14x168xf32>
    %19 = arith.truncf %18 : vector<14x168xf32> to vector<14x168xbf16>
    %c0_11 = arith.constant 0 : index
    %c0_12 = arith.constant 0 : index
    %c0_13 = arith.constant 0 : index
    %20 = vector.load %arg4[%c0_11, %c0_12, %c0_13] : memref<2x168x84xbf16, #tpu.memory_space<vmem>>, vector<1x168x84xbf16>
    %21 = vector.shape_cast %20 : vector<1x168x84xbf16> to vector<168x84xbf16>
    %cst_14 = arith.constant dense<0.000000e+00> : vector<14x84xf32>
    %22 = tpu.matmul %19, %21, %cst_14 {dimension_numbers = #tpu.dot_dimension_numbers<[1], [0], [0], [1], [0, 0, 1, 1], [], []>} : vector<14x168xbf16>, vector<168x84xbf16>, vector<14x84xf32> -> vector<14x84xf32>
    %c1_15 = arith.constant 1 : index
    %c0_16 = arith.constant 0 : index
    %c0_17 = arith.constant 0 : index
    %23 = vector.load %arg4[%c1_15, %c0_16, %c0_17] : memref<2x168x84xbf16, #tpu.memory_space<vmem>>, vector<1x168x84xbf16>
    %24 = vector.shape_cast %23 : vector<1x168x84xbf16> to vector<168x84xbf16>
    %cst_18 = arith.constant dense<0.000000e+00> : vector<14x84xf32>
    %25 = tpu.matmul %19, %24, %cst_18 {dimension_numbers = #tpu.dot_dimension_numbers<[1], [0], [0], [1], [0, 0, 1, 1], [], []>} : vector<14x168xbf16>, vector<168x84xbf16>, vector<14x84xf32> -> vector<14x84xf32>
    %26 = arith.maximumf %22, %25 : vector<14x84xf32>
    %c0_19 = arith.constant 0 : index
    %c0_20 = arith.constant 0 : index
    %27 = vector.load %arg5[%c0_19, %c0_20] : memref<1x84xf32, #tpu.memory_space<vmem>>, vector<1x84xf32>
    %28 = vector.broadcast %27 : vector<1x84xf32> to vector<14x84xf32>
    %29 = arith.addf %26, %28 : vector<14x84xf32>
    %cst_21 = arith.constant 0.000000e+00 : f32
    %30 = vector.broadcast %cst_21 : f32 to vector<14x84xf32>
    %31 = arith.maximumf %29, %30 : vector<14x84xf32>
    %32 = vector.extract_strided_slice %31 {offsets = [0, 0], sizes = [10, 84], strides = [1, 1]} : vector<14x84xf32> to vector<10x84xf32>
    %33 = vector.extract_strided_slice %31 {offsets = [1, 0], sizes = [10, 84], strides = [1, 1]} : vector<14x84xf32> to vector<10x84xf32>
    %34 = vector.extract_strided_slice %31 {offsets = [2, 0], sizes = [10, 84], strides = [1, 1]} : vector<14x84xf32> to vector<10x84xf32>
    %35 = vector.extract_strided_slice %31 {offsets = [3, 0], sizes = [10, 84], strides = [1, 1]} : vector<14x84xf32> to vector<10x84xf32>
    %36 = vector.extract_strided_slice %31 {offsets = [4, 0], sizes = [10, 84], strides = [1, 1]} : vector<14x84xf32> to vector<10x84xf32>
    %37 = tpu.concatenate %32, %33, %34, %35, %36 in 1 : vector<10x84xf32>, vector<10x84xf32>, vector<10x84xf32>, vector<10x84xf32>, vector<10x84xf32> -> vector<10x420xf32>
    %38 = arith.truncf %37 : vector<10x420xf32> to vector<10x420xbf16>
    %c0_22 = arith.constant 0 : index
    %c0_23 = arith.constant 0 : index
    %39 = vector.load %arg6[%c0_22, %c0_23] : memref<420x160xbf16, #tpu.memory_space<vmem>>, vector<420x160xbf16>
    %cst_24 = arith.constant dense<0.000000e+00> : vector<10x160xf32>
    %40 = tpu.matmul %38, %39, %cst_24 {dimension_numbers = #tpu.dot_dimension_numbers<[1], [0], [0], [1], [0, 0, 1, 1], [], []>} : vector<10x420xbf16>, vector<420x160xbf16>, vector<10x160xf32> -> vector<10x160xf32>
    %41 = arith.truncf %40 : vector<10x160xf32> to vector<10x160xbf16>
    %c0_25 = arith.constant 0 : index
    %c0_26 = arith.constant 0 : index
    %c0_27 = arith.constant 0 : index
    %42 = vector.load %arg7[%c0_25, %c0_26, %c0_27] : memref<2x5x10xbf16, #tpu.memory_space<vmem>>, vector<1x5x10xbf16>
    %43 = vector.shape_cast %42 : vector<1x5x10xbf16> to vector<5x10xbf16>
    %cst_28 = arith.constant dense<0.000000e+00> : vector<5x160xf32>
    %44 = tpu.matmul %43, %41, %cst_28 {dimension_numbers = #tpu.dot_dimension_numbers<[1], [0], [0], [1], [0, 0, 1, 1], [], []>} : vector<5x10xbf16>, vector<10x160xbf16>, vector<5x160xf32> -> vector<5x160xf32>
    %c1_29 = arith.constant 1 : index
    %c0_30 = arith.constant 0 : index
    %c0_31 = arith.constant 0 : index
    %45 = vector.load %arg7[%c1_29, %c0_30, %c0_31] : memref<2x5x10xbf16, #tpu.memory_space<vmem>>, vector<1x5x10xbf16>
    %46 = vector.shape_cast %45 : vector<1x5x10xbf16> to vector<5x10xbf16>
    %cst_32 = arith.constant dense<0.000000e+00> : vector<5x160xf32>
    %47 = tpu.matmul %46, %41, %cst_32 {dimension_numbers = #tpu.dot_dimension_numbers<[1], [0], [0], [1], [0, 0, 1, 1], [], []>} : vector<5x10xbf16>, vector<10x160xbf16>, vector<5x160xf32> -> vector<5x160xf32>
    %48 = arith.maximumf %44, %47 : vector<5x160xf32>
    %49 = arith.truncf %48 : vector<5x160xf32> to vector<5x160xbf16>
    %c0_33 = arith.constant 0 : index
    %c0_34 = arith.constant 0 : index
    %c0_35 = arith.constant 0 : index
    %50 = vector.load %arg8[%c0_33, %c0_34, %c0_35] : memref<2x160x80xbf16, #tpu.memory_space<vmem>>, vector<1x160x80xbf16>
    %51 = vector.shape_cast %50 : vector<1x160x80xbf16> to vector<160x80xbf16>
    %cst_36 = arith.constant dense<0.000000e+00> : vector<5x80xf32>
    %52 = tpu.matmul %49, %51, %cst_36 {dimension_numbers = #tpu.dot_dimension_numbers<[1], [0], [0], [1], [0, 0, 1, 1], [], []>} : vector<5x160xbf16>, vector<160x80xbf16>, vector<5x80xf32> -> vector<5x80xf32>
    %c1_37 = arith.constant 1 : index
    %c0_38 = arith.constant 0 : index
    %c0_39 = arith.constant 0 : index
    %53 = vector.load %arg8[%c1_37, %c0_38, %c0_39] : memref<2x160x80xbf16, #tpu.memory_space<vmem>>, vector<1x160x80xbf16>
    %54 = vector.shape_cast %53 : vector<1x160x80xbf16> to vector<160x80xbf16>
    %cst_40 = arith.constant dense<0.000000e+00> : vector<5x80xf32>
    %55 = tpu.matmul %49, %54, %cst_40 {dimension_numbers = #tpu.dot_dimension_numbers<[1], [0], [0], [1], [0, 0, 1, 1], [], []>} : vector<5x160xbf16>, vector<160x80xbf16>, vector<5x80xf32> -> vector<5x80xf32>
    %56 = arith.maximumf %52, %55 : vector<5x80xf32>
    %c0_41 = arith.constant 0 : index
    %c0_42 = arith.constant 0 : index
    %57 = vector.load %arg9[%c0_41, %c0_42] : memref<1x80xf32, #tpu.memory_space<vmem>>, vector<1x80xf32>
    %58 = vector.broadcast %57 : vector<1x80xf32> to vector<5x80xf32>
    %59 = arith.addf %56, %58 : vector<5x80xf32>
    %cst_43 = arith.constant 0.000000e+00 : f32
    %60 = vector.broadcast %cst_43 : f32 to vector<5x80xf32>
    %61 = arith.maximumf %59, %60 : vector<5x80xf32>
    %62 = vector.extract_strided_slice %61 {offsets = [0, 0], sizes = [1, 80], strides = [1, 1]} : vector<5x80xf32> to vector<1x80xf32>
    %63 = vector.extract_strided_slice %61 {offsets = [1, 0], sizes = [1, 80], strides = [1, 1]} : vector<5x80xf32> to vector<1x80xf32>
    %64 = vector.extract_strided_slice %61 {offsets = [2, 0], sizes = [1, 80], strides = [1, 1]} : vector<5x80xf32> to vector<1x80xf32>
    %65 = vector.extract_strided_slice %61 {offsets = [3, 0], sizes = [1, 80], strides = [1, 1]} : vector<5x80xf32> to vector<1x80xf32>
    %66 = vector.extract_strided_slice %61 {offsets = [4, 0], sizes = [1, 80], strides = [1, 1]} : vector<5x80xf32> to vector<1x80xf32>
    %67 = tpu.concatenate %62, %63, %64, %65, %66 in 1 : vector<1x80xf32>, vector<1x80xf32>, vector<1x80xf32>, vector<1x80xf32>, vector<1x80xf32> -> vector<1x400xf32>
    %c1_44 = arith.constant 1 : index
    %c0_45 = arith.constant 0 : index
    %c0_46 = arith.constant 0 : index
    %68 = vector.load %arg1[%c1_44, %c0_45, %c0_46] : memref<4x32x32xf32, #tpu.memory_space<vmem>>, vector<1x32x32xf32>
    %69 = vector.shape_cast %68 : vector<1x32x32xf32> to vector<32x32xf32>
    %70 = vector.extract_strided_slice %69 {offsets = [0, 0], sizes = [28, 32], strides = [1, 1]} : vector<32x32xf32> to vector<28x32xf32>
    %71 = vector.extract_strided_slice %69 {offsets = [1, 0], sizes = [28, 32], strides = [1, 1]} : vector<32x32xf32> to vector<28x32xf32>
    %72 = vector.extract_strided_slice %69 {offsets = [2, 0], sizes = [28, 32], strides = [1, 1]} : vector<32x32xf32> to vector<28x32xf32>
    %73 = vector.extract_strided_slice %69 {offsets = [3, 0], sizes = [28, 32], strides = [1, 1]} : vector<32x32xf32> to vector<28x32xf32>
    %74 = vector.extract_strided_slice %69 {offsets = [4, 0], sizes = [28, 32], strides = [1, 1]} : vector<32x32xf32> to vector<28x32xf32>
    %75 = tpu.concatenate %70, %71, %72, %73, %74 in 1 : vector<28x32xf32>, vector<28x32xf32>, vector<28x32xf32>, vector<28x32xf32>, vector<28x32xf32> -> vector<28x160xf32>
    %76 = arith.truncf %75 : vector<28x160xf32> to vector<28x160xbf16>
    %c0_47 = arith.constant 0 : index
    %c0_48 = arith.constant 0 : index
    %77 = vector.load %arg2[%c0_47, %c0_48] : memref<160x168xbf16, #tpu.memory_space<vmem>>, vector<160x168xbf16>
    %cst_49 = arith.constant dense<0.000000e+00> : vector<28x168xf32>
    %78 = tpu.matmul %76, %77, %cst_49 {dimension_numbers = #tpu.dot_dimension_numbers<[1], [0], [0], [1], [0, 0, 1, 1], [], []>} : vector<28x160xbf16>, vector<160x168xbf16>, vector<28x168xf32> -> vector<28x168xf32>
    %79 = arith.truncf %78 : vector<28x168xf32> to vector<28x168xbf16>
    %c0_50 = arith.constant 0 : index
    %c0_51 = arith.constant 0 : index
    %c0_52 = arith.constant 0 : index
    %80 = vector.load %arg3[%c0_50, %c0_51, %c0_52] : memref<2x14x28xbf16, #tpu.memory_space<vmem>>, vector<1x14x28xbf16>
    %81 = vector.shape_cast %80 : vector<1x14x28xbf16> to vector<14x28xbf16>
    %cst_53 = arith.constant dense<0.000000e+00> : vector<14x168xf32>
    %82 = tpu.matmul %81, %79, %cst_53 {dimension_numbers = #tpu.dot_dimension_numbers<[1], [0], [0], [1], [0, 0, 1, 1], [], []>} : vector<14x28xbf16>, vector<28x168xbf16>, vector<14x168xf32> -> vector<14x168xf32>
    %c1_54 = arith.constant 1 : index
    %c0_55 = arith.constant 0 : index
    %c0_56 = arith.constant 0 : index
    %83 = vector.load %arg3[%c1_54, %c0_55, %c0_56] : memref<2x14x28xbf16, #tpu.memory_space<vmem>>, vector<1x14x28xbf16>
    %84 = vector.shape_cast %83 : vector<1x14x28xbf16> to vector<14x28xbf16>
    %cst_57 = arith.constant dense<0.000000e+00> : vector<14x168xf32>
    %85 = tpu.matmul %84, %79, %cst_57 {dimension_numbers = #tpu.dot_dimension_numbers<[1], [0], [0], [1], [0, 0, 1, 1], [], []>} : vector<14x28xbf16>, vector<28x168xbf16>, vector<14x168xf32> -> vector<14x168xf32>
    %86 = arith.maximumf %82, %85 : vector<14x168xf32>
    %87 = arith.truncf %86 : vector<14x168xf32> to vector<14x168xbf16>
    %c0_58 = arith.constant 0 : index
    %c0_59 = arith.constant 0 : index
    %c0_60 = arith.constant 0 : index
    %88 = vector.load %arg4[%c0_58, %c0_59, %c0_60] : memref<2x168x84xbf16, #tpu.memory_space<vmem>>, vector<1x168x84xbf16>
    %89 = vector.shape_cast %88 : vector<1x168x84xbf16> to vector<168x84xbf16>
    %cst_61 = arith.constant dense<0.000000e+00> : vector<14x84xf32>
    %90 = tpu.matmul %87, %89, %cst_61 {dimension_numbers = #tpu.dot_dimension_numbers<[1], [0], [0], [1], [0, 0, 1, 1], [], []>} : vector<14x168xbf16>, vector<168x84xbf16>, vector<14x84xf32> -> vector<14x84xf32>
    %c1_62 = arith.constant 1 : index
    %c0_63 = arith.constant 0 : index
    %c0_64 = arith.constant 0 : index
    %91 = vector.load %arg4[%c1_62, %c0_63, %c0_64] : memref<2x168x84xbf16, #tpu.memory_space<vmem>>, vector<1x168x84xbf16>
    %92 = vector.shape_cast %91 : vector<1x168x84xbf16> to vector<168x84xbf16>
    %cst_65 = arith.constant dense<0.000000e+00> : vector<14x84xf32>
    %93 = tpu.matmul %87, %92, %cst_65 {dimension_numbers = #tpu.dot_dimension_numbers<[1], [0], [0], [1], [0, 0, 1, 1], [], []>} : vector<14x168xbf16>, vector<168x84xbf16>, vector<14x84xf32> -> vector<14x84xf32>
    %94 = arith.maximumf %90, %93 : vector<14x84xf32>
    %c0_66 = arith.constant 0 : index
    %c0_67 = arith.constant 0 : index
    %95 = vector.load %arg5[%c0_66, %c0_67] : memref<1x84xf32, #tpu.memory_space<vmem>>, vector<1x84xf32>
    %96 = vector.broadcast %95 : vector<1x84xf32> to vector<14x84xf32>
    %97 = arith.addf %94, %96 : vector<14x84xf32>
    %cst_68 = arith.constant 0.000000e+00 : f32
    %98 = vector.broadcast %cst_68 : f32 to vector<14x84xf32>
    %99 = arith.maximumf %97, %98 : vector<14x84xf32>
    %100 = vector.extract_strided_slice %99 {offsets = [0, 0], sizes = [10, 84], strides = [1, 1]} : vector<14x84xf32> to vector<10x84xf32>
    %101 = vector.extract_strided_slice %99 {offsets = [1, 0], sizes = [10, 84], strides = [1, 1]} : vector<14x84xf32> to vector<10x84xf32>
    %102 = vector.extract_strided_slice %99 {offsets = [2, 0], sizes = [10, 84], strides = [1, 1]} : vector<14x84xf32> to vector<10x84xf32>
    %103 = vector.extract_strided_slice %99 {offsets = [3, 0], sizes = [10, 84], strides = [1, 1]} : vector<14x84xf32> to vector<10x84xf32>
    %104 = vector.extract_strided_slice %99 {offsets = [4, 0], sizes = [10, 84], strides = [1, 1]} : vector<14x84xf32> to vector<10x84xf32>
    %105 = tpu.concatenate %100, %101, %102, %103, %104 in 1 : vector<10x84xf32>, vector<10x84xf32>, vector<10x84xf32>, vector<10x84xf32>, vector<10x84xf32> -> vector<10x420xf32>
    %106 = arith.truncf %105 : vector<10x420xf32> to vector<10x420xbf16>
    %c0_69 = arith.constant 0 : index
    %c0_70 = arith.constant 0 : index
    %107 = vector.load %arg6[%c0_69, %c0_70] : memref<420x160xbf16, #tpu.memory_space<vmem>>, vector<420x160xbf16>
    %cst_71 = arith.constant dense<0.000000e+00> : vector<10x160xf32>
    %108 = tpu.matmul %106, %107, %cst_71 {dimension_numbers = #tpu.dot_dimension_numbers<[1], [0], [0], [1], [0, 0, 1, 1], [], []>} : vector<10x420xbf16>, vector<420x160xbf16>, vector<10x160xf32> -> vector<10x160xf32>
    %109 = arith.truncf %108 : vector<10x160xf32> to vector<10x160xbf16>
    %c0_72 = arith.constant 0 : index
    %c0_73 = arith.constant 0 : index
    %c0_74 = arith.constant 0 : index
    %110 = vector.load %arg7[%c0_72, %c0_73, %c0_74] : memref<2x5x10xbf16, #tpu.memory_space<vmem>>, vector<1x5x10xbf16>
    %111 = vector.shape_cast %110 : vector<1x5x10xbf16> to vector<5x10xbf16>
    %cst_75 = arith.constant dense<0.000000e+00> : vector<5x160xf32>
    %112 = tpu.matmul %111, %109, %cst_75 {dimension_numbers = #tpu.dot_dimension_numbers<[1], [0], [0], [1], [0, 0, 1, 1], [], []>} : vector<5x10xbf16>, vector<10x160xbf16>, vector<5x160xf32> -> vector<5x160xf32>
    %c1_76 = arith.constant 1 : index
    %c0_77 = arith.constant 0 : index
    %c0_78 = arith.constant 0 : index
    %113 = vector.load %arg7[%c1_76, %c0_77, %c0_78] : memref<2x5x10xbf16, #tpu.memory_space<vmem>>, vector<1x5x10xbf16>
    %114 = vector.shape_cast %113 : vector<1x5x10xbf16> to vector<5x10xbf16>
    %cst_79 = arith.constant dense<0.000000e+00> : vector<5x160xf32>
    %115 = tpu.matmul %114, %109, %cst_79 {dimension_numbers = #tpu.dot_dimension_numbers<[1], [0], [0], [1], [0, 0, 1, 1], [], []>} : vector<5x10xbf16>, vector<10x160xbf16>, vector<5x160xf32> -> vector<5x160xf32>
    %116 = arith.maximumf %112, %115 : vector<5x160xf32>
    %117 = arith.truncf %116 : vector<5x160xf32> to vector<5x160xbf16>
    %c0_80 = arith.constant 0 : index
    %c0_81 = arith.constant 0 : index
    %c0_82 = arith.constant 0 : index
    %118 = vector.load %arg8[%c0_80, %c0_81, %c0_82] : memref<2x160x80xbf16, #tpu.memory_space<vmem>>, vector<1x160x80xbf16>
    %119 = vector.shape_cast %118 : vector<1x160x80xbf16> to vector<160x80xbf16>
    %cst_83 = arith.constant dense<0.000000e+00> : vector<5x80xf32>
    %120 = tpu.matmul %117, %119, %cst_83 {dimension_numbers = #tpu.dot_dimension_numbers<[1], [0], [0], [1], [0, 0, 1, 1], [], []>} : vector<5x160xbf16>, vector<160x80xbf16>, vector<5x80xf32> -> vector<5x80xf32>
    %c1_84 = arith.constant 1 : index
    %c0_85 = arith.constant 0 : index
    %c0_86 = arith.constant 0 : index
    %121 = vector.load %arg8[%c1_84, %c0_85, %c0_86] : memref<2x160x80xbf16, #tpu.memory_space<vmem>>, vector<1x160x80xbf16>
    %122 = vector.shape_cast %121 : vector<1x160x80xbf16> to vector<160x80xbf16>
    %cst_87 = arith.constant dense<0.000000e+00> : vector<5x80xf32>
    %123 = tpu.matmul %117, %122, %cst_87 {dimension_numbers = #tpu.dot_dimension_numbers<[1], [0], [0], [1], [0, 0, 1, 1], [], []>} : vector<5x160xbf16>, vector<160x80xbf16>, vector<5x80xf32> -> vector<5x80xf32>
    %124 = arith.maximumf %120, %123 : vector<5x80xf32>
    %c0_88 = arith.constant 0 : index
    %c0_89 = arith.constant 0 : index
    %125 = vector.load %arg9[%c0_88, %c0_89] : memref<1x80xf32, #tpu.memory_space<vmem>>, vector<1x80xf32>
    %126 = vector.broadcast %125 : vector<1x80xf32> to vector<5x80xf32>
    %127 = arith.addf %124, %126 : vector<5x80xf32>
    %cst_90 = arith.constant 0.000000e+00 : f32
    %128 = vector.broadcast %cst_90 : f32 to vector<5x80xf32>
    %129 = arith.maximumf %127, %128 : vector<5x80xf32>
    %130 = vector.extract_strided_slice %129 {offsets = [0, 0], sizes = [1, 80], strides = [1, 1]} : vector<5x80xf32> to vector<1x80xf32>
    %131 = vector.extract_strided_slice %129 {offsets = [1, 0], sizes = [1, 80], strides = [1, 1]} : vector<5x80xf32> to vector<1x80xf32>
    %132 = vector.extract_strided_slice %129 {offsets = [2, 0], sizes = [1, 80], strides = [1, 1]} : vector<5x80xf32> to vector<1x80xf32>
    %133 = vector.extract_strided_slice %129 {offsets = [3, 0], sizes = [1, 80], strides = [1, 1]} : vector<5x80xf32> to vector<1x80xf32>
    %134 = vector.extract_strided_slice %129 {offsets = [4, 0], sizes = [1, 80], strides = [1, 1]} : vector<5x80xf32> to vector<1x80xf32>
    %135 = tpu.concatenate %130, %131, %132, %133, %134 in 1 : vector<1x80xf32>, vector<1x80xf32>, vector<1x80xf32>, vector<1x80xf32>, vector<1x80xf32> -> vector<1x400xf32>
    %c2 = arith.constant 2 : index
    %c0_91 = arith.constant 0 : index
    %c0_92 = arith.constant 0 : index
    %136 = vector.load %arg1[%c2, %c0_91, %c0_92] : memref<4x32x32xf32, #tpu.memory_space<vmem>>, vector<1x32x32xf32>
    %137 = vector.shape_cast %136 : vector<1x32x32xf32> to vector<32x32xf32>
    %138 = vector.extract_strided_slice %137 {offsets = [0, 0], sizes = [28, 32], strides = [1, 1]} : vector<32x32xf32> to vector<28x32xf32>
    %139 = vector.extract_strided_slice %137 {offsets = [1, 0], sizes = [28, 32], strides = [1, 1]} : vector<32x32xf32> to vector<28x32xf32>
    %140 = vector.extract_strided_slice %137 {offsets = [2, 0], sizes = [28, 32], strides = [1, 1]} : vector<32x32xf32> to vector<28x32xf32>
    %141 = vector.extract_strided_slice %137 {offsets = [3, 0], sizes = [28, 32], strides = [1, 1]} : vector<32x32xf32> to vector<28x32xf32>
    %142 = vector.extract_strided_slice %137 {offsets = [4, 0], sizes = [28, 32], strides = [1, 1]} : vector<32x32xf32> to vector<28x32xf32>
    %143 = tpu.concatenate %138, %139, %140, %141, %142 in 1 : vector<28x32xf32>, vector<28x32xf32>, vector<28x32xf32>, vector<28x32xf32>, vector<28x32xf32> -> vector<28x160xf32>
    %144 = arith.truncf %143 : vector<28x160xf32> to vector<28x160xbf16>
    %c0_93 = arith.constant 0 : index
    %c0_94 = arith.constant 0 : index
    %145 = vector.load %arg2[%c0_93, %c0_94] : memref<160x168xbf16, #tpu.memory_space<vmem>>, vector<160x168xbf16>
    %cst_95 = arith.constant dense<0.000000e+00> : vector<28x168xf32>
    %146 = tpu.matmul %144, %145, %cst_95 {dimension_numbers = #tpu.dot_dimension_numbers<[1], [0], [0], [1], [0, 0, 1, 1], [], []>} : vector<28x160xbf16>, vector<160x168xbf16>, vector<28x168xf32> -> vector<28x168xf32>
    %147 = arith.truncf %146 : vector<28x168xf32> to vector<28x168xbf16>
    %c0_96 = arith.constant 0 : index
    %c0_97 = arith.constant 0 : index
    %c0_98 = arith.constant 0 : index
    %148 = vector.load %arg3[%c0_96, %c0_97, %c0_98] : memref<2x14x28xbf16, #tpu.memory_space<vmem>>, vector<1x14x28xbf16>
    %149 = vector.shape_cast %148 : vector<1x14x28xbf16> to vector<14x28xbf16>
    %cst_99 = arith.constant dense<0.000000e+00> : vector<14x168xf32>
    %150 = tpu.matmul %149, %147, %cst_99 {dimension_numbers = #tpu.dot_dimension_numbers<[1], [0], [0], [1], [0, 0, 1, 1], [], []>} : vector<14x28xbf16>, vector<28x168xbf16>, vector<14x168xf32> -> vector<14x168xf32>
    %c1_100 = arith.constant 1 : index
    %c0_101 = arith.constant 0 : index
    %c0_102 = arith.constant 0 : index
    %151 = vector.load %arg3[%c1_100, %c0_101, %c0_102] : memref<2x14x28xbf16, #tpu.memory_space<vmem>>, vector<1x14x28xbf16>
    %152 = vector.shape_cast %151 : vector<1x14x28xbf16> to vector<14x28xbf16>
    %cst_103 = arith.constant dense<0.000000e+00> : vector<14x168xf32>
    %153 = tpu.matmul %152, %147, %cst_103 {dimension_numbers = #tpu.dot_dimension_numbers<[1], [0], [0], [1], [0, 0, 1, 1], [], []>} : vector<14x28xbf16>, vector<28x168xbf16>, vector<14x168xf32> -> vector<14x168xf32>
    %154 = arith.maximumf %150, %153 : vector<14x168xf32>
    %155 = arith.truncf %154 : vector<14x168xf32> to vector<14x168xbf16>
    %c0_104 = arith.constant 0 : index
    %c0_105 = arith.constant 0 : index
    %c0_106 = arith.constant 0 : index
    %156 = vector.load %arg4[%c0_104, %c0_105, %c0_106] : memref<2x168x84xbf16, #tpu.memory_space<vmem>>, vector<1x168x84xbf16>
    %157 = vector.shape_cast %156 : vector<1x168x84xbf16> to vector<168x84xbf16>
    %cst_107 = arith.constant dense<0.000000e+00> : vector<14x84xf32>
    %158 = tpu.matmul %155, %157, %cst_107 {dimension_numbers = #tpu.dot_dimension_numbers<[1], [0], [0], [1], [0, 0, 1, 1], [], []>} : vector<14x168xbf16>, vector<168x84xbf16>, vector<14x84xf32> -> vector<14x84xf32>
    %c1_108 = arith.constant 1 : index
    %c0_109 = arith.constant 0 : index
    %c0_110 = arith.constant 0 : index
    %159 = vector.load %arg4[%c1_108, %c0_109, %c0_110] : memref<2x168x84xbf16, #tpu.memory_space<vmem>>, vector<1x168x84xbf16>
    %160 = vector.shape_cast %159 : vector<1x168x84xbf16> to vector<168x84xbf16>
    %cst_111 = arith.constant dense<0.000000e+00> : vector<14x84xf32>
    %161 = tpu.matmul %155, %160, %cst_111 {dimension_numbers = #tpu.dot_dimension_numbers<[1], [0], [0], [1], [0, 0, 1, 1], [], []>} : vector<14x168xbf16>, vector<168x84xbf16>, vector<14x84xf32> -> vector<14x84xf32>
    %162 = arith.maximumf %158, %161 : vector<14x84xf32>
    %c0_112 = arith.constant 0 : index
    %c0_113 = arith.constant 0 : index
    %163 = vector.load %arg5[%c0_112, %c0_113] : memref<1x84xf32, #tpu.memory_space<vmem>>, vector<1x84xf32>
    %164 = vector.broadcast %163 : vector<1x84xf32> to vector<14x84xf32>
    %165 = arith.addf %162, %164 : vector<14x84xf32>
    %cst_114 = arith.constant 0.000000e+00 : f32
    %166 = vector.broadcast %cst_114 : f32 to vector<14x84xf32>
    %167 = arith.maximumf %165, %166 : vector<14x84xf32>
    %168 = vector.extract_strided_slice %167 {offsets = [0, 0], sizes = [10, 84], strides = [1, 1]} : vector<14x84xf32> to vector<10x84xf32>
    %169 = vector.extract_strided_slice %167 {offsets = [1, 0], sizes = [10, 84], strides = [1, 1]} : vector<14x84xf32> to vector<10x84xf32>
    %170 = vector.extract_strided_slice %167 {offsets = [2, 0], sizes = [10, 84], strides = [1, 1]} : vector<14x84xf32> to vector<10x84xf32>
    %171 = vector.extract_strided_slice %167 {offsets = [3, 0], sizes = [10, 84], strides = [1, 1]} : vector<14x84xf32> to vector<10x84xf32>
    %172 = vector.extract_strided_slice %167 {offsets = [4, 0], sizes = [10, 84], strides = [1, 1]} : vector<14x84xf32> to vector<10x84xf32>
    %173 = tpu.concatenate %168, %169, %170, %171, %172 in 1 : vector<10x84xf32>, vector<10x84xf32>, vector<10x84xf32>, vector<10x84xf32>, vector<10x84xf32> -> vector<10x420xf32>
    %174 = arith.truncf %173 : vector<10x420xf32> to vector<10x420xbf16>
    %c0_115 = arith.constant 0 : index
    %c0_116 = arith.constant 0 : index
    %175 = vector.load %arg6[%c0_115, %c0_116] : memref<420x160xbf16, #tpu.memory_space<vmem>>, vector<420x160xbf16>
    %cst_117 = arith.constant dense<0.000000e+00> : vector<10x160xf32>
    %176 = tpu.matmul %174, %175, %cst_117 {dimension_numbers = #tpu.dot_dimension_numbers<[1], [0], [0], [1], [0, 0, 1, 1], [], []>} : vector<10x420xbf16>, vector<420x160xbf16>, vector<10x160xf32> -> vector<10x160xf32>
    %177 = arith.truncf %176 : vector<10x160xf32> to vector<10x160xbf16>
    %c0_118 = arith.constant 0 : index
    %c0_119 = arith.constant 0 : index
    %c0_120 = arith.constant 0 : index
    %178 = vector.load %arg7[%c0_118, %c0_119, %c0_120] : memref<2x5x10xbf16, #tpu.memory_space<vmem>>, vector<1x5x10xbf16>
    %179 = vector.shape_cast %178 : vector<1x5x10xbf16> to vector<5x10xbf16>
    %cst_121 = arith.constant dense<0.000000e+00> : vector<5x160xf32>
    %180 = tpu.matmul %179, %177, %cst_121 {dimension_numbers = #tpu.dot_dimension_numbers<[1], [0], [0], [1], [0, 0, 1, 1], [], []>} : vector<5x10xbf16>, vector<10x160xbf16>, vector<5x160xf32> -> vector<5x160xf32>
    %c1_122 = arith.constant 1 : index
    %c0_123 = arith.constant 0 : index
    %c0_124 = arith.constant 0 : index
    %181 = vector.load %arg7[%c1_122, %c0_123, %c0_124] : memref<2x5x10xbf16, #tpu.memory_space<vmem>>, vector<1x5x10xbf16>
    %182 = vector.shape_cast %181 : vector<1x5x10xbf16> to vector<5x10xbf16>
    %cst_125 = arith.constant dense<0.000000e+00> : vector<5x160xf32>
    %183 = tpu.matmul %182, %177, %cst_125 {dimension_numbers = #tpu.dot_dimension_numbers<[1], [0], [0], [1], [0, 0, 1, 1], [], []>} : vector<5x10xbf16>, vector<10x160xbf16>, vector<5x160xf32> -> vector<5x160xf32>
    %184 = arith.maximumf %180, %183 : vector<5x160xf32>
    %185 = arith.truncf %184 : vector<5x160xf32> to vector<5x160xbf16>
    %c0_126 = arith.constant 0 : index
    %c0_127 = arith.constant 0 : index
    %c0_128 = arith.constant 0 : index
    %186 = vector.load %arg8[%c0_126, %c0_127, %c0_128] : memref<2x160x80xbf16, #tpu.memory_space<vmem>>, vector<1x160x80xbf16>
    %187 = vector.shape_cast %186 : vector<1x160x80xbf16> to vector<160x80xbf16>
    %cst_129 = arith.constant dense<0.000000e+00> : vector<5x80xf32>
    %188 = tpu.matmul %185, %187, %cst_129 {dimension_numbers = #tpu.dot_dimension_numbers<[1], [0], [0], [1], [0, 0, 1, 1], [], []>} : vector<5x160xbf16>, vector<160x80xbf16>, vector<5x80xf32> -> vector<5x80xf32>
    %c1_130 = arith.constant 1 : index
    %c0_131 = arith.constant 0 : index
    %c0_132 = arith.constant 0 : index
    %189 = vector.load %arg8[%c1_130, %c0_131, %c0_132] : memref<2x160x80xbf16, #tpu.memory_space<vmem>>, vector<1x160x80xbf16>
    %190 = vector.shape_cast %189 : vector<1x160x80xbf16> to vector<160x80xbf16>
    %cst_133 = arith.constant dense<0.000000e+00> : vector<5x80xf32>
    %191 = tpu.matmul %185, %190, %cst_133 {dimension_numbers = #tpu.dot_dimension_numbers<[1], [0], [0], [1], [0, 0, 1, 1], [], []>} : vector<5x160xbf16>, vector<160x80xbf16>, vector<5x80xf32> -> vector<5x80xf32>
    %192 = arith.maximumf %188, %191 : vector<5x80xf32>
    %c0_134 = arith.constant 0 : index
    %c0_135 = arith.constant 0 : index
    %193 = vector.load %arg9[%c0_134, %c0_135] : memref<1x80xf32, #tpu.memory_space<vmem>>, vector<1x80xf32>
    %194 = vector.broadcast %193 : vector<1x80xf32> to vector<5x80xf32>
    %195 = arith.addf %192, %194 : vector<5x80xf32>
    %cst_136 = arith.constant 0.000000e+00 : f32
    %196 = vector.broadcast %cst_136 : f32 to vector<5x80xf32>
    %197 = arith.maximumf %195, %196 : vector<5x80xf32>
    %198 = vector.extract_strided_slice %197 {offsets = [0, 0], sizes = [1, 80], strides = [1, 1]} : vector<5x80xf32> to vector<1x80xf32>
    %199 = vector.extract_strided_slice %197 {offsets = [1, 0], sizes = [1, 80], strides = [1, 1]} : vector<5x80xf32> to vector<1x80xf32>
    %200 = vector.extract_strided_slice %197 {offsets = [2, 0], sizes = [1, 80], strides = [1, 1]} : vector<5x80xf32> to vector<1x80xf32>
    %201 = vector.extract_strided_slice %197 {offsets = [3, 0], sizes = [1, 80], strides = [1, 1]} : vector<5x80xf32> to vector<1x80xf32>
    %202 = vector.extract_strided_slice %197 {offsets = [4, 0], sizes = [1, 80], strides = [1, 1]} : vector<5x80xf32> to vector<1x80xf32>
    %203 = tpu.concatenate %198, %199, %200, %201, %202 in 1 : vector<1x80xf32>, vector<1x80xf32>, vector<1x80xf32>, vector<1x80xf32>, vector<1x80xf32> -> vector<1x400xf32>
    %c3 = arith.constant 3 : index
    %c0_137 = arith.constant 0 : index
    %c0_138 = arith.constant 0 : index
    %204 = vector.load %arg1[%c3, %c0_137, %c0_138] : memref<4x32x32xf32, #tpu.memory_space<vmem>>, vector<1x32x32xf32>
    %205 = vector.shape_cast %204 : vector<1x32x32xf32> to vector<32x32xf32>
    %206 = vector.extract_strided_slice %205 {offsets = [0, 0], sizes = [28, 32], strides = [1, 1]} : vector<32x32xf32> to vector<28x32xf32>
    %207 = vector.extract_strided_slice %205 {offsets = [1, 0], sizes = [28, 32], strides = [1, 1]} : vector<32x32xf32> to vector<28x32xf32>
    %208 = vector.extract_strided_slice %205 {offsets = [2, 0], sizes = [28, 32], strides = [1, 1]} : vector<32x32xf32> to vector<28x32xf32>
    %209 = vector.extract_strided_slice %205 {offsets = [3, 0], sizes = [28, 32], strides = [1, 1]} : vector<32x32xf32> to vector<28x32xf32>
    %210 = vector.extract_strided_slice %205 {offsets = [4, 0], sizes = [28, 32], strides = [1, 1]} : vector<32x32xf32> to vector<28x32xf32>
    %211 = tpu.concatenate %206, %207, %208, %209, %210 in 1 : vector<28x32xf32>, vector<28x32xf32>, vector<28x32xf32>, vector<28x32xf32>, vector<28x32xf32> -> vector<28x160xf32>
    %212 = arith.truncf %211 : vector<28x160xf32> to vector<28x160xbf16>
    %c0_139 = arith.constant 0 : index
    %c0_140 = arith.constant 0 : index
    %213 = vector.load %arg2[%c0_139, %c0_140] : memref<160x168xbf16, #tpu.memory_space<vmem>>, vector<160x168xbf16>
    %cst_141 = arith.constant dense<0.000000e+00> : vector<28x168xf32>
    %214 = tpu.matmul %212, %213, %cst_141 {dimension_numbers = #tpu.dot_dimension_numbers<[1], [0], [0], [1], [0, 0, 1, 1], [], []>} : vector<28x160xbf16>, vector<160x168xbf16>, vector<28x168xf32> -> vector<28x168xf32>
    %215 = arith.truncf %214 : vector<28x168xf32> to vector<28x168xbf16>
    %c0_142 = arith.constant 0 : index
    %c0_143 = arith.constant 0 : index
    %c0_144 = arith.constant 0 : index
    %216 = vector.load %arg3[%c0_142, %c0_143, %c0_144] : memref<2x14x28xbf16, #tpu.memory_space<vmem>>, vector<1x14x28xbf16>
    %217 = vector.shape_cast %216 : vector<1x14x28xbf16> to vector<14x28xbf16>
    %cst_145 = arith.constant dense<0.000000e+00> : vector<14x168xf32>
    %218 = tpu.matmul %217, %215, %cst_145 {dimension_numbers = #tpu.dot_dimension_numbers<[1], [0], [0], [1], [0, 0, 1, 1], [], []>} : vector<14x28xbf16>, vector<28x168xbf16>, vector<14x168xf32> -> vector<14x168xf32>
    %c1_146 = arith.constant 1 : index
    %c0_147 = arith.constant 0 : index
    %c0_148 = arith.constant 0 : index
    %219 = vector.load %arg3[%c1_146, %c0_147, %c0_148] : memref<2x14x28xbf16, #tpu.memory_space<vmem>>, vector<1x14x28xbf16>
    %220 = vector.shape_cast %219 : vector<1x14x28xbf16> to vector<14x28xbf16>
    %cst_149 = arith.constant dense<0.000000e+00> : vector<14x168xf32>
    %221 = tpu.matmul %220, %215, %cst_149 {dimension_numbers = #tpu.dot_dimension_numbers<[1], [0], [0], [1], [0, 0, 1, 1], [], []>} : vector<14x28xbf16>, vector<28x168xbf16>, vector<14x168xf32> -> vector<14x168xf32>
    %222 = arith.maximumf %218, %221 : vector<14x168xf32>
    %223 = arith.truncf %222 : vector<14x168xf32> to vector<14x168xbf16>
    %c0_150 = arith.constant 0 : index
    %c0_151 = arith.constant 0 : index
    %c0_152 = arith.constant 0 : index
    %224 = vector.load %arg4[%c0_150, %c0_151, %c0_152] : memref<2x168x84xbf16, #tpu.memory_space<vmem>>, vector<1x168x84xbf16>
    %225 = vector.shape_cast %224 : vector<1x168x84xbf16> to vector<168x84xbf16>
    %cst_153 = arith.constant dense<0.000000e+00> : vector<14x84xf32>
    %226 = tpu.matmul %223, %225, %cst_153 {dimension_numbers = #tpu.dot_dimension_numbers<[1], [0], [0], [1], [0, 0, 1, 1], [], []>} : vector<14x168xbf16>, vector<168x84xbf16>, vector<14x84xf32> -> vector<14x84xf32>
    %c1_154 = arith.constant 1 : index
    %c0_155 = arith.constant 0 : index
    %c0_156 = arith.constant 0 : index
    %227 = vector.load %arg4[%c1_154, %c0_155, %c0_156] : memref<2x168x84xbf16, #tpu.memory_space<vmem>>, vector<1x168x84xbf16>
    %228 = vector.shape_cast %227 : vector<1x168x84xbf16> to vector<168x84xbf16>
    %cst_157 = arith.constant dense<0.000000e+00> : vector<14x84xf32>
    %229 = tpu.matmul %223, %228, %cst_157 {dimension_numbers = #tpu.dot_dimension_numbers<[1], [0], [0], [1], [0, 0, 1, 1], [], []>} : vector<14x168xbf16>, vector<168x84xbf16>, vector<14x84xf32> -> vector<14x84xf32>
    %230 = arith.maximumf %226, %229 : vector<14x84xf32>
    %c0_158 = arith.constant 0 : index
    %c0_159 = arith.constant 0 : index
    %231 = vector.load %arg5[%c0_158, %c0_159] : memref<1x84xf32, #tpu.memory_space<vmem>>, vector<1x84xf32>
    %232 = vector.broadcast %231 : vector<1x84xf32> to vector<14x84xf32>
    %233 = arith.addf %230, %232 : vector<14x84xf32>
    %cst_160 = arith.constant 0.000000e+00 : f32
    %234 = vector.broadcast %cst_160 : f32 to vector<14x84xf32>
    %235 = arith.maximumf %233, %234 : vector<14x84xf32>
    %236 = vector.extract_strided_slice %235 {offsets = [0, 0], sizes = [10, 84], strides = [1, 1]} : vector<14x84xf32> to vector<10x84xf32>
    %237 = vector.extract_strided_slice %235 {offsets = [1, 0], sizes = [10, 84], strides = [1, 1]} : vector<14x84xf32> to vector<10x84xf32>
    %238 = vector.extract_strided_slice %235 {offsets = [2, 0], sizes = [10, 84], strides = [1, 1]} : vector<14x84xf32> to vector<10x84xf32>
    %239 = vector.extract_strided_slice %235 {offsets = [3, 0], sizes = [10, 84], strides = [1, 1]} : vector<14x84xf32> to vector<10x84xf32>
    %240 = vector.extract_strided_slice %235 {offsets = [4, 0], sizes = [10, 84], strides = [1, 1]} : vector<14x84xf32> to vector<10x84xf32>
    %241 = tpu.concatenate %236, %237, %238, %239, %240 in 1 : vector<10x84xf32>, vector<10x84xf32>, vector<10x84xf32>, vector<10x84xf32>, vector<10x84xf32> -> vector<10x420xf32>
    %242 = arith.truncf %241 : vector<10x420xf32> to vector<10x420xbf16>
    %c0_161 = arith.constant 0 : index
    %c0_162 = arith.constant 0 : index
    %243 = vector.load %arg6[%c0_161, %c0_162] : memref<420x160xbf16, #tpu.memory_space<vmem>>, vector<420x160xbf16>
    %cst_163 = arith.constant dense<0.000000e+00> : vector<10x160xf32>
    %244 = tpu.matmul %242, %243, %cst_163 {dimension_numbers = #tpu.dot_dimension_numbers<[1], [0], [0], [1], [0, 0, 1, 1], [], []>} : vector<10x420xbf16>, vector<420x160xbf16>, vector<10x160xf32> -> vector<10x160xf32>
    %245 = arith.truncf %244 : vector<10x160xf32> to vector<10x160xbf16>
    %c0_164 = arith.constant 0 : index
    %c0_165 = arith.constant 0 : index
    %c0_166 = arith.constant 0 : index
    %246 = vector.load %arg7[%c0_164, %c0_165, %c0_166] : memref<2x5x10xbf16, #tpu.memory_space<vmem>>, vector<1x5x10xbf16>
    %247 = vector.shape_cast %246 : vector<1x5x10xbf16> to vector<5x10xbf16>
    %cst_167 = arith.constant dense<0.000000e+00> : vector<5x160xf32>
    %248 = tpu.matmul %247, %245, %cst_167 {dimension_numbers = #tpu.dot_dimension_numbers<[1], [0], [0], [1], [0, 0, 1, 1], [], []>} : vector<5x10xbf16>, vector<10x160xbf16>, vector<5x160xf32> -> vector<5x160xf32>
    %c1_168 = arith.constant 1 : index
    %c0_169 = arith.constant 0 : index
    %c0_170 = arith.constant 0 : index
    %249 = vector.load %arg7[%c1_168, %c0_169, %c0_170] : memref<2x5x10xbf16, #tpu.memory_space<vmem>>, vector<1x5x10xbf16>
    %250 = vector.shape_cast %249 : vector<1x5x10xbf16> to vector<5x10xbf16>
    %cst_171 = arith.constant dense<0.000000e+00> : vector<5x160xf32>
    %251 = tpu.matmul %250, %245, %cst_171 {dimension_numbers = #tpu.dot_dimension_numbers<[1], [0], [0], [1], [0, 0, 1, 1], [], []>} : vector<5x10xbf16>, vector<10x160xbf16>, vector<5x160xf32> -> vector<5x160xf32>
    %252 = arith.maximumf %248, %251 : vector<5x160xf32>
    %253 = arith.truncf %252 : vector<5x160xf32> to vector<5x160xbf16>
    %c0_172 = arith.constant 0 : index
    %c0_173 = arith.constant 0 : index
    %c0_174 = arith.constant 0 : index
    %254 = vector.load %arg8[%c0_172, %c0_173, %c0_174] : memref<2x160x80xbf16, #tpu.memory_space<vmem>>, vector<1x160x80xbf16>
    %255 = vector.shape_cast %254 : vector<1x160x80xbf16> to vector<160x80xbf16>
    %cst_175 = arith.constant dense<0.000000e+00> : vector<5x80xf32>
    %256 = tpu.matmul %253, %255, %cst_175 {dimension_numbers = #tpu.dot_dimension_numbers<[1], [0], [0], [1], [0, 0, 1, 1], [], []>} : vector<5x160xbf16>, vector<160x80xbf16>, vector<5x80xf32> -> vector<5x80xf32>
    %c1_176 = arith.constant 1 : index
    %c0_177 = arith.constant 0 : index
    %c0_178 = arith.constant 0 : index
    %257 = vector.load %arg8[%c1_176, %c0_177, %c0_178] : memref<2x160x80xbf16, #tpu.memory_space<vmem>>, vector<1x160x80xbf16>
    %258 = vector.shape_cast %257 : vector<1x160x80xbf16> to vector<160x80xbf16>
    %cst_179 = arith.constant dense<0.000000e+00> : vector<5x80xf32>
    %259 = tpu.matmul %253, %258, %cst_179 {dimension_numbers = #tpu.dot_dimension_numbers<[1], [0], [0], [1], [0, 0, 1, 1], [], []>} : vector<5x160xbf16>, vector<160x80xbf16>, vector<5x80xf32> -> vector<5x80xf32>
    %260 = arith.maximumf %256, %259 : vector<5x80xf32>
    %c0_180 = arith.constant 0 : index
    %c0_181 = arith.constant 0 : index
    %261 = vector.load %arg9[%c0_180, %c0_181] : memref<1x80xf32, #tpu.memory_space<vmem>>, vector<1x80xf32>
    %262 = vector.broadcast %261 : vector<1x80xf32> to vector<5x80xf32>
    %263 = arith.addf %260, %262 : vector<5x80xf32>
    %cst_182 = arith.constant 0.000000e+00 : f32
    %264 = vector.broadcast %cst_182 : f32 to vector<5x80xf32>
    %265 = arith.maximumf %263, %264 : vector<5x80xf32>
    %266 = vector.extract_strided_slice %265 {offsets = [0, 0], sizes = [1, 80], strides = [1, 1]} : vector<5x80xf32> to vector<1x80xf32>
    %267 = vector.extract_strided_slice %265 {offsets = [1, 0], sizes = [1, 80], strides = [1, 1]} : vector<5x80xf32> to vector<1x80xf32>
    %268 = vector.extract_strided_slice %265 {offsets = [2, 0], sizes = [1, 80], strides = [1, 1]} : vector<5x80xf32> to vector<1x80xf32>
    %269 = vector.extract_strided_slice %265 {offsets = [3, 0], sizes = [1, 80], strides = [1, 1]} : vector<5x80xf32> to vector<1x80xf32>
    %270 = vector.extract_strided_slice %265 {offsets = [4, 0], sizes = [1, 80], strides = [1, 1]} : vector<5x80xf32> to vector<1x80xf32>
    %271 = tpu.concatenate %266, %267, %268, %269, %270 in 1 : vector<1x80xf32>, vector<1x80xf32>, vector<1x80xf32>, vector<1x80xf32>, vector<1x80xf32> -> vector<1x400xf32>
    %272 = tpu.concatenate %67, %135, %203, %271 in 0 : vector<1x400xf32>, vector<1x400xf32>, vector<1x400xf32>, vector<1x400xf32> -> vector<4x400xf32>
    %273 = arith.truncf %272 : vector<4x400xf32> to vector<4x400xbf16>
    %c0_183 = arith.constant 0 : index
    %c0_184 = arith.constant 0 : index
    %274 = vector.load %arg10[%c0_183, %c0_184] : memref<400x120xbf16, #tpu.memory_space<vmem>>, vector<400x120xbf16>
    %cst_185 = arith.constant dense<0.000000e+00> : vector<4x120xf32>
    %275 = tpu.matmul %273, %274, %cst_185 {dimension_numbers = #tpu.dot_dimension_numbers<[1], [0], [0], [1], [0, 0, 1, 1], [], []>} : vector<4x400xbf16>, vector<400x120xbf16>, vector<4x120xf32> -> vector<4x120xf32>
    %c0_186 = arith.constant 0 : index
    %c0_187 = arith.constant 0 : index
    %276 = vector.load %arg11[%c0_186, %c0_187] : memref<1x120xf32, #tpu.memory_space<vmem>>, vector<1x120xf32>
    %277 = vector.broadcast %276 : vector<1x120xf32> to vector<4x120xf32>
    %278 = arith.addf %275, %277 : vector<4x120xf32>
    %cst_188 = arith.constant 0.000000e+00 : f32
    %279 = vector.broadcast %cst_188 : f32 to vector<4x120xf32>
    %280 = arith.maximumf %278, %279 : vector<4x120xf32>
    %281 = arith.truncf %280 : vector<4x120xf32> to vector<4x120xbf16>
    %c0_189 = arith.constant 0 : index
    %c0_190 = arith.constant 0 : index
    %282 = vector.load %arg12[%c0_189, %c0_190] : memref<120x84xbf16, #tpu.memory_space<vmem>>, vector<120x84xbf16>
    %cst_191 = arith.constant dense<0.000000e+00> : vector<4x84xf32>
    %283 = tpu.matmul %281, %282, %cst_191 {dimension_numbers = #tpu.dot_dimension_numbers<[1], [0], [0], [1], [0, 0, 1, 1], [], []>} : vector<4x120xbf16>, vector<120x84xbf16>, vector<4x84xf32> -> vector<4x84xf32>
    %c0_192 = arith.constant 0 : index
    %c0_193 = arith.constant 0 : index
    %284 = vector.load %arg13[%c0_192, %c0_193] : memref<1x84xf32, #tpu.memory_space<vmem>>, vector<1x84xf32>
    %285 = vector.broadcast %284 : vector<1x84xf32> to vector<4x84xf32>
    %286 = arith.addf %283, %285 : vector<4x84xf32>
    %cst_194 = arith.constant 0.000000e+00 : f32
    %287 = vector.broadcast %cst_194 : f32 to vector<4x84xf32>
    %288 = arith.maximumf %286, %287 : vector<4x84xf32>
    %289 = arith.truncf %288 : vector<4x84xf32> to vector<4x84xbf16>
    %c0_195 = arith.constant 0 : index
    %c0_196 = arith.constant 0 : index
    %290 = vector.load %arg14[%c0_195, %c0_196] : memref<84x10xbf16, #tpu.memory_space<vmem>>, vector<84x10xbf16>
    %cst_197 = arith.constant dense<0.000000e+00> : vector<4x10xf32>
    %291 = tpu.matmul %289, %290, %cst_197 {dimension_numbers = #tpu.dot_dimension_numbers<[1], [0], [0], [1], [0, 0, 1, 1], [], []>} : vector<4x84xbf16>, vector<84x10xbf16>, vector<4x10xf32> -> vector<4x10xf32>
    %c0_198 = arith.constant 0 : index
    %c0_199 = arith.constant 0 : index
    %292 = vector.load %arg15[%c0_198, %c0_199] : memref<1x10xf32, #tpu.memory_space<vmem>>, vector<1x10xf32>
    %293 = vector.broadcast %292 : vector<1x10xf32> to vector<4x10xf32>
    %294 = arith.addf %291, %293 : vector<4x10xf32>
    %cst_200 = arith.constant dense<0xFF800000> : vector<4xf32>
    %295 = vector.multi_reduction <maximumf>, %294, %cst_200 [1] : vector<4x10xf32> to vector<4xf32>
    %296 = vector.shape_cast %295 : vector<4xf32> to vector<4x1xf32>
    %297 = vector.broadcast %296 : vector<4x1xf32> to vector<4x10xf32>
    %298 = arith.subf %294, %297 : vector<4x10xf32>
    %299 = math.exp %298 : vector<4x10xf32>
    %cst_201 = arith.constant dense<0.000000e+00> : vector<4xf32>
    %300 = vector.multi_reduction <add>, %299, %cst_201 [1] : vector<4x10xf32> to vector<4xf32>
    %301 = vector.shape_cast %300 : vector<4xf32> to vector<4x1xf32>
    %302 = math.log %301 : vector<4x1xf32>
    %303 = vector.broadcast %302 : vector<4x1xf32> to vector<4x10xf32>
    %304 = arith.subf %298, %303 : vector<4x10xf32>
    %c0_202 = arith.constant 0 : index
    %c0_203 = arith.constant 0 : index
    %c0_204 = arith.constant 0 : index
    %305 = vector.load %arg16[%c0_202, %c0_203, %c0_204] : memref<1x4x10xf32, #tpu.memory_space<vmem>>, vector<1x4x10xf32>
    %306 = vector.shape_cast %305 : vector<1x4x10xf32> to vector<4x10xf32>
    %307 = vector.shape_cast %304 : vector<4x10xf32> to vector<1x4x10xf32>
    tpu.vector_store %arg16[%c0_202, %c0_203, %c0_204], %307 {strides = array<i32>} : memref<1x4x10xf32, #tpu.memory_space<vmem>>, vector<1x4x10xf32>,
    return
  }
  func.func @transform_0(%arg0: i32) -> (i32, i32, i32) {
    %c0_i32 = arith.constant 0 : i32
    %c0_i32_0 = arith.constant 0 : i32
    %c0_i32_1 = arith.constant 0 : i32
    return %arg0, %c0_i32, %c0_i32_0 : i32, i32, i32
  }
  func.func @transform_1(%arg0: i32) -> (i32, i32) {
    %c0_i32 = arith.constant 0 : i32
    %c0_i32_0 = arith.constant 0 : i32
    %c0_i32_1 = arith.constant 0 : i32
    return %c0_i32, %c0_i32_0 : i32, i32
  }
  func.func @transform_2(%arg0: i32) -> (i32, i32, i32) {
    %c0_i32 = arith.constant 0 : i32
    %c0_i32_0 = arith.constant 0 : i32
    %c0_i32_1 = arith.constant 0 : i32
    %c0_i32_2 = arith.constant 0 : i32
    return %c0_i32, %c0_i32_0, %c0_i32_1 : i32, i32, i32
  }
  func.func @transform_3(%arg0: i32) -> (i32, i32, i32) {
    %c0_i32 = arith.constant 0 : i32
    %c0_i32_0 = arith.constant 0 : i32
    %c0_i32_1 = arith.constant 0 : i32
    %c0_i32_2 = arith.constant 0 : i32
    return %c0_i32, %c0_i32_0, %c0_i32_1 : i32, i32, i32
  }
  func.func @transform_4(%arg0: i32) -> (i32, i32) {
    %c0_i32 = arith.constant 0 : i32
    %c0_i32_0 = arith.constant 0 : i32
    %c0_i32_1 = arith.constant 0 : i32
    return %c0_i32, %c0_i32_0 : i32, i32
  }
  func.func @transform_5(%arg0: i32) -> (i32, i32) {
    %c0_i32 = arith.constant 0 : i32
    %c0_i32_0 = arith.constant 0 : i32
    %c0_i32_1 = arith.constant 0 : i32
    return %c0_i32, %c0_i32_0 : i32, i32
  }
  func.func @transform_6(%arg0: i32) -> (i32, i32, i32) {
    %c0_i32 = arith.constant 0 : i32
    %c0_i32_0 = arith.constant 0 : i32
    %c0_i32_1 = arith.constant 0 : i32
    %c0_i32_2 = arith.constant 0 : i32
    return %c0_i32, %c0_i32_0, %c0_i32_1 : i32, i32, i32
  }
  func.func @transform_7(%arg0: i32) -> (i32, i32, i32) {
    %c0_i32 = arith.constant 0 : i32
    %c0_i32_0 = arith.constant 0 : i32
    %c0_i32_1 = arith.constant 0 : i32
    %c0_i32_2 = arith.constant 0 : i32
    return %c0_i32, %c0_i32_0, %c0_i32_1 : i32, i32, i32
  }
  func.func @transform_8(%arg0: i32) -> (i32, i32) {
    %c0_i32 = arith.constant 0 : i32
    %c0_i32_0 = arith.constant 0 : i32
    %c0_i32_1 = arith.constant 0 : i32
    return %c0_i32, %c0_i32_0 : i32, i32
  }
  func.func @transform_9(%arg0: i32) -> (i32, i32) {
    %c0_i32 = arith.constant 0 : i32
    %c0_i32_0 = arith.constant 0 : i32
    %c0_i32_1 = arith.constant 0 : i32
    return %c0_i32, %c0_i32_0 : i32, i32
  }
  func.func @transform_10(%arg0: i32) -> (i32, i32) {
    %c0_i32 = arith.constant 0 : i32
    %c0_i32_0 = arith.constant 0 : i32
    %c0_i32_1 = arith.constant 0 : i32
    return %c0_i32, %c0_i32_0 : i32, i32
  }
  func.func @transform_11(%arg0: i32) -> (i32, i32) {
    %c0_i32 = arith.constant 0 : i32
    %c0_i32_0 = arith.constant 0 : i32
    %c0_i32_1 = arith.constant 0 : i32
    return %c0_i32, %c0_i32_0 : i32, i32
  }
  func.func @transform_12(%arg0: i32) -> (i32, i32) {
    %c0_i32 = arith.constant 0 : i32
    %c0_i32_0 = arith.constant 0 : i32
    %c0_i32_1 = arith.constant 0 : i32
    return %c0_i32, %c0_i32_0 : i32, i32
  }
  func.func @transform_13(%arg0: i32) -> (i32, i32) {
    %c0_i32 = arith.constant 0 : i32
    %c0_i32_0 = arith.constant 0 : i32
    %c0_i32_1 = arith.constant 0 : i32
    return %c0_i32, %c0_i32_0 : i32, i32
  }
  func.func @transform_14(%arg0: i32) -> (i32, i32) {
    %c0_i32 = arith.constant 0 : i32
    %c0_i32_0 = arith.constant 0 : i32
    %c0_i32_1 = arith.constant 0 : i32
    return %c0_i32, %c0_i32_0 : i32, i32
  }
  func.func @transform_15(%arg0: i32) -> (i32, i32, i32) {
    %c0_i32 = arith.constant 0 : i32
    %c0_i32_0 = arith.constant 0 : i32
    %c0_i32_1 = arith.constant 0 : i32
    return %arg0, %c0_i32, %c0_i32_0 : i32, i32, i32
  }
}

</mosaic_0001>

<bundles_post_ra>
// kernel: lenet_forward.1
= control target key start
LH: loop header
LB: loop body
LE: loop exit
PB: predicated region body
PF: predicated region fallthrough
CT: control target
= control target key end

     0   :  { %s8900_s0 = inlined_call_operand.vmem [shape: f32[8,32,32], index: 0, kind: input, shape index: {}]   ;;  %s8901_s1 = inlined_call_operand.vmem [shape: bf16[160,168], index: 1, kind: input, shape index: {}]   ;;  %s8902_s2 = inlined_call_operand.vmem [shape: bf16[2,14,28], index: 2, kind: input, shape index: {}]   ;;  %s8903_s3 = inlined_call_operand.vmem [shape: bf16[2,168,84], index: 3, kind: input, shape index: {}]   ;;  %s8904_s4 = inlined_call_operand.hbm [shape: f32[1,84], index: 4, kind: input, shape index: {}]   ;;  %s8905_s5 = inlined_call_operand.vmem [shape: bf16[420,160], index: 5, kind: input, shape index: {}]   ;;  %s8906_s6 = inlined_call_operand.vmem [shape: bf16[2,5,10], index: 6, kind: input, shape index: {}]   ;;  %s8907_s7 = inlined_call_operand.vmem [shape: bf16[2,160,80], index: 7, kind: input, shape index: {}]   ;;  %s8908_s8 = inlined_call_operand.hbm [shape: f32[1,80], index: 8, kind: input, shape index: {}]   ;;  %s8909_s9 = inlined_call_operand.vmem [shape: bf16[400,120], index: 9, kind: input, shape index: {}]   ;;  %s8910_s10 = inlined_call_operand.hbm [shape: f32[1,120], index: 10, kind: input, shape index: {}]   ;;  %s8911_s11 = inlined_call_operand.vmem [shape: bf16[120,84], index: 11, kind: input, shape index: {}]   ;;  %s8912_s12 = inlined_call_operand.hbm [shape: f32[1,84], index: 12, kind: input, shape index: {}]   ;;  %s8913_s13 = inlined_call_operand.vmem [shape: bf16[84,10], index: 13, kind: input, shape index: {}]   ;;  %s8914_s14 = inlined_call_operand.vmem [shape: f32[1,10], index: 14, kind: input, shape index: {}]   ;;  %s8915_s15 = inlined_call_operand.hbm [shape: f32[2,4,10], index: 15, kind: output, shape index: {}]  }
   0x1   :  { %9047 = sst [smem:[#allocation86_spill]] %s8915_s15 }
   0x2   :  { %20 = vsyncpa [#allocation3], 0 }
   0x3   :  { %21 = vsyncpa [#allocation6], 0 }
   0x4   :  { %22 = vsyncpa [#allocation9], 0 }
   0x5   :  { %23 = vsyncpa [#allocation4], 0 }
   0x6   :  { %25 = vsyncpa [#allocation4 + $0x1], 0  ;;  %s6159_s18 = smov 0   ;;  %s6161_s19 = smov 0  }
   0x7   :  { %s6163_s20 = smov 0   ;;  %s6165_s21 = smov 0  }
   0x8 LB: > { %9048 = sst [smem:[#allocation15_spill]] %s6049_s18  ;;  %s6180_s22 = sadd.s32 4294967295, %s6061_s21   ;;  %s6061_s21 = sphi %s6165_s21, %s9293_s21   ;;  %s6057_s20 = sphi %s6163_s20, %s9296_s20   ;;  %s6053_s19 = sphi %s6161_s19, %s9295_s19   ;;  %s6049_s18 = sphi %s6159_s18, %s9294_s18  }
   0x9   : > { %9049 = sst [smem:[#allocation16_spill]] %s6053_s19  ;;  %s4814_s23 = sadd.s32 4294967294, %s6061_s21  }
   0xa   : > { %9050 = sst [smem:[#allocation17_spill]] %s6057_s20  ;;  %s6184_s24 = sadd.s32 1, %s6061_s21  }
   0xb   : > { %9051 = sst [smem:[#allocation18_spill]] %s6061_s21  ;;  %s358_s25 = sadd.s32 1, %s6057_s20 }
   0xc   : > { %9052 = sst [smem:[#allocation19_spill]] %s6184_s24  ;;  %s355_s26 = ssub.s32 %s6061_s21, %s6184_s24 }
   0xd   : > { %p368_p0 = scmp.ne.s32.totalorder %s6057_s20, %s6053_s19  ;;  %p356_p1 = scmp.eq.s32.totalorder %s355_s26, 0 }
   0xe   : > { %p369_p2 = scmp.eq.s32.totalorder %s6180_s22, 1  ;;  %p374_p3 = scmp.ne.s32.totalorder %s6053_s19, %s6049_s18 }
   0xf   : > { %p375_p4 = scmp.eq.s32.totalorder %s4814_s23, 1  ;;  %p4815_p7 = scmp.ge.s32.totalorder %s6061_s21, 1 }
  0x10   : > { %s6195_s27 = scalar_select %p356_p1, %s6057_s20, %s358_s25  }
  0x11   : > { %p6197_p5 = por %p369_p2, %p368_p0  ;;  %p6201_p6 = por %p375_p4, %p374_p3 }
  0x12   : > { %9053 = sst [smem:[#allocation20_spill]] %s6195_s27  ;;  %p382_p8 = scmp.lt.s32.totalorder %s6061_s21, 3 }
  0x13   : > { %s9054_s28 = scalar_select %p6197_p5, 1, 0 }
  0x14   : > { %s9056_s29 = scalar_select %p6201_p6, 1, 0 }
  0x15   : > { %9055 = sst [smem:[#allocation21_spill]] %s9054_s28  ;;  %p8923_p9 = scmp.eq.s32.totalorder %s6180_s22, 0 }
  0x16   : > { %9057 = sst [smem:[#allocation22_spill]] %s9056_s29  ;;  %p6208_p10 = pnand %p4815_p7, %p382_p8 }
  0x17   : > { %s6063_s16 = smov [#allocation5]   ;;  %s6064_s23 = smov [#allocation2]  }
  0x18   : > { %s9058_s30 = scalar_select %p6208_p10, 1, 0 }
  0x19   : > { %s424_s17 = sshll.u32 %s6063_s16, 4  ;;  %p5228_p11 = pneg %p6208_p10  ;;  %s425_s17 = int_to_ptr.vmem [resolvable:$true] %s424_s17 }
  0x1a   : > { %s404_s25 = sshll.u32 %s6064_s23, 4  ;;  %s6065_s27 = smov [#allocation7]   ;;  %s6220_s25 = int_to_ptr.vmem [resolvable:$true] %s404_s25 }
  0x1b   : > { %p6216_p12 = pnand %p8923_p9, %p5228_p11  ;;  %s438_s20 = sshll.u32 %s6065_s27, 4  ;;  %s6222_s20 = int_to_ptr.vmem [resolvable:$true] %s438_s20 }
  0x1c   : > { %s5875_s16 = scalar_lea.hbm %s8908_s8, 16 }
  0x1d   : > { %p5876_p13 = scmp.ne.s32.totalorder %s8908_s8, %s5875_s16  ;;  %p6232_p0 = pneg %p6216_p12 }
  0x1e   : > { %p5882_p3 = scmp.lt.u32.totalorder %s5875_s16, %s8908_s8 }
  0x1f   : > { %p5878_p1 = pnand %p6232_p0, %p5876_p13 }
  0x21   : > { %p5879_p2 = pneg %p5878_p1 }
  0x23   : > { %p5884_p4 = pnand %p5882_p3, %p5879_p2 }
  0x25   : > { %5887 = shalt.err (!%p5884_p4)
}
  0x26   : > { %s5888_s24 = scalar_lea.vmem %s425_s17, 16  ;;  %s5895_s18 = scalar_lea.vmem %s425_s17, 32 }
  0x27   : > { %p5889_p7 = scmp.ne.s32.totalorder %s425_s17, %s5888_s24  ;;  %p5896_p9 = scmp.lt.s32.totalorder %s425_s17, %s425_s17 }
  0x28   : > { %p5897_p6 = scmp.lt.s32.totalorder %s5895_s18, %s5888_s24 }
  0x29   : > { %p5891_p8 = pnand %p5889_p7, %p6232_p0 }
  0x2a   : > { %p5898_p5 = por %p5897_p6, %p5896_p9 }
  0x2b   : > { %p5892_p11 = pneg %p5891_p8 }
  0x2d   : > { %p5899_p10 = pnand %p5898_p5, %p5892_p11 }
  0x2f   : > { %5902 = shalt.err (!%p5899_p10)
}
  0x30   : > { %5234 = dma.hbm_to_vmem [thread:$0]  (!%p6216_p12), %s8908_s8, 16, %s425_s17, [#allocation6]  }
  0x31   : > { %s5903_s27 = scalar_lea.hbm %s8904_s4, 16 }
  0x32   : > { %p5904_p13 = scmp.ne.s32.totalorder %s8904_s4, %s5903_s27  ;;  %p5910_p5 = scmp.lt.u32.totalorder %s5903_s27, %s8904_s4 }
  0x34   : > { %p5906_p1 = pnand %p5904_p13, %p6232_p0 }
  0x36   : > { %p5907_p6 = pneg %p5906_p1 }
  0x38   : > { %p5912_p9 = pnand %p5910_p5, %p5907_p6 }
  0x3a   : > { %5915 = shalt.err (!%p5912_p9)
}
  0x3b   : > { %s5916_s17 = scalar_lea.vmem %s6220_s25, 16  ;;  %s5923_s19 = scalar_lea.vmem %s6220_s25, 32 }
  0x3c   : > { %p5917_p10 = scmp.ne.s32.totalorder %s6220_s25, %s5916_s17  ;;  %p5924_p4 = scmp.lt.s32.totalorder %s6220_s25, %s6220_s25 }
  0x3d   : > { %p5925_p7 = scmp.lt.s32.totalorder %s5923_s19, %s5916_s17 }
  0x3e   : > { %p5919_p2 = pnand %p5917_p10, %p6232_p0 }
  0x3f   : > { %p5926_p8 = por %p5925_p7, %p5924_p4 }
  0x40   : > { %p5920_p3 = pneg %p5919_p2 }
  0x42   : > { %p5927_p11 = pnand %p5926_p8, %p5920_p3 }
  0x44   : > { %5930 = shalt.err (!%p5927_p11)
}
  0x45   : > { %5231 = dma.hbm_to_vmem [thread:$0]  (!%p6216_p12), %s8904_s4, 16, %s6220_s25, [#allocation3]  }
  0x46   : > { %s5931_s16 = scalar_lea.hbm %s8910_s10, 16 }
  0x47   : > { %p5932_p13 = scmp.ne.s32.totalorder %s8910_s10, %s5931_s16  ;;  %p5938_p5 = scmp.lt.u32.totalorder %s5931_s16, %s8910_s10 }
  0x49   : > { %p5934_p1 = pnand %p5932_p13, %p6232_p0 }
  0x4b   : > { %p5935_p6 = pneg %p5934_p1 }
  0x4d   : > { %p5940_p9 = pnand %p5938_p5, %p5935_p6 }
  0x4f   : > { %5943 = shalt.err (!%p5940_p9)
}
  0x50   : > { %s5944_s25 = scalar_lea.vmem %s6222_s20, 16  ;;  %s5951_s19 = scalar_lea.vmem %s6222_s20, 32 }
  0x51   : > { %p5945_p10 = scmp.ne.s32.totalorder %s6222_s20, %s5944_s25  ;;  %p5952_p4 = scmp.lt.s32.totalorder %s6222_s20, %s6222_s20 }
  0x52   : > { %p5953_p7 = scmp.lt.s32.totalorder %s5951_s19, %s5944_s25 }
  0x53   : > { %p5947_p2 = pnand %p5945_p10, %p6232_p0 }
  0x54   : > { %p5954_p8 = por %p5953_p7, %p5952_p4 }
  0x55   : > { %p5948_p3 = pneg %p5947_p2 }
  0x57   : > { %p5955_p11 = pnand %p5954_p8, %p5948_p3 }
  0x59   : > { %5958 = shalt.err (!%p5955_p11)
}
  0x5a   : > { %5237 = dma.hbm_to_vmem [thread:$0]  (!%p6216_p12), %s8910_s10, 16, %s6222_s20, [#allocation6]  }
  0x5b   : > { %s6066_s29 = smov [#allocation8]   ;;  %s5959_s24 = scalar_lea.hbm %s8912_s12, 16 }
  0x5c   : > { %s452_s15 = sshll.u32 %s6066_s29, 4  ;;  %p5960_p13 = scmp.ne.s32.totalorder %s8912_s12, %s5959_s24  ;;  %s453_s15 = int_to_ptr.vmem [resolvable:$true] %s452_s15 }
  0x5d   : > { %p5966_p5 = scmp.lt.u32.totalorder %s5959_s24, %s8912_s12 }
  0x5e   : > { %p5962_p1 = pnand %p5960_p13, %p6232_p0 }
  0x60   : > { %p5963_p6 = pneg %p5962_p1 }
  0x62   : > { %p5968_p9 = pnand %p5966_p5, %p5963_p6 }
  0x64   : > { %5971 = shalt.err (!%p5968_p9)
}
  0x65   : > { %s5972_s20 = scalar_lea.vmem %s453_s15, 16  ;;  %s5979_s28 = scalar_lea.vmem %s453_s15, 32 }
  0x66   : > { %p5973_p10 = scmp.ne.s32.totalorder %s453_s15, %s5972_s20  ;;  %p5980_p4 = scmp.lt.s32.totalorder %s453_s15, %s453_s15 }
  0x67   : > { %p5981_p7 = scmp.lt.s32.totalorder %s5979_s28, %s5972_s20 }
  0x68   : > { %p5975_p2 = pnand %p5973_p10, %p6232_p0 }
  0x69   : > { %p5982_p8 = por %p5981_p7, %p5980_p4 }
  0x6a   : > { %p5976_p3 = pneg %p5975_p2 }
  0x6c   : > { %p5983_p11 = pnand %p5982_p8, %p5976_p3 }
  0x6e   : > { %5986 = shalt.err (!%p5983_p11)
}
  0x6f   : > { %5240 = dma.hbm_to_vmem [thread:$0]  (!%p6216_p12), %s8912_s12, 16, %s453_s15, [#allocation9]  }
  0x70   : > { %p9061_p13 = scmp.ne.s32.totalorder %s9058_s30, 0 }
  0x72   : > { %481 = sbr.rel (%p9061_p13) target bundleno = 6294 (0x1896), region = 80 }
  0x79   : > { %p9062_p1 = scmp.eq.s32.totalorder %s6180_s22, 0 }
  0x7b   : > { %6032 = dma.done.wait (%p9062_p1), [#allocation3], 16   ;;  %p9063_p0 = pmov %p9062_p1 }
  0x7d   : > { %6034 = vsyncadd (%p9063_p0), [#allocation3], 4294967280  ;;  %p9064_p6 = pmov %p9063_p0 }
  0x7e   : > { %p9065_p5 = pmov %p9063_p0 }
  0x7f   : > { %6036 = dma.done.wait (%p9064_p6), [#allocation6], 32  }
  0x80   : > { %6038 = vsyncadd (%p9065_p5), [#allocation6], 4294967264  ;;  %p9066_p9 = pmov %p9063_p0 }
  0x81   : > { %p9067_p12 = pmov %p9063_p0 }
  0x82   : > { %6040 = dma.done.wait (%p9066_p9), [#allocation9], 16  }
  0x83   : > { %6042 = vsyncadd (%p9067_p12), [#allocation9], 4294967280  ;;  %s4827_s30 = sshll.u32 %s6180_s22, 2  ;;  %vm558_vm0 = vcmask 1046528   ;;  %vm598_vm1 = vcmask 1044480   ;;  %vm578_vm2 = vcmask 1045504  }
  0x84   : > { %p543_p10 = scmp.lt.s32.totalorder %s4827_s30, 7  ;;  %vm618_vm3 = vcmask 1043456   ;;  %v5541_v16 = vld [vmem:[%s8901_s1 + $0x4] ss:$8 sps:$4 sm:$0xff]   ;;  %v5543_v17 = vld [vmem:[%s8901_s1] ss:$8 sps:$4 sm:$0xff]  }
  0x85   : > { %v5544_v22 = vld [vmem:[%s8901_s1 + $0x14] ss:$8 sps:$4 sm:$0xff]   ;;  %775 = vmatprep.subr.bf16.mxu0 %v5541_v16  ;;  %s6067_s20 = smov 32   ;;  %v5546_v29 = vld [vmem:[%s8901_s1 + $0x10] ss:$8 sps:$4 sm:$0xff]   ;;  %s8953_s29 = smov 96  }
  0x86   : > { %s9298_s30 = smov (!%p543_p10, %s4827_s30), 7  ;;  %776 = vmatpush1.bf16.msra.mxu0 %v5543_v17  ;;  %v5547_v33 = vld [vmem:[%s8901_s1 + $0x24] ss:$8 sps:$4 sm:$0xff]   ;;  %s9033_s23 = smov 64   ;;  %v5549_v39 = vld [vmem:[%s8901_s1 + $0x20] ss:$8 sps:$4 sm:$0xff]  }
  0x87   : > { %s5119_s26 = sshll.u32 %s9298_s30, 5  ;;  %777 = vmatprep.subr.bf16.mxu0 %v5544_v22  ;;  %v5550_v42 = vld [vmem:[%s8901_s1 + $0x34] ss:$8 sps:$4 sm:$0xff]   ;;  %vm630_vm4 = vcmask 261120   ;;  %v5552_v44 = vld [vmem:[%s8901_s1 + $0x30] ss:$8 sps:$4 sm:$0xff]  }
  0x88   : > { %s6332_s16 = scalar_lea.vmem %s8900_s0, %s5119_s26  ;;  %v5553_v45 = vld [vmem:[%s8901_s1 + $0x44] ss:$8 sps:$4 sm:$0xff]   ;;  %v5555_v46 = vld [vmem:[%s8901_s1 + $0x40] ss:$8 sps:$4 sm:$0xff]   ;;  %v5556_v47 = vld [vmem:[%s8901_s1 + $0x54] ss:$8 sps:$4 sm:$0xff]  }
  0x89   : > { %v6335_v0 = vld [vmem:[%s6332_s16] sm:$0xff]  ;;  %v6338_v1 = vld [vmem:[%s6332_s16 + $0x8] sm:$0xff]  ;;  %v6341_v2 = vld [vmem:[%s6332_s16 + $0x10] sm:$0xff]  ;;  %vm635_vm5 = vcmask 523264   ;;  %vm640_vm6 = vcmask 785408   ;;  %vm839_vm7 = vcmask 228352  }
  0x8a   : > { %v559_v3 = vrot.slane %v6335_v0, 1  ;;  %v560_v4 = vrot.slane %v6338_v1, 1  ;;  %v562_v5 = vrot.slane %v6341_v2, 1  ;;  %v599_v6 = vrot.slane %v6335_v0, 3  ;;  %v6348_v7 = vld [vmem:[%s6332_s16 + $0x18] sm:$0xff]  ;;  %778 = vmatpush1.bf16.msra.mxu0 %v5546_v29  ;;  %s6071_s27 = smov 40  }
  0x8b   : > { %v600_v8 = vrot.slane %v6338_v1, 3  ;;  %v602_v9 = vrot.slane %v6341_v2, 3  ;;  %v579_v10 = vrot.slane %v6335_v0, 2  ;;  %v580_v11 = vrot.slane %v6338_v1, 2  ;;  %779 = vmatprep.subr.bf16.mxu0 %v5547_v33  ;;  %v5558_v48 = vld [vmem:[%s8901_s1 + $0x50] ss:$8 sps:$4 sm:$0xff]  }
  0x8c   : > { %v561_v12 = vsel %vm558_vm0, %v559_v3, %v560_v4  ;;  %v563_v13 = vsel %vm558_vm0, %v560_v4, %v562_v5  ;;  %v582_v14 = vrot.slane %v6341_v2, 2  ;;  %v564_v15 = vrot.slane %v6348_v7, 1  ;;  %v5559_v49 = vld [vmem:[%s8901_s1 + $0x64] ss:$8 sps:$4 sm:$0xff]   ;;  %v5561_v50 = vld [vmem:[%s8901_s1 + $0x60] ss:$8 sps:$4 sm:$0xff]  }
  0x8d   : > { %v5301_v18 = vpack.i.bf16 %v563_v13, %v561_v12  ;;  %v601_v19 = vsel %vm598_vm1, %v599_v6, %v600_v8  ;;  %v603_v20 = vsel %vm598_vm1, %v600_v8, %v602_v9  ;;  %v581_v21 = vsel %vm578_vm2, %v579_v10, %v580_v11  ;;  %v5562_v51 = vld [vmem:[%s8901_s1 + $0x74] ss:$8 sps:$4 sm:$0xff]   ;;  %v5564_v52 = vld [vmem:[%s8901_s1 + $0x70] ss:$8 sps:$4 sm:$0xff]   ;;  %v5565_v53 = vld [vmem:[%s8901_s1 + $0x84] ss:$8 sps:$4 sm:$0xff]  }
  0x8e   : > { %v5311_v23 = vpack.i.bf16 %v603_v20, %v601_v19  ;;  %v583_v24 = vsel %vm578_vm2, %v580_v11, %v582_v14  ;;  %v565_v25 = vsel %vm558_vm0, %v562_v5, %v564_v15  ;;  %v584_v26 = vrot.slane %v6348_v7, 2  ;;  %780 = vmatpush1.bf16.msra.mxu0 %v5549_v39  ;;  %v5567_v54 = vld [vmem:[%s8901_s1 + $0x80] ss:$8 sps:$4 sm:$0xff]   ;;  %v5568_v55 = vld [vmem:[%s8901_s1 + $0x94] ss:$8 sps:$4 sm:$0xff]   ;;  %s6072_s24 = smov 84  }
  0x8f   : > { %5302 = vrot.lane.b32.xlu0 %v5301_v18, %s6067_s20  ;;  %v5306_v27 = vpack.i.bf16 %v583_v24, %v581_v21  ;;  %v604_v28 = vrot.slane %v6348_v7, 3  ;;  %v619_v30 = vrot.slane %v6335_v0, 4  ;;  %v5316_v31 = vpack.i.bf16 %v564_v15, %v565_v25  ;;  %781 = vmatprep.subr.bf16.mxu0 %v5550_v42  ;;  %v5570_v56 = vld [vmem:[%s8901_s1 + $0x90] ss:$8 sps:$4 sm:$0xff]   ;;  %s6073_s18 = smov 80   ;;  %s6074_s17 = smov 124  }
  0x90   : > { %5312 = vrot.lane.b32.xlu1 %v5311_v23, %s8953_s29  ;;  %v585_v32 = vsel %vm578_vm2, %v582_v14, %v584_v26  ;;  %v620_v34 = vrot.slane %v6338_v1, 4  ;;  %v622_v36 = vrot.slane %v6341_v2, 4  ;;  %v624_v58 = vrot.slane %v6348_v7, 4  ;;  %v6463_v29 = vld [vmem:[%s8903_s3 + $0x54] sm:$0xff]   ;;  %s9154_s25 = smov 96   ;;  %s9284_s21 = smov 64  }
  0x91   : > { %v605_v35 = vsel %vm598_vm1, %v602_v9, %v604_v28  ;;  %v5321_v38 = vpack.i.bf16 %v584_v26, %v585_v32  ;;  %v6484_v32 = vld [vmem:[%s8903_s3 + $0x6c] sm:$0xff]   ;;  %v6491_v33 = vld [vmem:[%s8903_s3 + $0x74] sm:$0xff]   ;;  %vm1036_vm8 = vcmask 326656   ;;  %vm1264_vm9 = vcmask 687104   ;;  %s5116_s30 = sshll.u32 %s6180_s22, 6  ;;  %s9287_s15 = sld [smem:[#allocation86_spill]] }
  0x92   : > { %v621_v37 = vsel %vm618_vm3, %v619_v30, %v620_v34  ;;  %v623_v40 = vsel %vm618_vm3, %v620_v34, %v622_v36  ;;  %v5326_v41 = vpack.i.bf16 %v604_v28, %v605_v35  ;;  %782 = vmatpush1.bf16.msra.mxu0 %v5552_v44  ;;  %v625_v4 = vsel %vm618_vm3, %v622_v36, %v624_v58  ;;  %v6470_v30 = vld [vmem:[%s8903_s3 + $0x5c] sm:$0xff]   ;;  %v6505_v35 = vld [vmem:[%s8903_s3 + $0x84] sm:$0xff]   ;;  %s6078_s22 = smov [#allocation10]  }
  0x93   : > { %5307 = vrot.lane.b32.xlu0 %v5306_v27, %s9033_s23  ;;  %v646_v43 = vpack.c.bf16 %v623_v40, %v621_v37  ;;  %783 = vmatprep.subr.bf16.mxu0 %v5553_v45  ;;  %v648_v15 = vpack.c.bf16 %v624_v58, %v625_v4  ;;  %v8929_v28 = vmov 0   ;;  %v6498_v34 = vld [vmem:[%s8903_s3 + $0x7c] sm:$0xff]   ;;  %v5594_v4 = vld [vmem:[%s8903_s3 + $0xa4] ss:$0 sps:$4 sm:$0xff]   ;;  %vm1269_vm10 = vcmask 1014784  }
  0x94   : > { %5317 = vrot.lane.b32.xlu1 %v5316_v31, %s6067_s20  ;;  %881 = vmatprep.mubr.bf16.mxu1 %v8929_v28  ;;  %v6477_v31 = vld [vmem:[%s8903_s3 + $0x64] sm:$0xff]   ;;  %v6580_v58 = vld [vmem:[%s8903_s3 + $0x38] sm:$0xff]   ;;  %vm1597_vm11 = vcmask 293888   ;;  %vm1601_vm12 = vcmask 1041408   ;;  %vm1272_vm13 = vcmask 654336   ;;  %vm1697_vm14 = vcmask 80896  }
  0x95   : > { %4850 = vmatprep.mubr.msk.bf16.mxu0 %vm630_vm4, %v646_v43  ;;  %vm2071_vm15 = vcmask 916480  }
  0x96   : > { %784 = vmatpush1.bf16.msra.mxu0 %v5555_v46 }
  0x97   : > { %5322 = vrot.lane.b32.xlu0 %v5321_v38, %s9033_s23  ;;  %785 = vmatprep.subr.bf16.mxu0 %v5556_v47  ;;  %s8857_s19 = scalar_lea.hbm %s9287_s15, %s5116_s30 }
  0x98   : > { %5327 = vrot.lane.b32.xlu1 %v5326_v41, %s8953_s29 }
  0x9a   : > { %786 = vmatpush1.bf16.msra.mxu0 %v5558_v48 }
  0x9b   : > { %787 = vmatprep.subr.bf16.mxu0 %v5559_v49  ;;  %v6514_v49 = vld [vmem:[%s8902_s2] sm:$0x7f]  }
  0x9e   : > { %788 = vmatpush1.bf16.msra.mxu0 %v5561_v50  ;;  %v6523_v50 = vld [vmem:[%s8902_s2 + $0x8] sm:$0x7f]  }
  0x9f   : > { %789 = vmatprep.subr.bf16.mxu0 %v5562_v51  ;;  %v6528_v51 = vld [vmem:[%s8903_s3] sm:$0xff]  }
  0xa2   : > { %790 = vmatpush1.bf16.msra.mxu0 %v5564_v52  ;;  %v6537_v52 = vld [vmem:[%s8903_s3 + $0x8] sm:$0xff]  }
  0xa3   : > { %791 = vmatprep.subr.bf16.mxu0 %v5565_v53  ;;  %v6544_v53 = vld [vmem:[%s8903_s3 + $0x10] sm:$0xff]  }
  0xa6   : > { %792 = vmatpush1.bf16.msra.mxu0 %v5567_v54  ;;  %v6551_v54 = vld [vmem:[%s8903_s3 + $0x18] sm:$0xff]  }
  0xa7   : > { %793 = vmatprep.subr.bf16.mxu0 %v5568_v55  ;;  %v6558_v55 = vld [vmem:[%s8903_s3 + $0x20] sm:$0xff]  }
  0xaa   : > { %794 = vmatpush1.bf16.msra.mxu0 %v5570_v56  ;;  %v6565_v56 = vld [vmem:[%s8903_s3 + $0x28] sm:$0xff]  }
  0xab   : > { %1172 = vmatprep.subr.bf16.mxu0 %v8929_v28 }
 0x101   : > { %v5303_v57 = vpop.permute.xlu0 %5302 }
 0x102   : > { %v5313_v59 = vpop.permute.xlu1 %5312  ;;  %v5305_v60 = vunpack.i.h.bf16 %v5303_v57  ;;  %v5304_v61 = vunpack.i.l.bf16 %v5303_v57  ;;  %v6572_v57 = vld [vmem:[%s8903_s3 + $0x30] sm:$0xff]  }
 0x103   : > { %v5315_v62 = vunpack.i.h.bf16 %v5313_v59  ;;  %v5314_v63 = vunpack.i.l.bf16 %v5313_v59  ;;  %v6585_v59 = vld [vmem:[%s8903_s3 + $0x8c] sm:$0xff]  }
 0x104   : > { %v632_v9 = vsel %vm630_vm4, %v6338_v1, %v5305_v60  ;;  %v631_v10 = vsel %vm630_vm4, %v6335_v0, %v5304_v61  ;;  %v6594_v60 = vld [vmem:[%s8903_s3 + $0x40] sm:$0xff]   ;;  %v6599_v61 = vld [vmem:[%s8903_s3 + $0x94] sm:$0xff]  }
 0x105   : > { %v5308_v3 = vpop.permute.xlu0 %5307 }
 0x106   : > { %v5310_v5 = vunpack.i.h.bf16 %v5308_v3  ;;  %v5309_v6 = vunpack.i.l.bf16 %v5308_v3  ;;  %v5318_v8 = vpop.permute.xlu1 %5317  ;;  %v5593_v3 = vld [vmem:[%s8903_s3 + $0x50] ss:$0 sps:$4 sm:$0xff]  }
 0x107   : > { %v5320_v11 = vunpack.i.h.bf16 %v5318_v8  ;;  %v5319_v12 = vunpack.i.l.bf16 %v5318_v8 }
 0x108   : > { %v636_v13 = vsel %vm635_vm5, %v631_v10, %v5309_v6  ;;  %v637_v14 = vsel %vm635_vm5, %v632_v9, %v5310_v5  ;;  %v6626_v5 = vsel %vm618_vm3, %v5593_v3, 0  ;;  %v6629_v6 = vsel %vm618_vm3, %v5594_v4, 0  ;;  %v6776_v3 = vld [vmem:[%s8905_s5 + $0xb0] ss:$8 sps:$4 sm:$0xff]   ;;  %v6782_v4 = vld [vmem:[%s8905_s5 + $0xc4] ss:$8 sps:$4 sm:$0xff]  }
 0x109   : > { %v634_v16 = vsel %vm630_vm4, %v6348_v7, %v5320_v11  ;;  %v633_v17 = vsel %vm630_vm4, %v6341_v2, %v5319_v12  ;;  %v5323_v18 = vpop.permute.xlu0 %5322  ;;  %v641_v19 = vsel %vm640_vm6, %v636_v13, %v5314_v63  ;;  %v642_v1 = vsel %vm640_vm6, %v637_v14, %v5315_v62  ;;  %v6608_v62 = vld [vmem:[%s8903_s3 + $0x48] sm:$0xff]   ;;  %v6613_v63 = vld [vmem:[%s8903_s3 + $0x9c] sm:$0xff]   ;;  %9077 = vst [vmem:[#allocation32_spill] sm:$0xff] %v6776_v3 }
 0x10a   : > { %v5325_v20 = vunpack.i.h.bf16 %v5323_v18  ;;  %v5324_v0 = vunpack.i.l.bf16 %v5323_v18  ;;  %v5328_v21 = vpop.permute.xlu1 %5327  ;;  %v645_v22 = vpack.c.bf16 %v642_v1, %v641_v19  ;;  %9078 = vst [vmem:[#allocation33_spill] sm:$0xff] %v6782_v4 }
 0x10b   : > { %v5330_v23 = vunpack.i.h.bf16 %v5328_v21  ;;  %v5329_v24 = vunpack.i.l.bf16 %v5328_v21  ;;  %v6644_v21 = vld [vmem:[%s8905_s5] ss:$8 sps:$4 sm:$0xff]  }
 0x10c   : > { %v639_v25 = vsel %vm635_vm5, %v634_v16, %v5325_v20  ;;  %v638_v26 = vsel %vm635_vm5, %v633_v17, %v5324_v0  ;;  %808 = vmatmul.mubr.bf16.vlgmr.msra.gmra.mrb[0].mxu0 %v645_v22  ;;  %v6639_v0 = vld [vmem:[%s8905_s5 + $0x4] ss:$8 sps:$4 sm:$0xff]   ;;  %v6649_v22 = vld [vmem:[%s8905_s5 + $0x14] ss:$8 sps:$4 sm:$0xff]  }
 0x10d   : > { %4851 = vmatprep.mubr.msk.bf16.mxu0 %vm630_vm4, %v648_v15  ;;  %v643_v2 = vsel %vm640_vm6, %v638_v26, %v5329_v24  ;;  %v644_v7 = vsel %vm640_vm6, %v639_v25, %v5330_v23  ;;  %1173 = vmatpush1.bf16.msra.mxu0 %v6463_v29  ;;  %v6656_v23 = vld [vmem:[%s8905_s5 + $0x10] ss:$8 sps:$4 sm:$0xff]   ;;  %v6662_v24 = vld [vmem:[%s8905_s5 + $0x24] ss:$8 sps:$4 sm:$0xff]   ;;  %v6668_v25 = vld [vmem:[%s8905_s5 + $0x20] ss:$8 sps:$4 sm:$0xff]  }
 0x10e   : > { %v647_v27 = vpack.c.bf16 %v644_v7, %v643_v2  ;;  %1174 = vmatprep.subr.bf16.mxu0 %v8929_v28  ;;  %v6674_v26 = vld [vmem:[%s8905_s5 + $0x34] ss:$8 sps:$4 sm:$0xff]   ;;  %v6680_v2 = vld [vmem:[%s8905_s5 + $0x30] ss:$8 sps:$4 sm:$0xff]   ;;  %v6686_v7 = vld [vmem:[%s8905_s5 + $0x44] ss:$8 sps:$4 sm:$0xff]  }
 0x111   : > { %1175 = vmatpush1.bf16.msra.mxu0 %v6470_v30 }
 0x112   : > { %1176 = vmatprep.subr.bf16.mxu0 %v8929_v28 }
 0x114   : > { %818 = vmatmul.mubr.bf16.gmra.mrb[4].mxu0 %v647_v27  ;;  %v6692_v27 = vld [vmem:[%s8905_s5 + $0x40] ss:$8 sps:$4 sm:$0xff]  }
 0x115   : > { %1177 = vmatpush1.bf16.msra.mxu0 %v6477_v31 }
 0x116   : > { %1178 = vmatprep.subr.bf16.mxu0 %v8929_v28 }
 0x119   : > { %1179 = vmatpush1.bf16.msra.mxu0 %v6484_v32 }
 0x11a   : > { %1180 = vmatprep.subr.bf16.mxu0 %v8929_v28 }
 0x11d   : > { %1181 = vmatpush1.bf16.msra.mxu0 %v6491_v33 }
 0x11e   : > { %1182 = vmatprep.subr.bf16.mxu0 %v8929_v28 }
 0x121   : > { %1183 = vmatpush1.bf16.msra.mxu0 %v6498_v34 }
 0x122   : > { %1184 = vmatprep.subr.bf16.mxu0 %v8929_v28 }
 0x125   : > { %1185 = vmatpush1.bf16.msra.mxu0 %v6505_v35 }
 0x126   : > { %1186 = vmatprep.subr.bf16.mxu0 %v8929_v28 }
 0x129   : > { %1187 = vmatpush1.bf16.msra.mxu0 %v6585_v59 }
 0x12a   : > { %1188 = vmatprep.subr.bf16.mxu0 %v8929_v28 }
 0x12d   : > { %1189 = vmatpush1.bf16.msra.mxu0 %v6599_v61 }
 0x12e   : > { %1190 = vmatprep.subr.bf16.mxu0 %v8929_v28 }
 0x131   : > { %1191 = vmatpush1.bf16.msra.mxu0 %v6613_v63 }
 0x132   : > { %1192 = vmatprep.subr.bf16.mxu0 %v8929_v28 }
 0x135   : > { %1193 = vmatpush1.bf16.msra.mxu0 %v6629_v6 }
 0x1df   : > { %v809_v36 = vpop.f32.mrb[0].mxu0 }
 0x1e0   : > { %v811_v37 = vpop.f32.mrb[1].mxu0 }
 0x1e1   : > { %v813_v38 = vpop.f32.mrb[2].mxu0 }
 0x1e2   : > { %v828_v39 = vpack.c.bf16 %v813_v38, %v809_v36  ;;  %v815_v40 = vpop.f32.mrb[3].mxu0  ;;  %v6698_v36 = vld [vmem:[%s8905_s5 + $0x54] ss:$8 sps:$4 sm:$0xff]   ;;  %v6710_v38 = vld [vmem:[%s8905_s5 + $0x64] ss:$8 sps:$4 sm:$0xff]  }
 0x1e3   : > { %v829_v41 = vpack.c.bf16 %v815_v40, %v811_v37  ;;  %v6704_v37 = vld [vmem:[%s8905_s5 + $0x50] ss:$8 sps:$4 sm:$0xff]   ;;  %v6722_v40 = vld [vmem:[%s8905_s5 + $0x74] ss:$8 sps:$4 sm:$0xff]  }
 0x1e4   : > { %9068 = vst [vmem:[#allocation23_spill] sm:$0xff] %v6722_v40 }
 0x1e5   : > { %849 = vmatprep.subr.bf16.mxu1 %v829_v41 }
 0x1e6   : > { %850 = vmatpush1.bf16.msra.mxu1 %v828_v39 }
 0x1e7   : > { %v819_v42 = vpop.f32.mrb[4].mxu0 }
 0x1e8   : > { %v821_v43 = vpop.f32.mrb[5].mxu0 }
 0x1e9   : > { %v823_v44 = vpop.f32.mrb[6].mxu0 }
 0x1ea   : > { %v830_v45 = vpack.c.bf16 %v823_v44, %v819_v42  ;;  %v825_v46 = vpop.f32.mrb[7].mxu0  ;;  %v6734_v42 = vld [vmem:[%s8905_s5 + $0x84] ss:$8 sps:$4 sm:$0xff]   ;;  %v6746_v44 = vld [vmem:[%s8905_s5 + $0x94] ss:$8 sps:$4 sm:$0xff]  }
 0x1eb   : > { %v831_v47 = vpack.c.bf16 %v825_v46, %v821_v43  ;;  %9070 = vst [vmem:[#allocation25_spill] sm:$0xff] %v6734_v42  ;;  %v6740_v43 = vld [vmem:[%s8905_s5 + $0x80] ss:$8 sps:$4 sm:$0xff]   ;;  %9072 = vst [vmem:[#allocation27_spill] sm:$0xff] %v6746_v44  ;;  %v6758_v46 = vld [vmem:[%s8905_s5 + $0xa4] ss:$8 sps:$4 sm:$0xff]  }
 0x1ec   : > { %v844_v48 = vsel %vm578_vm2, %v830_v45, 0  ;;  %9071 = vst [vmem:[#allocation26_spill] sm:$0xff] %v6740_v43  ;;  %v6752_v45 = vld [vmem:[%s8905_s5 + $0x90] ss:$8 sps:$4 sm:$0xff]   ;;  %9074 = vst [vmem:[#allocation29_spill] sm:$0xff] %v6758_v46 }
 0x1ed   : > { %4853 = vmatprep.subr.msk.bf16.mxu1 %vm578_vm2, %v831_v47  ;;  %9073 = vst [vmem:[#allocation28_spill] sm:$0xff] %v6752_v45 }
 0x1ee   : > { %852 = vmatpush1.bf16.msra.mxu1 %v844_v48 }
 0x1ef   : > { %903 = vmatprep.subr.bf16.mxu1 %v829_v41  ;;  %v6728_v41 = vld [vmem:[%s8905_s5 + $0x70] ss:$8 sps:$4 sm:$0xff]  }
 0x1f0   : > { %9069 = vst [vmem:[#allocation24_spill] sm:$0xff] %v6728_v41 }
 0x1f1   : > { %4854 = vmatmul.mubr.msk.bf16.vlgmr.msra.gmra.mrb[0].mxu1 %vm839_vm7, %v6514_v49 }
 0x1f2   : > { %904 = vmatpush1.bf16.msra.mxu1 %v828_v39  ;;  %935 = vmatprep.mubr.bf16.mxu1 %v8929_v28  ;;  %v6716_v39 = vld [vmem:[%s8905_s5 + $0x60] ss:$8 sps:$4 sm:$0xff]  }
 0x1f3   : > { %4858 = vmatprep.subr.msk.bf16.mxu1 %vm578_vm2, %v831_v47  ;;  %v6764_v47 = vld [vmem:[%s8905_s5 + $0xa0] ss:$8 sps:$4 sm:$0xff]  }
 0x1f4   : > { %9075 = vst [vmem:[#allocation30_spill] sm:$0xff] %v6764_v47 }
 0x1f6   : > { %906 = vmatpush1.bf16.msra.mxu1 %v844_v48  ;;  %v6770_v48 = vld [vmem:[%s8905_s5 + $0xb4] ss:$8 sps:$4 sm:$0xff]  }
 0x1f7   : > { %1043 = vmatprep.subr.bf16.mxu1 %v8929_v28  ;;  %9076 = vst [vmem:[#allocation31_spill] sm:$0xff] %v6770_v48 }
 0x1f9   : > { %4859 = vmatmul.mubr.msk.bf16.vlgmr.msra.gmra.mrb[4].mxu1 %vm839_vm7, %v6523_v50 }
 0x1fa   : > { %1044 = vmatpush1.bf16.msra.mxu1 %v6528_v51 }
 0x1fb   : > { %1045 = vmatprep.subr.bf16.mxu1 %v8929_v28 }
 0x1fe   : > { %1046 = vmatpush1.bf16.msra.mxu1 %v6537_v52 }
 0x1ff   : > { %1047 = vmatprep.subr.bf16.mxu1 %v8929_v28 }
 0x202   : > { %1048 = vmatpush1.bf16.msra.mxu1 %v6544_v53 }
 0x203   : > { %1049 = vmatprep.subr.bf16.mxu1 %v8929_v28 }
 0x206   : > { %1050 = vmatpush1.bf16.msra.mxu1 %v6551_v54 }
 0x207   : > { %1051 = vmatprep.subr.bf16.mxu1 %v8929_v28 }
 0x20a   : > { %1052 = vmatpush1.bf16.msra.mxu1 %v6558_v55 }
 0x20b   : > { %1053 = vmatprep.subr.bf16.mxu1 %v8929_v28 }
 0x20e   : > { %1054 = vmatpush1.bf16.msra.mxu1 %v6565_v56 }
 0x20f   : > { %1055 = vmatprep.subr.bf16.mxu1 %v8929_v28 }
 0x212   : > { %1056 = vmatpush1.bf16.msra.mxu1 %v6572_v57 }
 0x213   : > { %1057 = vmatprep.subr.bf16.mxu1 %v8929_v28 }
 0x216   : > { %1058 = vmatpush1.bf16.msra.mxu1 %v6580_v58 }
 0x217   : > { %1059 = vmatprep.subr.bf16.mxu1 %v8929_v28 }
 0x21a   : > { %1060 = vmatpush1.bf16.msra.mxu1 %v6594_v60 }
 0x21b   : > { %1061 = vmatprep.subr.bf16.mxu1 %v8929_v28 }
 0x21e   : > { %1062 = vmatpush1.bf16.msra.mxu1 %v6608_v62 }
 0x21f   : > { %1063 = vmatprep.subr.bf16.mxu1 %v8929_v28 }
 0x222   : > { %1064 = vmatpush1.bf16.msra.mxu1 %v6626_v5 }
 0x223   : > { %1608 = vmatprep.subr.bf16.mxu1 %v6639_v0 }
 0x2c4   : > { %v883_v8 = vpop.f32.mrb[0].mxu1 }
 0x2c5   : > { %v885_v9 = vpop.f32.mrb[1].mxu1 }
 0x2c6   : > { %v887_v10 = vpop.f32.mrb[2].mxu1 }
 0x2c7   : > { %v889_v11 = vpop.f32.mrb[3].mxu1 }
 0x2cc   : > { %v937_v12 = vpop.f32.mrb[4].mxu1 }
 0x2cd   : > { %v946_v13 = vmax.f32 %v883_v8, %v937_v12  ;;  %v939_v14 = vpop.f32.mrb[5].mxu1  ;;  %v6788_v8 = vld [vmem:[%s8905_s5 + $0xc0] ss:$8 sps:$4 sm:$0xff]  }
 0x2ce   : > { %v947_v15 = vmax.f32 %v885_v9, %v939_v14  ;;  %v941_v16 = vpop.f32.mrb[6].mxu1  ;;  %9079 = vst [vmem:[#allocation34_spill] sm:$0xff] %v6788_v8  ;;  %v6794_v9 = vld [vmem:[%s8905_s5 + $0xd4] ss:$8 sps:$4 sm:$0xff]  }
 0x2cf   : > { %v948_v17 = vmax.f32 %v887_v10, %v941_v16  ;;  %v943_v18 = vpop.f32.mrb[7].mxu1  ;;  %9080 = vst [vmem:[#allocation35_spill] sm:$0xff] %v6794_v9  ;;  %v6800_v10 = vld [vmem:[%s8905_s5 + $0xd0] ss:$8 sps:$4 sm:$0xff]  }
 0x2d0   : > { %v949_v19 = vmax.f32 %v889_v11, %v943_v18  ;;  %9081 = vst [vmem:[#allocation36_spill] sm:$0xff] %v6800_v10 }
 0x2d1   : > { %v950_v1 = vpack.c.bf16 %v948_v17, %v946_v13  ;;  %v6804_v13 = vld [vmem:[#allocation2] ss:$0 sm:$0xff]  ;;  %v6809_v17 = vld [vmem:[%s8905_s5 + $0xe4] ss:$8 sps:$4 sm:$0xff]  }
 0x2d2   : > { %v951_v20 = vpack.c.bf16 %v949_v19, %v947_v15  ;;  %9082 = vst [vmem:[#allocation37_spill] sm:$0xff] %v6804_v13  ;;  %9083 = vst [vmem:[#allocation38_spill] sm:$0xff] %v6809_v17 }
 0x2d4   : > { %4871 = vmatprep.mubr.msk.bf16.mxu1 %vm1036_vm8, %v951_v20  ;;  %4904 = vmatprep.mubr.msk.bf16.mxu0 %vm1036_vm8, %v951_v20 }
 0x2d5   : > { %1076 = vmatmul.mubr.bf16.vlgmr.msra.gmra.mrb[8].mxu1 %v950_v1  ;;  %1205 = vmatmul.mubr.bf16.vlgmr.msra.gmra.mrb[8].mxu0 %v950_v1  ;;  %v6814_v1 = vld [vmem:[%s8905_s5 + $0xe0] ss:$8 sps:$4 sm:$0xff]  }
 0x2d6   : > { %1739 = vmatprep.mubr.bf16.mxu0 %v8929_v28  ;;  %1609 = vmatpush1.bf16.msra.mxu1 %v6644_v21  ;;  %9084 = vst [vmem:[#allocation39_spill] sm:$0xff] %v6814_v1 }
 0x2d7   : > { %1610 = vmatprep.subr.bf16.mxu1 %v6649_v22 }
 0x2da   : > { %1611 = vmatpush1.bf16.msra.mxu1 %v6656_v23 }
 0x2db   : > { %1612 = vmatprep.subr.bf16.mxu1 %v6662_v24 }
 0x2de   : > { %1613 = vmatpush1.bf16.msra.mxu1 %v6668_v25 }
 0x2df   : > { %1614 = vmatprep.subr.bf16.mxu1 %v6674_v26 }
 0x2e2   : > { %1615 = vmatpush1.bf16.msra.mxu1 %v6680_v2 }
 0x2e3   : > { %1616 = vmatprep.subr.bf16.mxu1 %v6686_v7 }
 0x2e6   : > { %1617 = vmatpush1.bf16.msra.mxu1 %v6692_v27 }
 0x2e7   : > { %1618 = vmatprep.subr.bf16.mxu1 %v6698_v36 }
 0x2ea   : > { %1619 = vmatpush1.bf16.msra.mxu1 %v6704_v37 }
 0x2eb   : > { %1620 = vmatprep.subr.bf16.mxu1 %v6710_v38 }
 0x2ee   : > { %1621 = vmatpush1.bf16.msra.mxu1 %v6716_v39 }
 0x2ef   : > { %1622 = vmatprep.subr.bf16.mxu1 %v6722_v40 }
 0x2f2   : > { %1623 = vmatpush1.bf16.msra.mxu1 %v6728_v41 }
 0x2f3   : > { %1624 = vmatprep.subr.bf16.mxu1 %v6734_v42 }
 0x2f6   : > { %1625 = vmatpush1.bf16.msra.mxu1 %v6740_v43 }
 0x2f7   : > { %1626 = vmatprep.subr.bf16.mxu1 %v6746_v44 }
 0x2fa   : > { %1627 = vmatpush1.bf16.msra.mxu1 %v6752_v45 }
 0x2fb   : > { %1628 = vmatprep.subr.bf16.mxu1 %v6758_v46 }
 0x2fe   : > { %1629 = vmatpush1.bf16.msra.mxu1 %v6764_v47 }
 0x2ff   : > { %1630 = vmatprep.subr.bf16.mxu1 %v6770_v48 }
 0x302   : > { %1631 = vmatpush1.bf16.msra.mxu1 %v6776_v3 }
 0x303   : > { %1632 = vmatprep.subr.bf16.mxu1 %v6782_v4 }
 0x306   : > { %1633 = vmatpush1.bf16.msra.mxu1 %v6788_v8 }
 0x307   : > { %1634 = vmatprep.subr.bf16.mxu1 %v6794_v9 }
 0x30a   : > { %1635 = vmatpush1.bf16.msra.mxu1 %v6800_v10 }
 0x30b   : > { %1636 = vmatprep.subr.bf16.mxu1 %v6809_v17 }
 0x30e   : > { %1637 = vmatpush1.bf16.msra.mxu1 %v6814_v1 }
 0x3a8   : > { %v1077_v11 = vpop.f32.mrb[8].mxu1  ;;  %v1206_v12 = vpop.f32.mrb[8].mxu0 }
 0x3a9   : > { %v1213_v14 = vmax.f32 %v1077_v11, %v1206_v12  ;;  %v1079_v15 = vpop.f32.mrb[9].mxu1  ;;  %v1208_v16 = vpop.f32.mrb[9].mxu0 }
 0x3aa   : > { %v1080_v18 = vpop.f32.mrb[10].mxu1  ;;  %v1209_v19 = vpop.f32.mrb[10].mxu0  ;;  %v6825_v15 = vld [vmem:[%s8905_s5 + $0xf4] ss:$8 sps:$4 sm:$0xff]  }
 0x3ab   : > { %v1222_v20 = vadd.f32 %v6804_v13, %v1213_v14  ;;  %v1214_v28 = vmax.f32 %v1080_v18, %v1209_v19  ;;  %v1082_v10 = vpop.f32.mrb[11].mxu1  ;;  %v1211_v9 = vpop.f32.mrb[11].mxu0  ;;  %9085 = vst [vmem:[#allocation40_spill] sm:$0xff] %v6825_v15  ;;  %v6830_v14 = vld [vmem:[%s8905_s5 + $0xf0] ss:$8 sps:$4 sm:$0xff]   ;;  %1638 = vmatprep.subr.bf16.mxu1 %v6825_v15 }
 0x3ac   : > { %9086 = vst [vmem:[#allocation41_spill] sm:$0xff] %v6830_v14  ;;  %1639 = vmatpush1.bf16.msra.mxu1 %v6830_v14 }
 0x3ad   : > { %v6819_v11 = vmax.f32 %v1222_v20, 0.0  ;;  %v1223_v12 = vadd.f32 %v6804_v13, %v1214_v28 }
 0x3af   : > { %v6832_v10 = vmax.f32 %v1223_v12, 0.0  ;;  %v1237_v9 = vrot.slane %v6819_v11, 2  ;;  %v1228_v16 = vrot.slane %v6819_v11, 1  ;;  %v6845_v12 = vld [vmem:[%s8905_s5 + $0x104] ss:$8 sps:$4 sm:$0xff]   ;;  %v1255_v1 = vrot.slane %v6819_v11, 4 }
 0x3b0   : > { %9087 = vst [vmem:[#allocation42_spill] sm:$0xff] %v6845_v12  ;;  %v1246_v14 = vrot.slane %v6819_v11, 3  ;;  %1651 = vmatprep.subr.bf16.mxu1 %v6845_v12 }
 0x3b1   : > { %v1238_v28 = vrot.slane %v6832_v10, 2  ;;  %v1229_v18 = vrot.slane %v6832_v10, 1  ;;  %v1256_v19 = vrot.slane %v6832_v10, 4  ;;  %v1247_v20 = vrot.slane %v6832_v10, 3 }
 0x3b3   : > { %v1239_v13 = vsel %vm578_vm2, %v1237_v9, %v1238_v28  ;;  %v1230_v15 = vsel %vm558_vm0, %v1228_v16, %v1229_v18  ;;  %v1257_v4 = vsel %vm618_vm3, %v1255_v1, %v1256_v19  ;;  %v1248_v3 = vsel %vm598_vm1, %v1246_v14, %v1247_v20  ;;  %v6862_v1 = vld [vmem:[%s6332_s16 + $0x28] sm:$0xff] }
 0x3b4   : > { %v5336_v17 = vpack.i.bf16 %v1238_v28, %v1239_v13  ;;  %v5331_v8 = vpack.i.bf16 %v1229_v18, %v1230_v15  ;;  %v5346_v9 = vpack.i.bf16 %v1256_v19, %v1257_v4  ;;  %v5341_v16 = vpack.i.bf16 %v1247_v20, %v1248_v3  ;;  %v6859_v13 = vld [vmem:[%s6332_s16 + $0x20] sm:$0xff]  ;;  %v6865_v15 = vld [vmem:[%s6332_s16 + $0x30] sm:$0xff]  ;;  %v6872_v4 = vld [vmem:[%s6332_s16 + $0x38] sm:$0xff] }
 0x3b5   : > { %v2084_v14 = vrot.slane %v6862_v1, 1  ;;  %v2102_v3 = vrot.slane %v6859_v13, 2  ;;  %v2103_v28 = vrot.slane %v6862_v1, 2  ;;  %v2105_v18 = vrot.slane %v6865_v15, 2 }
 0x3b6   : > { %5337 = vrot.lane.b32.xlu1 %v5336_v17, %s6071_s27  ;;  %5332 = vrot.lane.b32.xlu0 %v5331_v8, %s6072_s24  ;;  %v2083_v17 = vrot.slane %v6859_v13, 1  ;;  %v2086_v8 = vrot.slane %v6865_v15, 1  ;;  %v2121_v19 = vrot.slane %v6859_v13, 3  ;;  %v2122_v20 = vrot.slane %v6862_v1, 3 }
 0x3b7   : > { %v2124_v12 = vrot.slane %v6865_v15, 3  ;;  %v2088_v48 = vrot.slane %v6872_v4, 1  ;;  %v2104_v46 = vsel %vm578_vm2, %v2102_v3, %v2103_v28  ;;  %v2106_v45 = vsel %vm578_vm2, %v2103_v28, %v2105_v18 }
 0x3b8   : > { %v2123_v44 = vsel %vm598_vm1, %v2121_v19, %v2122_v20  ;;  %v5356_v43 = vpack.i.bf16 %v2106_v45, %v2104_v46  ;;  %v2126_v40 = vrot.slane %v6872_v4, 3 }
 0x3b9   : > { %v2125_v42 = vsel %vm598_vm1, %v2122_v20, %v2124_v12  ;;  %v2089_v41 = vsel %vm558_vm0, %v2086_v8, %v2088_v48 }
 0x3ba   : > { %5347 = vrot.lane.b32.xlu1 %v5346_v9, %s6073_s18  ;;  %5342 = vrot.lane.b32.xlu0 %v5341_v16, %s6074_s17  ;;  %v2085_v9 = vsel %vm558_vm0, %v2083_v17, %v2084_v14  ;;  %v2087_v16 = vsel %vm558_vm0, %v2084_v14, %v2086_v8  ;;  %v2107_v17 = vrot.slane %v6872_v4, 2  ;;  %v5361_v14 = vpack.i.bf16 %v2125_v42, %v2123_v44 }
 0x3bb   : > { %v5351_v47 = vpack.i.bf16 %v2087_v16, %v2085_v9  ;;  %v5366_v9 = vpack.i.bf16 %v2088_v48, %v2089_v41  ;;  %v2127_v28 = vsel %vm598_vm1, %v2124_v12, %v2126_v40 }
 0x3bc   : > { %v2108_v3 = vsel %vm578_vm2, %v2105_v18, %v2107_v17  ;;  %v5376_v46 = vpack.i.bf16 %v2126_v40, %v2127_v28 }
 0x3bd   : > { %v5371_v45 = vpack.i.bf16 %v2107_v17, %v2108_v3 }
 0x3be   : > { %5352 = vrot.lane.b32.xlu0 %v5351_v47, %s6067_s20  ;;  %5357 = vrot.lane.b32.xlu1 %v5356_v43, %s9033_s23 }
 0x3c2   : > { %5362 = vrot.lane.b32.xlu0 %v5361_v14, %s8953_s29  ;;  %5367 = vrot.lane.b32.xlu1 %v5366_v9, %s6067_s20 }
 0x3c6   : > { %5372 = vrot.lane.b32.xlu0 %v5371_v45, %s9033_s23  ;;  %5377 = vrot.lane.b32.xlu1 %v5376_v46, %s8953_s29  ;;  %v6920_v45 = vld [vmem:[%s8905_s5 + $0x100] ss:$8 sps:$4 sm:$0xff]  }
 0x3c7   : > { %9088 = vst [vmem:[#allocation43_spill] sm:$0xff] %v6920_v45 }
 0x428   : > { %v5338_v42 = vpop.permute.xlu1 %5337  ;;  %v5333_v44 = vpop.permute.xlu0 %5332 }
 0x429   : > { %v5340_v47 = vunpack.i.h.bf16 %v5338_v42  ;;  %v5339_v8 = vunpack.i.l.bf16 %v5338_v42  ;;  %v5335_v43 = vunpack.i.h.bf16 %v5333_v44  ;;  %v5334_v41 = vunpack.i.l.bf16 %v5333_v44  ;;  %v6932_v44 = vld [vmem:[%s8905_s5 + $0x110] ss:$8 sps:$4 sm:$0xff]  }
 0x42a   : > { %9090 = vst [vmem:[#allocation45_spill] sm:$0xff] %v6932_v44 }
 0x42b   : > { %v1266_v19 = vsel %vm1264_vm9, %v6832_v10, %v5335_v43  ;;  %v1268_v20 = vsel %vm1036_vm8, %v5335_v43, %v5340_v47  ;;  %v1267_v16 = vsel %vm1036_vm8, %v5334_v41, %v5339_v8  ;;  %v1265_v17 = vsel %vm1264_vm9, %v6819_v11, %v5334_v41  ;;  %v6925_v11 = vld [vmem:[%s8905_s5 + $0x114] ss:$8 sps:$4 sm:$0xff]   ;;  %v6938_v47 = vld [vmem:[%s8905_s5 + $0x124] ss:$8 sps:$4 sm:$0xff]   ;;  %v6944_v8 = vld [vmem:[%s8905_s5 + $0x120] ss:$8 sps:$4 sm:$0xff]  }
 0x42c   : > { %v6897_v48 = vpop.permute.xlu1 %5347  ;;  %v6899_v12 = vpop.permute.xlu0 %5342  ;;  %v1275_v46 = vpack.c.bf16 %v1266_v19, %v1265_v17  ;;  %9089 = vst [vmem:[#allocation44_spill] sm:$0xff] %v6925_v11  ;;  %9091 = vst [vmem:[#allocation46_spill] sm:$0xff] %v6938_v47  ;;  %v6950_v43 = vld [vmem:[%s8905_s5 + $0x134] ss:$8 sps:$4 sm:$0xff]   ;;  %v6956_v41 = vld [vmem:[%s8905_s5 + $0x130] ss:$8 sps:$4 sm:$0xff]  }
 0x42d   : > { %v8955_v18 = vunpack.i.h.bf16 %v6899_v12  ;;  %v8952_v40 = vunpack.i.l.bf16 %v6899_v12  ;;  %v5350_v14 = vunpack.i.h.bf16 %v6897_v48  ;;  %v5349_v9 = vunpack.i.l.bf16 %v6897_v48  ;;  %9092 = vst [vmem:[#allocation47_spill] sm:$0xff] %v6944_v8  ;;  %9093 = vst [vmem:[#allocation48_spill] sm:$0xff] %v6950_v43  ;;  %v6962_v48 = vld [vmem:[%s8905_s5 + $0x144] ss:$8 sps:$4 sm:$0xff]   ;;  %v6968_v19 = vld [vmem:[%s8905_s5 + $0x140] ss:$8 sps:$4 sm:$0xff]  }
 0x42e   : > { %9094 = vst [vmem:[#allocation49_spill] sm:$0xff] %v6956_v41  ;;  %9095 = vst [vmem:[#allocation50_spill] sm:$0xff] %v6962_v48  ;;  %v6986_v17 = vld [vmem:[%s8905_s5 + $0x164] ss:$8 sps:$4 sm:$0xff]  }
 0x42f   : > { %v1270_v3 = vsel %vm1269_vm10, %v1267_v16, %v8952_v40  ;;  %v1271_v28 = vsel %vm1269_vm10, %v1268_v20, %v8955_v18  ;;  %v1278_v42 = vpack.c.bf16 %v5350_v14, %v5349_v9  ;;  %9096 = vst [vmem:[#allocation51_spill] sm:$0xff] %v6968_v19  ;;  %v6974_v20 = vld [vmem:[%s8905_s5 + $0x154] ss:$8 sps:$4 sm:$0xff]   ;;  %v6980_v16 = vld [vmem:[%s8905_s5 + $0x150] ss:$8 sps:$4 sm:$0xff]   ;;  %9099 = vst [vmem:[#allocation54_spill] sm:$0xff] %v6986_v17 }
 0x430   : > { %v1276_v10 = vpack.c.bf16 %v1271_v28, %v1270_v3  ;;  %9097 = vst [vmem:[#allocation52_spill] sm:$0xff] %v6974_v20  ;;  %9098 = vst [vmem:[#allocation53_spill] sm:$0xff] %v6980_v16  ;;  %v6992_v3 = vld [vmem:[%s8905_s5 + $0x160] ss:$8 sps:$4 sm:$0xff]   ;;  %v6998_v28 = vld [vmem:[%s8905_s5 + $0x174] ss:$8 sps:$4 sm:$0xff]  }
 0x431   : > { %9100 = vst [vmem:[#allocation55_spill] sm:$0xff] %v6992_v3  ;;  %9101 = vst [vmem:[#allocation56_spill] sm:$0xff] %v6998_v28  ;;  %v7022_v40 = vld [vmem:[%s8905_s5 + $0x194] ss:$8 sps:$4 sm:$0xff]   ;;  %v1331_v18 = vld [vmem:[%s8905_s5 + $0x1a0] sm:$0x33] }
 0x432   : > { %1640 = vmatprep.mubr.bf16.mxu1 %v1276_v10  ;;  %v7004_v10 = vld [vmem:[%s8905_s5 + $0x170] ss:$8 sps:$4 sm:$0xff]   ;;  %9105 = vst [vmem:[#allocation60_spill] sm:$0xff] %v7022_v40 }
 0x433   : > { %1641 = vmatmul.mubr.bf16.vlgmr.msra.gmra.mrb[12].mxu1 %v1275_v46  ;;  %9102 = vst [vmem:[#allocation57_spill] sm:$0xff] %v7004_v10  ;;  %v7010_v46 = vld [vmem:[%s8905_s5 + $0x184] ss:$8 sps:$4 sm:$0xff]  }
 0x434   : > { %1652 = vmatpush1.bf16.msra.mxu1 %v6920_v45  ;;  %4961 = vmatprep.mubr.msk.bf16.mxu1 %vm1597_vm11, %v1278_v42  ;;  %9103 = vst [vmem:[#allocation58_spill] sm:$0xff] %v7010_v46  ;;  %v7016_v42 = vld [vmem:[%s8905_s5 + $0x180] ss:$8 sps:$4 sm:$0xff]  }
 0x435   : > { %1653 = vmatprep.subr.bf16.mxu1 %v6925_v11  ;;  %9104 = vst [vmem:[#allocation59_spill] sm:$0xff] %v7016_v42 }
 0x438   : > { %1654 = vmatpush1.bf16.msra.mxu1 %v6932_v44 }
 0x439   : > { %1655 = vmatprep.subr.bf16.mxu1 %v6938_v47 }
 0x43c   : > { %1656 = vmatpush1.bf16.msra.mxu1 %v6944_v8 }
 0x43d   : > { %1657 = vmatprep.subr.bf16.mxu1 %v6950_v43 }
 0x440   : > { %1658 = vmatpush1.bf16.msra.mxu1 %v6956_v41 }
 0x441   : > { %1659 = vmatprep.subr.bf16.mxu1 %v6962_v48 }
 0x444   : > { %1660 = vmatpush1.bf16.msra.mxu1 %v6968_v19 }
 0x445   : > { %1661 = vmatprep.subr.bf16.mxu1 %v6974_v20 }
 0x448   : > { %1662 = vmatpush1.bf16.msra.mxu1 %v6980_v16  ;;  %v9110_v16 = vunpack.i.l.bf16 %v6899_v12 }
 0x449   : > { %1663 = vmatprep.subr.bf16.mxu1 %v6986_v17 }
 0x44c   : > { %1664 = vmatpush1.bf16.msra.mxu1 %v6992_v3 }
 0x44d   : > { %1665 = vmatprep.subr.bf16.mxu1 %v6998_v28  ;;  %v7034_v28 = vcombine.high %v1331_v18, %v1331_v18 }
 0x44f   : > { %9107 = vst [vmem:[#allocation62_spill] sm:$0xff] %v7034_v28 }
 0x450   : > { %1666 = vmatpush1.bf16.msra.mxu1 %v7004_v10  ;;  %v7031_v10 = vld [vmem:[%s8905_s5 + $0x190] ss:$8 sps:$4 sm:$0xff]  }
 0x451   : > { %1667 = vmatprep.subr.bf16.mxu1 %v7010_v46  ;;  %9106 = vst [vmem:[#allocation61_spill] sm:$0xff] %v7031_v10  ;;  %v4958_v46 = vcombine.low %v1331_v18, %v1331_v18 }
 0x453   : > { %v7040_v3 = vsel %vm1601_vm12, %v4958_v46, 0  ;;  %v7058_v46 = vld [vmem:[%s8901_s1] ss:$8 sps:$4 sm:$0xff]  }
 0x454   : > { %1668 = vmatpush1.bf16.msra.mxu1 %v7016_v42  ;;  %9108 = vst [vmem:[#allocation63_spill] sm:$0xff] %v7040_v3  ;;  %v9109_v42 = vunpack.i.h.bf16 %v6899_v12  ;;  %9112 = vst [vmem:[#allocation65_spill] sm:$0xff] %v7058_v46  ;;  %v7064_v12 = vld [vmem:[%s8901_s1 + $0x14] ss:$8 sps:$4 sm:$0xff]  }
 0x455   : > { %1669 = vmatprep.subr.bf16.mxu1 %v7022_v40  ;;  %v1273_v40 = vsel %vm1272_vm13, %v9110_v16, %v5349_v9  ;;  %9113 = vst [vmem:[#allocation66_spill] sm:$0xff] %v7064_v12  ;;  %v7082_v9 = vld [vmem:[%s8901_s1 + $0x20] ss:$8 sps:$4 sm:$0xff]   ;;  %v7088_v16 = vld [vmem:[%s8901_s1 + $0x34] ss:$8 sps:$4 sm:$0xff]  }
 0x456   : > { %v1274_v17 = vsel %vm1272_vm13, %v9109_v42, %v5350_v14  ;;  %v7076_v14 = vld [vmem:[%s8901_s1 + $0x24] ss:$8 sps:$4 sm:$0xff]   ;;  %9116 = vst [vmem:[#allocation69_spill] sm:$0xff] %v7082_v9  ;;  %9117 = vst [vmem:[#allocation70_spill] sm:$0xff] %v7088_v16 }
 0x457   : > { %v1277_v18 = vpack.c.bf16 %v1274_v17, %v1273_v40  ;;  %v7070_v40 = vld [vmem:[%s8901_s1 + $0x10] ss:$8 sps:$4 sm:$0xff]   ;;  %9115 = vst [vmem:[#allocation68_spill] sm:$0xff] %v7076_v14  ;;  %v7100_v42 = vld [vmem:[%s8901_s1 + $0x44] ss:$8 sps:$4 sm:$0xff]  }
 0x458   : > { %1670 = vmatpush1.bf16.msra.mxu1 %v7031_v10  ;;  %v7052_v10 = vld [vmem:[%s8901_s1 + $0x4] ss:$8 sps:$4 sm:$0xff]   ;;  %9114 = vst [vmem:[#allocation67_spill] sm:$0xff] %v7070_v40  ;;  %v7094_v17 = vld [vmem:[%s8901_s1 + $0x30] ss:$8 sps:$4 sm:$0xff]   ;;  %9119 = vst [vmem:[#allocation72_spill] sm:$0xff] %v7100_v42 }
 0x459   : > { %4960 = vmatprep.subr.msk.bf16.mxu1 %vm1601_vm12, %v7034_v28  ;;  %9111 = vst [vmem:[#allocation64_spill] sm:$0xff] %v7052_v10  ;;  %9118 = vst [vmem:[#allocation71_spill] sm:$0xff] %v7094_v17 }
 0x45c   : > { %1672 = vmatpush1.bf16.msra.mxu1 %v7040_v3 }
 0x45d   : > { %2173 = vmatprep.subr.bf16.mxu1 %v7052_v10 }
 0x45f   : > { %1684 = vmatmul.mubr.bf16.vlgmr.msra.gmra.mrb[12].mxu1 %v1277_v18  ;;  %v7106_v18 = vld [vmem:[%s8901_s1 + $0x40] ss:$8 sps:$4 sm:$0xff]  }
 0x460   : > { %2174 = vmatpush1.bf16.msra.mxu1 %v7058_v46  ;;  %9120 = vst [vmem:[#allocation73_spill] sm:$0xff] %v7106_v18  ;;  %v2145_v46 = vrot.slane %v6872_v4, 4 }
 0x461   : > { %2175 = vmatprep.subr.bf16.mxu1 %v7064_v12  ;;  %v2143_v12 = vrot.slane %v6865_v15, 4 }
 0x464   : > { %2176 = vmatpush1.bf16.msra.mxu1 %v7070_v40  ;;  %v2141_v40 = vrot.slane %v6862_v1, 4 }
 0x465   : > { %2177 = vmatprep.subr.bf16.mxu1 %v7076_v14  ;;  %v5358_v14 = vpop.permute.xlu1 %5357 }
 0x466   : > { %v5360_v3 = vunpack.i.h.bf16 %v5358_v14  ;;  %v5359_v28 = vunpack.i.l.bf16 %v5358_v14 }
 0x468   : > { %2178 = vmatpush1.bf16.msra.mxu1 %v7082_v9  ;;  %v5353_v9 = vpop.permute.xlu0 %5352 }
 0x469   : > { %2179 = vmatprep.subr.bf16.mxu1 %v7088_v16  ;;  %v7112_v16 = vld [vmem:[%s8901_s1 + $0x54] ss:$8 sps:$4 sm:$0xff]   ;;  %v5354_v10 = vunpack.i.l.bf16 %v5353_v9  ;;  %v5368_v44 = vpop.permute.xlu1 %5367 }
 0x46a   : > { %9121 = vst [vmem:[#allocation74_spill] sm:$0xff] %v7112_v16  ;;  %v5369_v45 = vunpack.i.l.bf16 %v5368_v44 }
 0x46b   : > { %v2151_v48 = vsel %vm630_vm4, %v6859_v13, %v5354_v10 }
 0x46c   : > { %2180 = vmatpush1.bf16.msra.mxu1 %v7094_v17  ;;  %v7118_v17 = vld [vmem:[%s8901_s1 + $0x50] ss:$8 sps:$4 sm:$0xff]   ;;  %v2155_v43 = vsel %vm635_vm5, %v2151_v48, %v5359_v28  ;;  %v5363_v47 = vpop.permute.xlu0 %5362 }
 0x46d   : > { %2181 = vmatprep.subr.bf16.mxu1 %v7100_v42  ;;  %9122 = vst [vmem:[#allocation75_spill] sm:$0xff] %v7118_v17  ;;  %v7124_v42 = vld [vmem:[%s8901_s1 + $0x64] ss:$8 sps:$4 sm:$0xff]   ;;  %v5365_v14 = vunpack.i.h.bf16 %v5363_v47  ;;  %v5364_v11 = vunpack.i.l.bf16 %v5363_v47  ;;  %v5378_v28 = vpop.permute.xlu1 %5377 }
 0x46e   : > { %9123 = vst [vmem:[#allocation76_spill] sm:$0xff] %v7124_v42 }
 0x470   : > { %2182 = vmatpush1.bf16.msra.mxu1 %v7106_v18  ;;  %v7130_v18 = vld [vmem:[%s8901_s1 + $0x60] ss:$8 sps:$4 sm:$0xff]  }
 0x471   : > { %2183 = vmatprep.subr.bf16.mxu1 %v7112_v16  ;;  %9124 = vst [vmem:[#allocation77_spill] sm:$0xff] %v7130_v18  ;;  %v7136_v16 = vld [vmem:[%s8901_s1 + $0x74] ss:$8 sps:$4 sm:$0xff]  }
 0x472   : > { %9125 = vst [vmem:[#allocation78_spill] sm:$0xff] %v7136_v16 }
 0x474   : > { %2184 = vmatpush1.bf16.msra.mxu1 %v7118_v17  ;;  %v7142_v17 = vld [vmem:[%s8901_s1 + $0x70] ss:$8 sps:$4 sm:$0xff]  }
 0x475   : > { %2185 = vmatprep.subr.bf16.mxu1 %v7124_v42  ;;  %9126 = vst [vmem:[#allocation79_spill] sm:$0xff] %v7142_v17  ;;  %v7148_v42 = vld [vmem:[%s8901_s1 + $0x84] ss:$8 sps:$4 sm:$0xff]  }
 0x476   : > { %9127 = vst [vmem:[#allocation80_spill] sm:$0xff] %v7148_v42 }
 0x478   : > { %2186 = vmatpush1.bf16.msra.mxu1 %v7130_v18  ;;  %v7154_v18 = vld [vmem:[%s8901_s1 + $0x80] ss:$8 sps:$4 sm:$0xff]  }
 0x479   : > { %2187 = vmatprep.subr.bf16.mxu1 %v7136_v16  ;;  %9128 = vst [vmem:[#allocation81_spill] sm:$0xff] %v7154_v18  ;;  %v7160_v16 = vld [vmem:[%s8901_s1 + $0x94] ss:$8 sps:$4 sm:$0xff]  }
 0x47a   : > { %9129 = vst [vmem:[#allocation82_spill] sm:$0xff] %v7160_v16 }
 0x47c   : > { %2188 = vmatpush1.bf16.msra.mxu1 %v7142_v17  ;;  %v7166_v17 = vld [vmem:[%s8901_s1 + $0x90] ss:$8 sps:$4 sm:$0xff]  }
 0x47d   : > { %2189 = vmatprep.subr.bf16.mxu1 %v7148_v42  ;;  %9130 = vst [vmem:[#allocation83_spill] sm:$0xff] %v7166_v17  ;;  %v9131_v42 = vmov 0  }
 0x480   : > { %2190 = vmatpush1.bf16.msra.mxu1 %v7154_v18  ;;  %v2140_v18 = vrot.slane %v6859_v13, 4 }
 0x481   : > { %2191 = vmatprep.subr.bf16.mxu1 %v7160_v16  ;;  %v5355_v16 = vunpack.i.h.bf16 %v5353_v9  ;;  %v2146_v9 = vsel %vm618_vm3, %v2143_v12, %v2145_v46 }
 0x482   : > { %v2142_v20 = vsel %vm618_vm3, %v2140_v18, %v2141_v40  ;;  %v5370_v18 = vunpack.i.h.bf16 %v5368_v44  ;;  %v2166_v13 = vpack.c.bf16 %v2145_v46, %v2146_v9  ;;  %v5379_v44 = vunpack.i.l.bf16 %v5378_v28  ;;  %v7258_v46 = vld [vmem:[%s8907_s7 + $0x18] sm:$0xff]   ;;  %v7279_v9 = vld [vmem:[%s8907_s7 + $0x30] sm:$0xff]  }
 0x483   : > { %v2152_v19 = vsel %vm630_vm4, %v6862_v1, %v5355_v16  ;;  %v2159_v1 = vsel %vm640_vm6, %v2155_v43, %v5364_v11  ;;  %v7251_v43 = vld [vmem:[%s8907_s7 + $0x10] sm:$0xff]   ;;  %v7265_v16 = vld [vmem:[%s8907_s7 + $0x20] sm:$0xff]  }
 0x484   : > { %2192 = vmatpush1.bf16.msra.mxu1 %v7166_v17  ;;  %v2144_v17 = vsel %vm618_vm3, %v2141_v40, %v2143_v12  ;;  %v2156_v8 = vsel %vm635_vm5, %v2152_v19, %v5360_v3  ;;  %v2154_v48 = vsel %vm630_vm4, %v6872_v4, %v5370_v18  ;;  %v2153_v19 = vsel %vm630_vm4, %v6865_v15, %v5369_v45  ;;  %v5373_v3 = vpop.permute.xlu0 %5372  ;;  %v7244_v45 = vld [vmem:[%s8907_s7 + $0x8] sm:$0xff]   ;;  %v7293_v18 = vld [vmem:[%s8907_s7 + $0x40] sm:$0xff]  }
 0x485   : > { %2372 = vmatprep.subr.bf16.mxu1 %v9131_v42  ;;  %v2164_v41 = vpack.c.bf16 %v2144_v17, %v2142_v20  ;;  %v2160_v40 = vsel %vm640_vm6, %v2156_v8, %v5365_v14  ;;  %v5375_v10 = vunpack.i.h.bf16 %v5373_v3  ;;  %v5374_v47 = vunpack.i.l.bf16 %v5373_v3  ;;  %v7272_v17 = vld [vmem:[%s8907_s7 + $0x28] sm:$0xff]   ;;  %v7287_v14 = vld [vmem:[%s8907_s7 + $0x38] sm:$0xff]  }
 0x486   : > { %v2163_v20 = vpack.c.bf16 %v2160_v40, %v2159_v1  ;;  %v5380_v12 = vunpack.i.h.bf16 %v5378_v28  ;;  %v7301_v1 = vld [vmem:[%s8907_s7 + $0x48] sm:$0xff]  }
 0x487   : > { %5014 = vmatprep.mubr.msk.bf16.mxu1 %vm630_vm4, %v2164_v41  ;;  %v2158_v41 = vsel %vm635_vm5, %v2154_v48, %v5375_v10  ;;  %v2157_v11 = vsel %vm635_vm5, %v2153_v19, %v5374_v47 }
 0x488   : > { %2206 = vmatmul.mubr.bf16.vlgmr.msra.gmra.mrb[16].mxu1 %v2163_v20  ;;  %v2161_v4 = vsel %vm640_vm6, %v2157_v11, %v5379_v44  ;;  %v2162_v8 = vsel %vm640_vm6, %v2158_v41, %v5380_v12 }
 0x489   : > { %5015 = vmatprep.mubr.msk.bf16.mxu1 %vm630_vm4, %v2166_v13  ;;  %2373 = vmatpush1.bf16.msra.mxu1 %v6463_v29  ;;  %v2165_v15 = vpack.c.bf16 %v2162_v8, %v2161_v4 }
 0x48a   : > { %2374 = vmatprep.subr.bf16.mxu1 %v9131_v42 }
 0x48d   : > { %2375 = vmatpush1.bf16.msra.mxu1 %v6470_v30 }
 0x48e   : > { %2376 = vmatprep.subr.bf16.mxu1 %v9131_v42 }
 0x490   : > { %2216 = vmatmul.mubr.bf16.gmra.mrb[20].mxu1 %v2165_v15 }
 0x491   : > { %2377 = vmatpush1.bf16.msra.mxu1 %v6477_v31 }
 0x492   : > { %2378 = vmatprep.subr.bf16.mxu1 %v9131_v42 }
 0x495   : > { %2379 = vmatpush1.bf16.msra.mxu1 %v6484_v32 }
 0x496   : > { %2380 = vmatprep.subr.bf16.mxu1 %v9131_v42 }
 0x499   : > { %2381 = vmatpush1.bf16.msra.mxu1 %v6491_v33 }
 0x49a   : > { %2382 = vmatprep.subr.bf16.mxu1 %v9131_v42 }
 0x49d   : > { %2383 = vmatpush1.bf16.msra.mxu1 %v6498_v34 }
 0x49e   : > { %2384 = vmatprep.subr.bf16.mxu1 %v9131_v42 }
 0x4a1   : > { %2385 = vmatpush1.bf16.msra.mxu1 %v6505_v35 }
 0x4a2   : > { %2386 = vmatprep.subr.bf16.mxu1 %v9131_v42 }
 0x4a5   : > { %2387 = vmatpush1.bf16.msra.mxu1 %v6585_v59  ;;  %v7221_v59 = vld [vmem:[%s8906_s6] sm:$0x7] }
 0x4a6   : > { %2388 = vmatprep.subr.bf16.mxu1 %v9131_v42 }
 0x4a9   : > { %2389 = vmatpush1.bf16.msra.mxu1 %v6599_v61  ;;  %v7231_v61 = vld [vmem:[%s8906_s6 + $0x4] sm:$0x7] }
 0x4aa   : > { %2390 = vmatprep.subr.bf16.mxu1 %v9131_v42 }
 0x4ad   : > { %2391 = vmatpush1.bf16.msra.mxu1 %v6613_v63  ;;  %v7236_v63 = vld [vmem:[%s8907_s7] sm:$0xff]  }
 0x4ae   : > { %2392 = vmatprep.subr.bf16.mxu1 %v9131_v42 }
 0x4b1   : > { %2393 = vmatpush1.bf16.msra.mxu1 %v6629_v6 }
 0x532   : > { %v1685_v29 = vpop.f32.mrb[12].mxu1 }
 0x533   : > { %v1687_v30 = vpop.f32.mrb[13].mxu1 }
 0x534   : > { %v1689_v31 = vpop.f32.mrb[14].mxu1 }
 0x535   : > { %v1694_v32 = vpack.c.bf16 %v1689_v31, %v1685_v29  ;;  %v1691_v33 = vpop.f32.mrb[15].mxu1 }
 0x536   : > { %v1695_v34 = vpack.c.bf16 %v1691_v33, %v1687_v30 }
 0x537   : > { %v1702_v35 = vsel %vm598_vm1, %v1694_v32, 0 }
 0x538   : > { %4962 = vmatprep.subr.msk.bf16.mxu0 %vm598_vm1, %v1695_v34 }
 0x539   : > { %1708 = vmatpush1.bf16.msra.mxu0 %v1702_v35 }
 0x53a   : > { %4965 = vmatprep.subr.msk.bf16.mxu0 %vm598_vm1, %v1695_v34 }
 0x53c   : > { %4963 = vmatmul.mubr.msk.bf16.vlgmr.msra.gmra.mrb[12].mxu0 %vm1697_vm14, %v7221_v59 }
 0x53d   : > { %1754 = vmatpush1.bf16.msra.mxu0 %v1702_v35  ;;  %1785 = vmatprep.mubr.bf16.mxu0 %v9131_v42 }
 0x53e   : > { %1881 = vmatprep.subr.bf16.mxu0 %v9131_v42 }
 0x544   : > { %4966 = vmatmul.mubr.msk.bf16.vlgmr.msra.gmra.mrb[16].mxu0 %vm1697_vm14, %v7231_v61 }
 0x545   : > { %1882 = vmatpush1.bf16.msra.mxu0 %v7236_v63 }
 0x546   : > { %1883 = vmatprep.subr.bf16.mxu0 %v9131_v42 }
 0x549   : > { %1884 = vmatpush1.bf16.msra.mxu0 %v7244_v45 }
 0x54a   : > { %1885 = vmatprep.subr.bf16.mxu0 %v9131_v42 }
 0x54d   : > { %1886 = vmatpush1.bf16.msra.mxu0 %v7251_v43 }
 0x54e   : > { %1887 = vmatprep.subr.bf16.mxu0 %v9131_v42 }
 0x551   : > { %1888 = vmatpush1.bf16.msra.mxu0 %v7258_v46 }
 0x552   : > { %1889 = vmatprep.subr.bf16.mxu0 %v9131_v42 }
 0x555   : > { %1890 = vmatpush1.bf16.msra.mxu0 %v7265_v16 }
 0x556   : > { %1891 = vmatprep.subr.bf16.mxu0 %v9131_v42 }
 0x559   : > { %1892 = vmatpush1.bf16.msra.mxu0 %v7272_v17 }
 0x55a   : > { %1893 = vmatprep.subr.bf16.mxu0 %v9131_v42 }
 0x55b   : > { %v2207_v40 = vpop.f32.mrb[16].mxu1 }
 0x55c   : > { %v2209_v13 = vpop.f32.mrb[17].mxu1 }
 0x55d   : > { %1894 = vmatpush1.bf16.msra.mxu0 %v7279_v9  ;;  %v2211_v20 = vpop.f32.mrb[18].mxu1 }
 0x55e   : > { %1895 = vmatprep.subr.bf16.mxu0 %v9131_v42  ;;  %v2226_v48 = vpack.c.bf16 %v2211_v20, %v2207_v40  ;;  %v2213_v19 = vpop.f32.mrb[19].mxu1  ;;  %v7308_v40 = vld [vmem:[%s8907_s7 + $0x50] sm:$0xff]   ;;  %v7316_v20 = vld [vmem:[%s8907_s7 + $0x58] sm:$0xff]  }
 0x55f   : > { %v2227_v3 = vpack.c.bf16 %v2213_v19, %v2209_v13  ;;  %v7323_v19 = vld [vmem:[%s8907_s7 + $0x60] sm:$0xff]  }
 0x561   : > { %1896 = vmatpush1.bf16.msra.mxu0 %v7287_v14 }
 0x562   : > { %1897 = vmatprep.subr.bf16.mxu0 %v9131_v42 }
 0x563   : > { %v2217_v28 = vpop.f32.mrb[20].mxu1 }
 0x564   : > { %v2219_v10 = vpop.f32.mrb[21].mxu1 }
 0x565   : > { %1898 = vmatpush1.bf16.msra.mxu0 %v7293_v18  ;;  %v2221_v47 = vpop.f32.mrb[22].mxu1 }
 0x566   : > { %1899 = vmatprep.subr.bf16.mxu0 %v9131_v42  ;;  %v2228_v12 = vpack.c.bf16 %v2221_v47, %v2217_v28  ;;  %v2223_v44 = vpop.f32.mrb[23].mxu1  ;;  %v7330_v28 = vld [vmem:[%s8907_s7 + $0x68] sm:$0xff]   ;;  %v7344_v47 = vld [vmem:[%s8907_s7 + $0x78] sm:$0xff]  }
 0x567   : > { %v2229_v41 = vpack.c.bf16 %v2223_v44, %v2219_v10  ;;  %v7337_v10 = vld [vmem:[%s8907_s7 + $0x70] sm:$0xff]   ;;  %v7351_v44 = vld [vmem:[%s8907_s7 + $0x80] sm:$0xff]  }
 0x569   : > { %1900 = vmatpush1.bf16.msra.mxu0 %v7301_v1 }
 0x56a   : > { %2002 = vmatprep.subr.bf16.mxu0 %v9131_v42 }
 0x60f   : > { %v1741_v11 = vpop.f32.mrb[12].mxu0 }
 0x610   : > { %v1743_v4 = vpop.f32.mrb[13].mxu0 }
 0x611   : > { %v1745_v8 = vpop.f32.mrb[14].mxu0 }
 0x612   : > { %v1746_v15 = vpop.f32.mrb[15].mxu0  ;;  %v7372_v8 = vld [vmem:[%s8907_s7 + $0x98] sm:$0xff]  }
 0x613   : > { %v2231_v15 = vsel %vm578_vm2, %v2228_v12, 0 }
 0x617   : > { %v1787_v29 = vpop.f32.mrb[16].mxu0 }
 0x618   : > { %v1794_v30 = vmax.f32 %v1741_v11, %v1787_v29  ;;  %v1789_v31 = vpop.f32.mrb[17].mxu0  ;;  %v7358_v11 = vld [vmem:[%s8907_s7 + $0x88] sm:$0xff]  }
 0x619   : > { %v1795_v32 = vmax.f32 %v1743_v4, %v1789_v31  ;;  %v1791_v33 = vpop.f32.mrb[18].mxu0  ;;  %v7365_v4 = vld [vmem:[%s8907_s7 + $0x90] sm:$0xff]  }
 0x61a   : > { %v1792_v34 = vpop.f32.mrb[19].mxu0  ;;  %v1796_v13 = vpack.c.bf16 %v1794_v30, %v1794_v30 }
 0x61b   : > { %v1797_v35 = vpack.c.bf16 %v1795_v32, %v1795_v32 }
 0x61d   : > { %4977 = vmatprep.mubr.msk.bf16.mxu0 %vm630_vm4, %v1797_v35 }
 0x61e   : > { %1914 = vmatmul.mubr.bf16.vlgmr.msra.gmra.mrb[20].mxu0 %v1796_v13 }
 0x61f   : > { %2003 = vmatpush1.bf16.msra.mxu0 %v7308_v40  ;;  %5008 = vmatprep.mubr.msk.bf16.mxu0 %vm630_vm4, %v1797_v35  ;;  %v9147_v35 = vld [vmem:[#allocation36_spill] sm:$0xff] }
 0x620   : > { %2004 = vmatprep.subr.bf16.mxu0 %v9131_v42 }
 0x623   : > { %2005 = vmatpush1.bf16.msra.mxu0 %v7316_v20 }
 0x624   : > { %2006 = vmatprep.subr.bf16.mxu0 %v9131_v42 }
 0x627   : > { %2007 = vmatpush1.bf16.msra.mxu0 %v7323_v19 }
 0x628   : > { %2008 = vmatprep.subr.bf16.mxu0 %v9131_v42 }
 0x62b   : > { %2009 = vmatpush1.bf16.msra.mxu0 %v7330_v28 }
 0x62c   : > { %2010 = vmatprep.subr.bf16.mxu0 %v9131_v42 }
 0x62f   : > { %2011 = vmatpush1.bf16.msra.mxu0 %v7337_v10 }
 0x630   : > { %2012 = vmatprep.subr.bf16.mxu0 %v9131_v42 }
 0x633   : > { %2013 = vmatpush1.bf16.msra.mxu0 %v7344_v47 }
 0x634   : > { %2014 = vmatprep.subr.bf16.mxu0 %v9131_v42 }
 0x637   : > { %2015 = vmatpush1.bf16.msra.mxu0 %v7351_v44 }
 0x638   : > { %2016 = vmatprep.subr.bf16.mxu0 %v9131_v42 }
 0x63b   : > { %2017 = vmatpush1.bf16.msra.mxu0 %v7358_v11 }
 0x63c   : > { %2018 = vmatprep.subr.bf16.mxu0 %v9131_v42 }
 0x63f   : > { %2019 = vmatpush1.bf16.msra.mxu0 %v7365_v4 }
 0x640   : > { %2020 = vmatprep.subr.bf16.mxu0 %v9131_v42 }
 0x643   : > { %2021 = vmatpush1.bf16.msra.mxu0 %v7372_v8 }
 0x644   : > { %2236 = vmatprep.subr.bf16.mxu0 %v2227_v3 }
 0x646   : > { %2035 = vmatmul.mubr.bf16.vlgmr.msra.gmra.mrb[24].mxu0 %v1796_v13  ;;  %v9148_v13 = vld [vmem:[#allocation38_spill] sm:$0xff] }
 0x647   : > { %2237 = vmatpush1.bf16.msra.mxu0 %v2226_v48  ;;  %2268 = vmatprep.mubr.bf16.mxu0 %v9131_v42 }
 0x648   : > { %5016 = vmatprep.subr.msk.bf16.mxu0 %vm578_vm2, %v2229_v41 }
 0x64b   : > { %2239 = vmatpush1.bf16.msra.mxu0 %v2231_v15 }
 0x64c   : > { %2279 = vmatprep.subr.bf16.mxu0 %v2227_v3 }
 0x64e   : > { %5017 = vmatmul.mubr.msk.bf16.vlgmr.msra.gmra.mrb[28].mxu0 %vm839_vm7, %v6514_v49 }
 0x64f   : > { %2280 = vmatpush1.bf16.msra.mxu0 %v2226_v48  ;;  %2311 = vmatprep.mubr.bf16.mxu0 %v9131_v42 }
 0x650   : > { %5018 = vmatprep.subr.msk.bf16.mxu0 %vm578_vm2, %v2229_v41 }
 0x653   : > { %2282 = vmatpush1.bf16.msra.mxu0 %v2231_v15  ;;  %v9149_v15 = vld [vmem:[#allocation39_spill] sm:$0xff] }
 0x654   : > { %2331 = vmatprep.subr.bf16.mxu0 %v9131_v42 }
 0x656   : > { %5019 = vmatmul.mubr.msk.bf16.vlgmr.msra.gmra.mrb[32].mxu0 %vm839_vm7, %v6523_v50 }
 0x657   : > { %2332 = vmatpush1.bf16.msra.mxu0 %v6528_v51 }
 0x658   : > { %2333 = vmatprep.subr.bf16.mxu0 %v9131_v42 }
 0x65b   : > { %2334 = vmatpush1.bf16.msra.mxu0 %v6537_v52 }
 0x65c   : > { %2335 = vmatprep.subr.bf16.mxu0 %v9131_v42 }
 0x65f   : > { %2336 = vmatpush1.bf16.msra.mxu0 %v6544_v53 }
 0x660   : > { %2337 = vmatprep.subr.bf16.mxu0 %v9131_v42 }
 0x663   : > { %2338 = vmatpush1.bf16.msra.mxu0 %v6551_v54  ;;  %v7999_v54 = vld [vmem:[%s8905_s5 + $0xf0] ss:$8 sps:$4 sm:$0xff]  }
 0x664   : > { %2339 = vmatprep.subr.bf16.mxu0 %v9131_v42 }
 0x667   : > { %2340 = vmatpush1.bf16.msra.mxu0 %v6558_v55 }
 0x668   : > { %2341 = vmatprep.subr.bf16.mxu0 %v9131_v42 }
 0x66b   : > { %2342 = vmatpush1.bf16.msra.mxu0 %v6565_v56 }
 0x66c   : > { %2343 = vmatprep.subr.bf16.mxu0 %v9131_v42 }
 0x66f   : > { %2344 = vmatpush1.bf16.msra.mxu0 %v6572_v57 }
 0x670   : > { %2345 = vmatprep.subr.bf16.mxu0 %v9131_v42 }
 0x673   : > { %2346 = vmatpush1.bf16.msra.mxu0 %v6580_v58 }
 0x674   : > { %2347 = vmatprep.subr.bf16.mxu0 %v9131_v42 }
 0x677   : > { %2348 = vmatpush1.bf16.msra.mxu0 %v6594_v60 }
 0x678   : > { %2349 = vmatprep.subr.bf16.mxu0 %v9131_v42 }
 0x67b   : > { %2350 = vmatpush1.bf16.msra.mxu0 %v6608_v62 }
 0x67c   : > { %2351 = vmatprep.subr.bf16.mxu0 %v9131_v42 }
 0x67f   : > { %2352 = vmatpush1.bf16.msra.mxu0 %v6626_v5 }
 0x680   : > { %2472 = vmatprep.subr.bf16.mxu0 %v6639_v0 }
 0x6f1   : > { %v7408_v49 = vpop.f32.mrb[20].mxu0 }
 0x6f2   : > { %9132 = vst [vmem:[#allocation84_spill] sm:$0xff] %v7408_v49  ;;  %v1917_v50 = vpop.f32.mrb[21].mxu0 }
 0x6f3   : > { %v1918_v51 = vpop.f32.mrb[22].mxu0  ;;  %v9150_v50 = vld [vmem:[#allocation40_spill] sm:$0xff] }
 0x6f4   : > { %v1919_v52 = vpop.f32.mrb[23].mxu0  ;;  %v9151_v51 = vld [vmem:[#allocation41_spill] sm:$0xff] }
 0x6f5   : > { %v9152_v52 = vld [vmem:[#allocation42_spill] sm:$0xff] }
 0x719   : > { %v7410_v53 = vpop.f32.mrb[24].mxu0 }
 0x71a   : > { %9133 = vst [vmem:[#allocation85_spill] sm:$0xff] %v7410_v53  ;;  %v2038_v55 = vpop.f32.mrb[25].mxu0 }
 0x71b   : > { %v2039_v56 = vpop.f32.mrb[26].mxu0 }
 0x71c   : > { %v2040_v57 = vpop.f32.mrb[27].mxu0 }
 0x721   : > { %v2270_v58 = vpop.f32.mrb[28].mxu0 }
 0x722   : > { %v2272_v60 = vpop.f32.mrb[29].mxu0 }
 0x723   : > { %v2274_v62 = vpop.f32.mrb[30].mxu0 }
 0x724   : > { %v2276_v48 = vpop.f32.mrb[31].mxu0 }
 0x729   : > { %v2313_v3 = vpop.f32.mrb[32].mxu0 }
 0x72a   : > { %v2322_v12 = vmax.f32 %v2270_v58, %v2313_v3  ;;  %v2315_v0 = vpop.f32.mrb[33].mxu0  ;;  %v9153_v3 = vld [vmem:[#allocation37_spill] sm:$0xff] }
 0x72b   : > { %v2323_v41 = vmax.f32 %v2272_v60, %v2315_v0  ;;  %v2317_v29 = vpop.f32.mrb[34].mxu0 }
 0x72c   : > { %v2324_v30 = vmax.f32 %v2274_v62, %v2317_v29  ;;  %v2319_v31 = vpop.f32.mrb[35].mxu0 }
 0x72d   : > { %v2325_v32 = vmax.f32 %v2276_v48, %v2319_v31 }
 0x72e   : > { %v2326_v33 = vpack.c.bf16 %v2324_v30, %v2322_v12 }
 0x72f   : > { %v2327_v34 = vpack.c.bf16 %v2325_v32, %v2323_v41 }
 0x731   : > { %5020 = vmatprep.mubr.msk.bf16.mxu0 %vm1036_vm8, %v2327_v34  ;;  %5021 = vmatprep.mubr.msk.bf16.mxu1 %vm1036_vm8, %v2327_v34 }
 0x732   : > { %2364 = vmatmul.mubr.bf16.vlgmr.msra.gmra.mrb[36].mxu0 %v2326_v33  ;;  %2405 = vmatmul.mubr.bf16.vlgmr.msra.gmra.mrb[24].mxu1 %v2326_v33 }
 0x733   : > { %2473 = vmatpush1.bf16.msra.mxu0 %v6644_v21  ;;  %2598 = vmatprep.mubr.bf16.mxu1 %v9131_v42  ;;  %v9134_v21 = vld [vmem:[#allocation23_spill] sm:$0xff] }
 0x734   : > { %2474 = vmatprep.subr.bf16.mxu0 %v6649_v22  ;;  %v9135_v22 = vld [vmem:[#allocation24_spill] sm:$0xff] }
 0x737   : > { %2475 = vmatpush1.bf16.msra.mxu0 %v6656_v23  ;;  %v9136_v23 = vld [vmem:[#allocation25_spill] sm:$0xff] }
 0x738   : > { %2476 = vmatprep.subr.bf16.mxu0 %v6662_v24  ;;  %v9137_v24 = vld [vmem:[#allocation26_spill] sm:$0xff] }
 0x73b   : > { %2477 = vmatpush1.bf16.msra.mxu0 %v6668_v25  ;;  %v9138_v25 = vld [vmem:[#allocation27_spill] sm:$0xff] }
 0x73c   : > { %2478 = vmatprep.subr.bf16.mxu0 %v6674_v26  ;;  %v9139_v26 = vld [vmem:[#allocation28_spill] sm:$0xff] }
 0x73f   : > { %2479 = vmatpush1.bf16.msra.mxu0 %v6680_v2  ;;  %v9140_v2 = vld [vmem:[#allocation29_spill] sm:$0xff] }
 0x740   : > { %2480 = vmatprep.subr.bf16.mxu0 %v6686_v7  ;;  %v9141_v7 = vld [vmem:[#allocation30_spill] sm:$0xff] }
 0x743   : > { %2481 = vmatpush1.bf16.msra.mxu0 %v6692_v27  ;;  %v9142_v27 = vld [vmem:[#allocation31_spill] sm:$0xff] }
 0x744   : > { %2482 = vmatprep.subr.bf16.mxu0 %v6698_v36  ;;  %v9143_v36 = vld [vmem:[#allocation32_spill] sm:$0xff] }
 0x747   : > { %2483 = vmatpush1.bf16.msra.mxu0 %v6704_v37  ;;  %v9144_v37 = vld [vmem:[#allocation33_spill] sm:$0xff] }
 0x748   : > { %2484 = vmatprep.subr.bf16.mxu0 %v6710_v38  ;;  %v9145_v38 = vld [vmem:[#allocation34_spill] sm:$0xff] }
 0x74b   : > { %2485 = vmatpush1.bf16.msra.mxu0 %v6716_v39  ;;  %v9146_v39 = vld [vmem:[#allocation35_spill] sm:$0xff] }
 0x74c   : > { %2486 = vmatprep.subr.bf16.mxu0 %v9134_v21 }
 0x74f   : > { %2487 = vmatpush1.bf16.msra.mxu0 %v9135_v22 }
 0x750   : > { %2488 = vmatprep.subr.bf16.mxu0 %v9136_v23 }
 0x753   : > { %2489 = vmatpush1.bf16.msra.mxu0 %v9137_v24 }
 0x754   : > { %2490 = vmatprep.subr.bf16.mxu0 %v9138_v25 }
 0x757   : > { %2491 = vmatpush1.bf16.msra.mxu0 %v9139_v26 }
 0x758   : > { %2492 = vmatprep.subr.bf16.mxu0 %v9140_v2 }
 0x75b   : > { %2493 = vmatpush1.bf16.msra.mxu0 %v9141_v7 }
 0x75c   : > { %2494 = vmatprep.subr.bf16.mxu0 %v9142_v27 }
 0x75f   : > { %2495 = vmatpush1.bf16.msra.mxu0 %v9143_v36 }
 0x760   : > { %2496 = vmatprep.subr.bf16.mxu0 %v9144_v37 }
 0x763   : > { %2497 = vmatpush1.bf16.msra.mxu0 %v9145_v38 }
 0x764   : > { %2498 = vmatprep.subr.bf16.mxu0 %v9146_v39 }
 0x767   : > { %2499 = vmatpush1.bf16.msra.mxu0 %v9147_v35 }
 0x768   : > { %2500 = vmatprep.subr.bf16.mxu0 %v9148_v13  ;;  %v7472_v13 = vld [vmem:[%s6332_s16 + $0x40] sm:$0xff] }
 0x76b   : > { %2501 = vmatpush1.bf16.msra.mxu0 %v9149_v15  ;;  %v7475_v15 = vld [vmem:[%s6332_s16 + $0x48] sm:$0xff] }
 0x76c   : > { %2502 = vmatprep.subr.bf16.mxu0 %v9150_v50  ;;  %v7478_v50 = vld [vmem:[%s6332_s16 + $0x50] sm:$0xff] }
 0x76f   : > { %2503 = vmatpush1.bf16.msra.mxu0 %v9151_v51  ;;  %v2768_v51 = vrot.slane %v7472_v13, 1 }
 0x770   : > { %2515 = vmatprep.subr.bf16.mxu0 %v9152_v52  ;;  %v2769_v52 = vrot.slane %v7475_v15, 1 }
 0x805   : > { %v2365_v55 = vpop.f32.mrb[36].mxu0  ;;  %v2406_v56 = vpop.f32.mrb[24].mxu1 }
 0x806   : > { %v2413_v57 = vmax.f32 %v2365_v55, %v2406_v56  ;;  %v2367_v58 = vpop.f32.mrb[37].mxu0  ;;  %v2408_v60 = vpop.f32.mrb[25].mxu1  ;;  %v2771_v55 = vrot.slane %v7478_v50, 1  ;;  %v2787_v56 = vrot.slane %v7472_v13, 2 }
 0x807   : > { %v2368_v62 = vpop.f32.mrb[38].mxu0  ;;  %v2409_v48 = vpop.f32.mrb[26].mxu1  ;;  %v2788_v58 = vrot.slane %v7475_v15, 2  ;;  %v2790_v60 = vrot.slane %v7478_v50, 2 }
 0x808   : > { %v2415_v12 = vadd.f32 %v9153_v3, %v2413_v57  ;;  %v2414_v0 = vmax.f32 %v2368_v62, %v2409_v48  ;;  %v2370_v41 = vpop.f32.mrb[39].mxu0  ;;  %v2411_v29 = vpop.f32.mrb[27].mxu1  ;;  %v7485_v57 = vld [vmem:[%s6332_s16 + $0x58] sm:$0xff]  ;;  %v2806_v62 = vrot.slane %v7472_v13, 3  ;;  %v2807_v48 = vrot.slane %v7475_v15, 3 }
 0x809   : > { %v2773_v41 = vrot.slane %v7485_v57, 1 }
 0x80a   : > { %v7450_v30 = vmax.f32 %v2415_v12, 0.0  ;;  %v2416_v31 = vadd.f32 %v9153_v3, %v2414_v0  ;;  %v2770_v3 = vsel %vm558_vm0, %v2768_v51, %v2769_v52  ;;  %v2772_v12 = vsel %vm558_vm0, %v2769_v52, %v2771_v55 }
 0x80b   : > { %v2809_v0 = vrot.slane %v7478_v50, 3  ;;  %v5401_v29 = vpack.i.bf16 %v2772_v12, %v2770_v3 }
 0x80c   : > { %v7453_v32 = vmax.f32 %v2416_v31, 0.0  ;;  %v2430_v33 = vrot.slane %v7450_v30, 2  ;;  %v2421_v34 = vrot.slane %v7450_v30, 1  ;;  %v2448_v2 = vrot.slane %v7450_v30, 4 }
 0x80d   : > { %v2439_v7 = vrot.slane %v7450_v30, 3  ;;  %v2789_v31 = vsel %vm578_vm2, %v2787_v56, %v2788_v58 }
 0x80e   : > { %v2431_v21 = vrot.slane %v7453_v32, 2  ;;  %v2422_v22 = vrot.slane %v7453_v32, 1  ;;  %v2449_v23 = vrot.slane %v7453_v32, 4  ;;  %v2440_v24 = vrot.slane %v7453_v32, 3 }
 0x810   : > { %v2432_v25 = vsel %vm578_vm2, %v2430_v33, %v2431_v21  ;;  %v2423_v26 = vsel %vm558_vm0, %v2421_v34, %v2422_v22  ;;  %v2450_v37 = vsel %vm618_vm3, %v2448_v2, %v2449_v23  ;;  %v2441_v38 = vsel %vm598_vm1, %v2439_v7, %v2440_v24 }
 0x811   : > { %v5386_v27 = vpack.i.bf16 %v2431_v21, %v2432_v25  ;;  %v5381_v36 = vpack.i.bf16 %v2422_v22, %v2423_v26  ;;  %v5396_v39 = vpack.i.bf16 %v2449_v23, %v2450_v37  ;;  %v5391_v35 = vpack.i.bf16 %v2440_v24, %v2441_v38 }
 0x812   : > { %v2791_v33 = vsel %vm578_vm2, %v2788_v58, %v2790_v60  ;;  %v2808_v34 = vsel %vm598_vm1, %v2806_v62, %v2807_v48  ;;  %v2810_v22 = vsel %vm598_vm1, %v2807_v48, %v2809_v0  ;;  %v2774_v23 = vsel %vm558_vm0, %v2771_v55, %v2773_v41 }
 0x813   : > { %5387 = vrot.lane.b32.xlu1 %v5386_v27, %s6071_s27  ;;  %5382 = vrot.lane.b32.xlu0 %v5381_v36, %s6072_s24  ;;  %v5406_v21 = vpack.i.bf16 %v2791_v33, %v2789_v31  ;;  %v2792_v24 = vrot.slane %v7485_v57, 2  ;;  %v5411_v25 = vpack.i.bf16 %v2810_v22, %v2808_v34  ;;  %v2811_v26 = vrot.slane %v7485_v57, 3 }
 0x814   : > { %v5416_v2 = vpack.i.bf16 %v2773_v41, %v2774_v23  ;;  %v9155_v23 = vld [vmem:[#allocation43_spill] sm:$0xff] }
 0x815   : > { %v2793_v7 = vsel %vm578_vm2, %v2790_v60, %v2792_v24  ;;  %v2812_v27 = vsel %vm598_vm1, %v2809_v0, %v2811_v26 }
 0x816   : > { %v5421_v36 = vpack.i.bf16 %v2792_v24, %v2793_v7  ;;  %v5426_v37 = vpack.i.bf16 %v2811_v26, %v2812_v27  ;;  %v9157_v24 = vld [vmem:[#allocation45_spill] sm:$0xff]  ;;  %v9160_v26 = vld [vmem:[#allocation48_spill] sm:$0xff]  ;;  %v9162_v7 = vld [vmem:[#allocation50_spill] sm:$0xff] }
 0x817   : > { %5397 = vrot.lane.b32.xlu1 %v5396_v39, %s6073_s18  ;;  %5392 = vrot.lane.b32.xlu0 %v5391_v35, %s6074_s17  ;;  %v9163_v27 = vld [vmem:[#allocation51_spill] sm:$0xff]  ;;  %9218 = vst [vmem:[#allocation45_spill] sm:$0xff] %v7999_v54 }
 0x81b   : > { %5402 = vrot.lane.b32.xlu0 %v5401_v29, %s6067_s20  ;;  %5407 = vrot.lane.b32.xlu1 %v5406_v21, %s9033_s23 }
 0x81f   : > { %5412 = vrot.lane.b32.xlu0 %v5411_v25, %s9154_s25  ;;  %5417 = vrot.lane.b32.xlu1 %v5416_v2, %s6067_s20  ;;  %v9159_v25 = vld [vmem:[#allocation47_spill] sm:$0xff]  ;;  %v9161_v2 = vld [vmem:[#allocation49_spill] sm:$0xff] }
 0x823   : > { %5422 = vrot.lane.b32.xlu0 %v5421_v36, %s9033_s23  ;;  %5427 = vrot.lane.b32.xlu1 %v5426_v37, %s9154_s25  ;;  %v9164_v36 = vld [vmem:[#allocation52_spill] sm:$0xff]  ;;  %v9165_v37 = vld [vmem:[#allocation53_spill] sm:$0xff] }
 0x885   : > { %v5388_v38 = vpop.permute.xlu1 %5387  ;;  %v5383_v39 = vpop.permute.xlu0 %5382 }
 0x886   : > { %v5390_v35 = vunpack.i.h.bf16 %v5388_v38  ;;  %v5389_v51 = vunpack.i.l.bf16 %v5388_v38  ;;  %v5385_v52 = vunpack.i.h.bf16 %v5383_v39  ;;  %v5384_v55 = vunpack.i.l.bf16 %v5383_v39  ;;  %v9166_v38 = vld [vmem:[#allocation54_spill] sm:$0xff]  ;;  %v9167_v39 = vld [vmem:[#allocation55_spill] sm:$0xff] }
 0x888   : > { %v2458_v48 = vsel %vm1264_vm9, %v7453_v32, %v5385_v52  ;;  %v2460_v3 = vsel %vm1036_vm8, %v5385_v52, %v5390_v35  ;;  %v2459_v12 = vsel %vm1036_vm8, %v5384_v55, %v5389_v51  ;;  %v2457_v0 = vsel %vm1264_vm9, %v7450_v30, %v5384_v55  ;;  %v9156_v32 = vld [vmem:[#allocation44_spill] sm:$0xff]  ;;  %v9158_v30 = vld [vmem:[#allocation46_spill] sm:$0xff]  ;;  %v9169_v51 = vld [vmem:[#allocation57_spill] sm:$0xff] }
 0x889   : > { %v5398_v56 = vpop.permute.xlu1 %5397  ;;  %v5393_v58 = vpop.permute.xlu0 %5392  ;;  %v2465_v21 = vpack.c.bf16 %v2458_v48, %v2457_v0  ;;  %v9168_v35 = vld [vmem:[#allocation56_spill] sm:$0xff]  ;;  %v9170_v52 = vld [vmem:[#allocation58_spill] sm:$0xff]  ;;  %v9171_v55 = vld [vmem:[#allocation59_spill] sm:$0xff] }
 0x88a   : > { %v5395_v60 = vunpack.i.h.bf16 %v5393_v58  ;;  %v5394_v62 = vunpack.i.l.bf16 %v5393_v58  ;;  %v5400_v41 = vunpack.i.h.bf16 %v5398_v56  ;;  %v5399_v29 = vunpack.i.l.bf16 %v5398_v56  ;;  %v9172_v56 = vld [vmem:[#allocation60_spill] sm:$0xff]  ;;  %v9173_v58 = vld [vmem:[#allocation61_spill] sm:$0xff]  ;;  %v9174_v48 = vld [vmem:[#allocation62_spill] sm:$0xff] }
 0x88b   : > { %v9175_v0 = vld [vmem:[#allocation63_spill] sm:$0xff] }
 0x88c   : > { %v2461_v31 = vsel %vm1269_vm10, %v2459_v12, %v5394_v62  ;;  %v2462_v33 = vsel %vm1269_vm10, %v2460_v3, %v5395_v60  ;;  %v2468_v22 = vpack.c.bf16 %v5400_v41, %v5399_v29  ;;  %v2464_v3 = vsel %vm1272_vm13, %v5395_v60, %v5400_v41  ;;  %v9183_v60 = vld [vmem:[#allocation71_spill] sm:$0xff]  ;;  %v9185_v41 = vld [vmem:[#allocation73_spill] sm:$0xff] }
 0x88d   : > { %v2466_v34 = vpack.c.bf16 %v2462_v33, %v2461_v31  ;;  %v2463_v12 = vsel %vm1272_vm13, %v5394_v62, %v5399_v29  ;;  %v9176_v33 = vld [vmem:[#allocation64_spill] sm:$0xff]  ;;  %v9186_v29 = vld [vmem:[#allocation74_spill] sm:$0xff] }
 0x88e   : > { %v2467_v31 = vpack.c.bf16 %v2464_v3, %v2463_v12  ;;  %v9184_v62 = vld [vmem:[#allocation72_spill] sm:$0xff] }
 0x88f   : > { %2504 = vmatprep.mubr.bf16.mxu0 %v2466_v34  ;;  %v9177_v34 = vld [vmem:[#allocation65_spill] sm:$0xff] }
 0x890   : > { %2505 = vmatmul.mubr.bf16.vlgmr.msra.gmra.mrb[40].mxu0 %v2465_v21  ;;  %v9178_v21 = vld [vmem:[#allocation66_spill] sm:$0xff] }
 0x891   : > { %2516 = vmatpush1.bf16.msra.mxu0 %v9155_v23  ;;  %5023 = vmatprep.mubr.msk.bf16.mxu0 %vm1597_vm11, %v2468_v22  ;;  %v9179_v22 = vld [vmem:[#allocation67_spill] sm:$0xff]  ;;  %v9180_v23 = vld [vmem:[#allocation68_spill] sm:$0xff] }
 0x892   : > { %2517 = vmatprep.subr.bf16.mxu0 %v9156_v32  ;;  %v9181_v32 = vld [vmem:[#allocation69_spill] sm:$0xff] }
 0x895   : > { %2518 = vmatpush1.bf16.msra.mxu0 %v9157_v24  ;;  %v9182_v24 = vld [vmem:[#allocation70_spill] sm:$0xff] }
 0x896   : > { %2519 = vmatprep.subr.bf16.mxu0 %v9158_v30  ;;  %v9187_v30 = vld [vmem:[#allocation75_spill] sm:$0xff] }
 0x899   : > { %2520 = vmatpush1.bf16.msra.mxu0 %v9159_v25  ;;  %v9188_v25 = vld [vmem:[#allocation76_spill] sm:$0xff] }
 0x89a   : > { %2521 = vmatprep.subr.bf16.mxu0 %v9160_v26  ;;  %v9189_v26 = vld [vmem:[#allocation77_spill] sm:$0xff] }
 0x89d   : > { %2522 = vmatpush1.bf16.msra.mxu0 %v9161_v2  ;;  %v9190_v2 = vld [vmem:[#allocation78_spill] sm:$0xff] }
 0x89e   : > { %2523 = vmatprep.subr.bf16.mxu0 %v9162_v7  ;;  %v9191_v7 = vld [vmem:[#allocation79_spill] sm:$0xff] }
 0x8a1   : > { %2524 = vmatpush1.bf16.msra.mxu0 %v9163_v27  ;;  %v9192_v27 = vld [vmem:[#allocation80_spill] sm:$0xff] }
 0x8a2   : > { %2525 = vmatprep.subr.bf16.mxu0 %v9164_v36  ;;  %v9193_v36 = vld [vmem:[#allocation81_spill] sm:$0xff] }
 0x8a5   : > { %2526 = vmatpush1.bf16.msra.mxu0 %v9165_v37  ;;  %v9194_v37 = vld [vmem:[#allocation82_spill] sm:$0xff] }
 0x8a6   : > { %2527 = vmatprep.subr.bf16.mxu0 %v9166_v38  ;;  %v9195_v38 = vld [vmem:[#allocation83_spill] sm:$0xff] }
 0x8a9   : > { %2528 = vmatpush1.bf16.msra.mxu0 %v9167_v39  ;;  %v5403_v39 = vpop.permute.xlu0 %5402 }
 0x8aa   : > { %2529 = vmatprep.subr.bf16.mxu0 %v9168_v35  ;;  %v5408_v35 = vpop.permute.xlu1 %5407  ;;  %v5404_v3 = vunpack.i.l.bf16 %v5403_v39 }
 0x8ab   : > { %v5410_v12 = vunpack.i.h.bf16 %v5408_v35 }
 0x8ad   : > { %2530 = vmatpush1.bf16.msra.mxu0 %v9169_v51  ;;  %v2825_v51 = vrot.slane %v7472_v13, 4 }
 0x8ae   : > { %2531 = vmatprep.subr.bf16.mxu0 %v9170_v52  ;;  %v2826_v52 = vrot.slane %v7475_v15, 4 }
 0x8b1   : > { %2532 = vmatpush1.bf16.msra.mxu0 %v9171_v55  ;;  %v2828_v55 = vrot.slane %v7478_v50, 4 }
 0x8b2   : > { %2533 = vmatprep.subr.bf16.mxu0 %v9172_v56  ;;  %v2830_v56 = vrot.slane %v7485_v57, 4 }
 0x8b5   : > { %2534 = vmatpush1.bf16.msra.mxu0 %v9173_v58  ;;  %v5405_v58 = vunpack.i.h.bf16 %v5403_v39 }
 0x8b6   : > { %5022 = vmatprep.subr.msk.bf16.mxu0 %vm1601_vm12, %v9174_v48 }
 0x8b9   : > { %2536 = vmatpush1.bf16.msra.mxu0 %v9175_v0 }
 0x8ba   : > { %2858 = vmatprep.subr.bf16.mxu0 %v9176_v33  ;;  %v2827_v33 = vsel %vm618_vm3, %v2825_v51, %v2826_v52 }
 0x8bc   : > { %2548 = vmatmul.mubr.bf16.vlgmr.msra.gmra.mrb[40].mxu0 %v2467_v31  ;;  %v5409_v31 = vunpack.i.l.bf16 %v5408_v35 }
 0x8bd   : > { %2859 = vmatpush1.bf16.msra.mxu0 %v9177_v34  ;;  %v2829_v34 = vsel %vm618_vm3, %v2826_v52, %v2828_v55 }
 0x8be   : > { %2860 = vmatprep.subr.bf16.mxu0 %v9178_v21  ;;  %v2837_v21 = vsel %vm630_vm4, %v7475_v15, %v5405_v58 }
 0x8c1   : > { %2861 = vmatpush1.bf16.msra.mxu0 %v9179_v22  ;;  %v2836_v22 = vsel %vm630_vm4, %v7472_v13, %v5404_v3 }
 0x8c2   : > { %2862 = vmatprep.subr.bf16.mxu0 %v9180_v23  ;;  %v2849_v23 = vpack.c.bf16 %v2829_v34, %v2827_v33  ;;  %v7613_v33 = vld [vmem:[%s8903_s3 + $0x6c] sm:$0xff]   ;;  %v7620_v34 = vld [vmem:[%s8903_s3 + $0x74] sm:$0xff]  }
 0x8c4   : > { %5034 = vmatprep.mubr.msk.bf16.mxu0 %vm630_vm4, %v2849_v23  ;;  %v7641_v23 = vld [vmem:[%s8903_s3 + $0x8c] sm:$0xff]  }
 0x8c5   : > { %2863 = vmatpush1.bf16.msra.mxu0 %v9181_v32  ;;  %v2840_v32 = vsel %vm635_vm5, %v2836_v22, %v5409_v31  ;;  %v7606_v31 = vld [vmem:[%s8903_s3 + $0x64] sm:$0xff]  }
 0x8c6   : > { %2864 = vmatprep.subr.bf16.mxu0 %v9182_v24  ;;  %v2841_v24 = vsel %vm635_vm5, %v2837_v21, %v5410_v12  ;;  %v7599_v12 = vld [vmem:[%s8903_s3 + $0x5c] sm:$0xff]   ;;  %v7634_v22 = vld [vmem:[%s8903_s3 + $0x84] sm:$0xff]  }
 0x8c7   : > { %v7627_v21 = vld [vmem:[%s8903_s3 + $0x7c] sm:$0xff]  }
 0x8c9   : > { %2865 = vmatpush1.bf16.msra.mxu0 %v9183_v60  ;;  %v5413_v60 = vpop.permute.xlu0 %5412 }
 0x8ca   : > { %2866 = vmatprep.subr.bf16.mxu0 %v9184_v62  ;;  %v5418_v62 = vpop.permute.xlu1 %5417 }
 0x8cd   : > { %2867 = vmatpush1.bf16.msra.mxu0 %v9185_v41  ;;  %v2831_v41 = vsel %vm618_vm3, %v2828_v55, %v2830_v56 }
 0x8ce   : > { %2868 = vmatprep.subr.bf16.mxu0 %v9186_v29  ;;  %v5415_v29 = vunpack.i.h.bf16 %v5413_v60  ;;  %v2851_v13 = vpack.c.bf16 %v2830_v56, %v2831_v41 }
 0x8d1   : > { %2869 = vmatpush1.bf16.msra.mxu0 %v9187_v30  ;;  %v5414_v30 = vunpack.i.l.bf16 %v5413_v60 }
 0x8d2   : > { %2870 = vmatprep.subr.bf16.mxu0 %v9188_v25  ;;  %v5420_v25 = vunpack.i.h.bf16 %v5418_v62 }
 0x8d3   : > { %v2844_v15 = vsel %vm640_vm6, %v2840_v32, %v5414_v30  ;;  %v7648_v32 = vld [vmem:[%s8903_s3 + $0x94] sm:$0xff]  }
 0x8d5   : > { %2871 = vmatpush1.bf16.msra.mxu0 %v9189_v26  ;;  %v5419_v26 = vunpack.i.l.bf16 %v5418_v62 }
 0x8d6   : > { %2872 = vmatprep.subr.bf16.mxu0 %v9190_v2  ;;  %v2845_v2 = vsel %vm640_vm6, %v2841_v24, %v5415_v29  ;;  %v7655_v24 = vld [vmem:[%s8903_s3 + $0x9c] sm:$0xff]  }
 0x8d9   : > { %2873 = vmatpush1.bf16.msra.mxu0 %v9191_v7  ;;  %v2848_v7 = vpack.c.bf16 %v2845_v2, %v2844_v15 }
 0x8da   : > { %2874 = vmatprep.subr.bf16.mxu0 %v9192_v27  ;;  %v2839_v27 = vsel %vm630_vm4, %v7485_v57, %v5420_v25  ;;  %v7590_v57 = vld [vmem:[%s8903_s3 + $0x54] sm:$0xff]  }
 0x8dd   : > { %2875 = vmatpush1.bf16.msra.mxu0 %v9193_v36  ;;  %v2838_v36 = vsel %vm630_vm4, %v7478_v50, %v5419_v26 }
 0x8de   : > { %2876 = vmatprep.subr.bf16.mxu0 %v9194_v37  ;;  %v5423_v37 = vpop.permute.xlu0 %5422 }
 0x8df   : > { %v5425_v39 = vunpack.i.h.bf16 %v5423_v37  ;;  %v5424_v35 = vunpack.i.l.bf16 %v5423_v37 }
 0x8e1   : > { %2877 = vmatpush1.bf16.msra.mxu0 %v9195_v38  ;;  %v5428_v38 = vpop.permute.xlu1 %5427  ;;  %v2843_v55 = vsel %vm635_vm5, %v2839_v27, %v5425_v39  ;;  %v2842_v58 = vsel %vm635_vm5, %v2838_v36, %v5424_v35 }
 0x8e2   : > { %3057 = vmatprep.subr.bf16.mxu0 %v9131_v42  ;;  %v5430_v51 = vunpack.i.h.bf16 %v5428_v38  ;;  %v5429_v52 = vunpack.i.l.bf16 %v5428_v38 }
 0x8e4   : > { %2891 = vmatmul.mubr.bf16.vlgmr.msra.gmra.mrb[44].mxu0 %v2848_v7  ;;  %v2846_v50 = vsel %vm640_vm6, %v2842_v58, %v5429_v52  ;;  %v2847_v56 = vsel %vm640_vm6, %v2843_v55, %v5430_v51  ;;  %v7782_v55 = vld [vmem:[%s8903_s3 + $0x38] sm:$0xff]   ;;  %v7789_v58 = vld [vmem:[%s8903_s3 + $0x40] sm:$0xff]  }
 0x8e5   : > { %5035 = vmatprep.mubr.msk.bf16.mxu0 %vm630_vm4, %v2851_v13  ;;  %3058 = vmatpush1.bf16.msra.mxu0 %v7590_v57  ;;  %v2850_v3 = vpack.c.bf16 %v2847_v56, %v2846_v50  ;;  %v7796_v50 = vld [vmem:[%s8903_s3 + $0x48] sm:$0xff]  }
 0x8e6   : > { %3059 = vmatprep.subr.bf16.mxu0 %v9131_v42  ;;  %v7804_v56 = vld [vmem:[%s8905_s5 + $0x4] ss:$8 sps:$4 sm:$0xff]  }
 0x8e9   : > { %3060 = vmatpush1.bf16.msra.mxu0 %v7599_v12 }
 0x8ea   : > { %3061 = vmatprep.subr.bf16.mxu0 %v9131_v42 }
 0x8ec   : > { %2901 = vmatmul.mubr.bf16.gmra.mrb[48].mxu0 %v2850_v3 }
 0x8ed   : > { %3062 = vmatpush1.bf16.msra.mxu0 %v7606_v31 }
 0x8ee   : > { %3063 = vmatprep.subr.bf16.mxu0 %v9131_v42 }
 0x8f1   : > { %3064 = vmatpush1.bf16.msra.mxu0 %v7613_v33 }
 0x8f2   : > { %3065 = vmatprep.subr.bf16.mxu0 %v9131_v42 }
 0x8f5   : > { %3066 = vmatpush1.bf16.msra.mxu0 %v7620_v34 }
 0x8f6   : > { %3067 = vmatprep.subr.bf16.mxu0 %v9131_v42 }
 0x8f9   : > { %3068 = vmatpush1.bf16.msra.mxu0 %v7627_v21 }
 0x8fa   : > { %3069 = vmatprep.subr.bf16.mxu0 %v9131_v42 }
 0x8fd   : > { %3070 = vmatpush1.bf16.msra.mxu0 %v7634_v22 }
 0x8fe   : > { %3071 = vmatprep.subr.bf16.mxu0 %v9131_v42 }
 0x901   : > { %3072 = vmatpush1.bf16.msra.mxu0 %v7641_v23 }
 0x902   : > { %3073 = vmatprep.subr.bf16.mxu0 %v9131_v42 }
 0x905   : > { %3074 = vmatpush1.bf16.msra.mxu0 %v7648_v32 }
 0x906   : > { %3075 = vmatprep.subr.bf16.mxu0 %v9131_v42 }
 0x909   : > { %3076 = vmatpush1.bf16.msra.mxu0 %v7655_v24 }
 0x90a   : > { %3077 = vmatprep.subr.bf16.mxu0 %v9131_v42 }
 0x90d   : > { %3078 = vmatpush1.bf16.msra.mxu0 %v6629_v6 }
 0x98f   : > { %v2549_v60 = vpop.f32.mrb[40].mxu0 }
 0x990   : > { %v2551_v62 = vpop.f32.mrb[41].mxu0 }
 0x991   : > { %v2553_v41 = vpop.f32.mrb[42].mxu0 }
 0x992   : > { %v2558_v29 = vpack.c.bf16 %v2553_v41, %v2549_v60  ;;  %v2555_v30 = vpop.f32.mrb[43].mxu0 }
 0x993   : > { %v2559_v25 = vpack.c.bf16 %v2555_v30, %v2551_v62  ;;  %v8005_v30 = vld [vmem:[%s8905_s5 + $0x104] ss:$8 sps:$4 sm:$0xff]  }
 0x994   : > { %v2561_v26 = vsel %vm598_vm1, %v2558_v29, 0  ;;  %9219 = vst [vmem:[#allocation46_spill] sm:$0xff] %v8005_v30 }
 0x995   : > { %5024 = vmatprep.subr.msk.bf16.mxu1 %vm598_vm1, %v2559_v25 }
 0x996   : > { %2567 = vmatpush1.bf16.msra.mxu1 %v2561_v26 }
 0x997   : > { %5026 = vmatprep.subr.msk.bf16.mxu1 %vm598_vm1, %v2559_v25 }
 0x999   : > { %5025 = vmatmul.mubr.msk.bf16.vlgmr.msra.gmra.mrb[28].mxu1 %vm1697_vm14, %v7221_v59 }
 0x99a   : > { %2608 = vmatpush1.bf16.msra.mxu1 %v2561_v26  ;;  %2639 = vmatprep.mubr.bf16.mxu1 %v9131_v42 }
 0x99b   : > { %2655 = vmatprep.subr.bf16.mxu1 %v9131_v42 }
 0x9a1   : > { %5027 = vmatmul.mubr.msk.bf16.vlgmr.msra.gmra.mrb[32].mxu1 %vm1697_vm14, %v7231_v61 }
 0x9a2   : > { %2656 = vmatpush1.bf16.msra.mxu1 %v7236_v63 }
 0x9a3   : > { %2657 = vmatprep.subr.bf16.mxu1 %v9131_v42 }
 0x9a6   : > { %2658 = vmatpush1.bf16.msra.mxu1 %v7244_v45 }
 0x9a7   : > { %2659 = vmatprep.subr.bf16.mxu1 %v9131_v42 }
 0x9aa   : > { %2660 = vmatpush1.bf16.msra.mxu1 %v7251_v43 }
 0x9ab   : > { %2661 = vmatprep.subr.bf16.mxu1 %v9131_v42 }
 0x9ae   : > { %2662 = vmatpush1.bf16.msra.mxu1 %v7258_v46 }
 0x9af   : > { %2663 = vmatprep.subr.bf16.mxu1 %v9131_v42 }
 0x9b2   : > { %2664 = vmatpush1.bf16.msra.mxu1 %v7265_v16 }
 0x9b3   : > { %2665 = vmatprep.subr.bf16.mxu1 %v9131_v42 }
 0x9b6   : > { %2666 = vmatpush1.bf16.msra.mxu1 %v7272_v17 }
 0x9b7   : > { %2667 = vmatprep.subr.bf16.mxu1 %v9131_v42  ;;  %v2892_v59 = vpop.f32.mrb[44].mxu0 }
 0x9b8   : > { %v2894_v61 = vpop.f32.mrb[45].mxu0 }
 0x9b9   : > { %v2896_v63 = vpop.f32.mrb[46].mxu0 }
 0x9ba   : > { %2668 = vmatpush1.bf16.msra.mxu1 %v7279_v9  ;;  %v2911_v45 = vpack.c.bf16 %v2896_v63, %v2892_v59  ;;  %v2898_v43 = vpop.f32.mrb[47].mxu0 }
 0x9bb   : > { %2669 = vmatprep.subr.bf16.mxu1 %v9131_v42  ;;  %v2912_v46 = vpack.c.bf16 %v2898_v43, %v2894_v61 }
 0x9be   : > { %2670 = vmatpush1.bf16.msra.mxu1 %v7287_v14 }
 0x9bf   : > { %2671 = vmatprep.subr.bf16.mxu1 %v9131_v42  ;;  %v2902_v16 = vpop.f32.mrb[48].mxu0 }
 0x9c0   : > { %v2904_v17 = vpop.f32.mrb[49].mxu0 }
 0x9c1   : > { %v2906_v9 = vpop.f32.mrb[50].mxu0 }
 0x9c2   : > { %2672 = vmatpush1.bf16.msra.mxu1 %v7293_v18  ;;  %v2913_v14 = vpack.c.bf16 %v2906_v9, %v2902_v16  ;;  %v2908_v15 = vpop.f32.mrb[51].mxu0 }
 0x9c3   : > { %2673 = vmatprep.subr.bf16.mxu1 %v9131_v42  ;;  %v2914_v2 = vpack.c.bf16 %v2908_v15, %v2904_v17 }
 0x9c6   : > { %2674 = vmatpush1.bf16.msra.mxu1 %v7301_v1 }
 0x9c7   : > { %2695 = vmatprep.subr.bf16.mxu1 %v9131_v42 }
 0xa6c   : > { %v2600_v13 = vpop.f32.mrb[28].mxu1 }
 0xa6d   : > { %v2602_v18 = vpop.f32.mrb[29].mxu1 }
 0xa6e   : > { %v2604_v7 = vpop.f32.mrb[30].mxu1 }
 0xa6f   : > { %v2605_v27 = vpop.f32.mrb[31].mxu1 }
 0xa70   : > { %v7818_v27 = vld [vmem:[%s8905_s5] ss:$8 sps:$4 sm:$0xff]  }
 0xa74   : > { %v2641_v36 = vpop.f32.mrb[32].mxu1 }
 0xa75   : > { %v2648_v1 = vmax.f32 %v2600_v13, %v2641_v36  ;;  %v2643_v37 = vpop.f32.mrb[33].mxu1  ;;  %v7825_v36 = vld [vmem:[%s8905_s5 + $0x14] ss:$8 sps:$4 sm:$0xff]  }
 0xa76   : > { %v2649_v38 = vmax.f32 %v2602_v18, %v2643_v37  ;;  %v2645_v39 = vpop.f32.mrb[34].mxu1  ;;  %v7837_v37 = vld [vmem:[%s8905_s5 + $0x24] ss:$8 sps:$4 sm:$0xff]  }
 0xa77   : > { %v2646_v35 = vpop.f32.mrb[35].mxu1  ;;  %v2650_v52 = vpack.c.bf16 %v2648_v1, %v2648_v1  ;;  %v7831_v1 = vld [vmem:[%s8905_s5 + $0x10] ss:$8 sps:$4 sm:$0xff]   ;;  %v7849_v39 = vld [vmem:[%s8905_s5 + $0x34] ss:$8 sps:$4 sm:$0xff]  }
 0xa78   : > { %v2651_v51 = vpack.c.bf16 %v2649_v38, %v2649_v38  ;;  %v7843_v38 = vld [vmem:[%s8905_s5 + $0x20] ss:$8 sps:$4 sm:$0xff]   ;;  %v7855_v35 = vld [vmem:[%s8905_s5 + $0x30] ss:$8 sps:$4 sm:$0xff]  }
 0xa7a   : > { %5028 = vmatprep.mubr.msk.bf16.mxu1 %vm630_vm4, %v2651_v51 }
 0xa7b   : > { %2688 = vmatmul.mubr.bf16.vlgmr.msra.gmra.mrb[36].mxu1 %v2650_v52 }
 0xa7c   : > { %2696 = vmatpush1.bf16.msra.mxu1 %v7308_v40  ;;  %5029 = vmatprep.mubr.msk.bf16.mxu1 %vm630_vm4, %v2651_v51  ;;  %v2916_v40 = vsel %vm578_vm2, %v2913_v14, 0  ;;  %v7861_v51 = vld [vmem:[%s8905_s5 + $0x44] ss:$8 sps:$4 sm:$0xff]  }
 0xa7d   : > { %2697 = vmatprep.subr.bf16.mxu1 %v9131_v42 }
 0xa80   : > { %2698 = vmatpush1.bf16.msra.mxu1 %v7316_v20  ;;  %v7716_v20 = vld [vmem:[%s8902_s2] sm:$0x7f]  }
 0xa81   : > { %2699 = vmatprep.subr.bf16.mxu1 %v9131_v42 }
 0xa84   : > { %2700 = vmatpush1.bf16.msra.mxu1 %v7323_v19  ;;  %v7726_v19 = vld [vmem:[%s8902_s2 + $0x8] sm:$0x7f]  }
 0xa85   : > { %2701 = vmatprep.subr.bf16.mxu1 %v9131_v42 }
 0xa88   : > { %2702 = vmatpush1.bf16.msra.mxu1 %v7330_v28  ;;  %v7733_v28 = vld [vmem:[%s8903_s3] sm:$0xff]  }
 0xa89   : > { %2703 = vmatprep.subr.bf16.mxu1 %v9131_v42 }
 0xa8c   : > { %2704 = vmatpush1.bf16.msra.mxu1 %v7337_v10  ;;  %v7740_v10 = vld [vmem:[%s8903_s3 + $0x8] sm:$0xff]  }
 0xa8d   : > { %2705 = vmatprep.subr.bf16.mxu1 %v9131_v42 }
 0xa90   : > { %2706 = vmatpush1.bf16.msra.mxu1 %v7344_v47  ;;  %v7747_v47 = vld [vmem:[%s8903_s3 + $0x10] sm:$0xff]  }
 0xa91   : > { %2707 = vmatprep.subr.bf16.mxu1 %v9131_v42 }
 0xa94   : > { %2708 = vmatpush1.bf16.msra.mxu1 %v7351_v44  ;;  %v7754_v44 = vld [vmem:[%s8903_s3 + $0x18] sm:$0xff]  }
 0xa95   : > { %2709 = vmatprep.subr.bf16.mxu1 %v9131_v42 }
 0xa98   : > { %2710 = vmatpush1.bf16.msra.mxu1 %v7358_v11  ;;  %v7761_v11 = vld [vmem:[%s8903_s3 + $0x20] sm:$0xff]  }
 0xa99   : > { %2711 = vmatprep.subr.bf16.mxu1 %v9131_v42 }
 0xa9c   : > { %2712 = vmatpush1.bf16.msra.mxu1 %v7365_v4  ;;  %v7768_v4 = vld [vmem:[%s8903_s3 + $0x28] sm:$0xff]  }
 0xa9d   : > { %2713 = vmatprep.subr.bf16.mxu1 %v9131_v42 }
 0xaa0   : > { %2714 = vmatpush1.bf16.msra.mxu1 %v7372_v8  ;;  %v7775_v8 = vld [vmem:[%s8903_s3 + $0x30] sm:$0xff]  }
 0xaa1   : > { %2921 = vmatprep.subr.bf16.mxu1 %v2912_v46 }
 0xaa3   : > { %2728 = vmatmul.mubr.bf16.vlgmr.msra.gmra.mrb[40].mxu1 %v2650_v52  ;;  %v7867_v52 = vld [vmem:[%s8905_s5 + $0x40] ss:$8 sps:$4 sm:$0xff]  }
 0xaa4   : > { %2922 = vmatpush1.bf16.msra.mxu1 %v2911_v45  ;;  %2953 = vmatprep.mubr.bf16.mxu1 %v9131_v42 }
 0xaa5   : > { %5036 = vmatprep.subr.msk.bf16.mxu1 %vm578_vm2, %v2914_v2 }
 0xaa8   : > { %2924 = vmatpush1.bf16.msra.mxu1 %v2916_v40 }
 0xaa9   : > { %2964 = vmatprep.subr.bf16.mxu1 %v2912_v46 }
 0xaab   : > { %5037 = vmatmul.mubr.msk.bf16.vlgmr.msra.gmra.mrb[44].mxu1 %vm839_vm7, %v7716_v20 }
 0xaac   : > { %2965 = vmatpush1.bf16.msra.mxu1 %v2911_v45  ;;  %2996 = vmatprep.mubr.bf16.mxu1 %v9131_v42 }
 0xaad   : > { %5038 = vmatprep.subr.msk.bf16.mxu1 %vm578_vm2, %v2914_v2 }
 0xab0   : > { %2967 = vmatpush1.bf16.msra.mxu1 %v2916_v40  ;;  %v7873_v40 = vld [vmem:[%s8905_s5 + $0x54] ss:$8 sps:$4 sm:$0xff]  }
 0xab1   : > { %3016 = vmatprep.subr.bf16.mxu1 %v9131_v42 }
 0xab3   : > { %5039 = vmatmul.mubr.msk.bf16.vlgmr.msra.gmra.mrb[48].mxu1 %vm839_vm7, %v7726_v19 }
 0xab4   : > { %3017 = vmatpush1.bf16.msra.mxu1 %v7733_v28 }
 0xab5   : > { %3018 = vmatprep.subr.bf16.mxu1 %v9131_v42 }
 0xab8   : > { %3019 = vmatpush1.bf16.msra.mxu1 %v7740_v10 }
 0xab9   : > { %3020 = vmatprep.subr.bf16.mxu1 %v9131_v42 }
 0xabc   : > { %3021 = vmatpush1.bf16.msra.mxu1 %v7747_v47 }
 0xabd   : > { %3022 = vmatprep.subr.bf16.mxu1 %v9131_v42 }
 0xac0   : > { %3023 = vmatpush1.bf16.msra.mxu1 %v7754_v44 }
 0xac1   : > { %3024 = vmatprep.subr.bf16.mxu1 %v9131_v42 }
 0xac4   : > { %3025 = vmatpush1.bf16.msra.mxu1 %v7761_v11 }
 0xac5   : > { %3026 = vmatprep.subr.bf16.mxu1 %v9131_v42 }
 0xac8   : > { %3027 = vmatpush1.bf16.msra.mxu1 %v7768_v4 }
 0xac9   : > { %3028 = vmatprep.subr.bf16.mxu1 %v9131_v42 }
 0xacc   : > { %3029 = vmatpush1.bf16.msra.mxu1 %v7775_v8 }
 0xacd   : > { %3030 = vmatprep.subr.bf16.mxu1 %v9131_v42 }
 0xad0   : > { %3031 = vmatpush1.bf16.msra.mxu1 %v7782_v55 }
 0xad1   : > { %3032 = vmatprep.subr.bf16.mxu1 %v9131_v42 }
 0xad4   : > { %3033 = vmatpush1.bf16.msra.mxu1 %v7789_v58 }
 0xad5   : > { %3034 = vmatprep.subr.bf16.mxu1 %v9131_v42 }
 0xad8   : > { %3035 = vmatpush1.bf16.msra.mxu1 %v7796_v50 }
 0xad9   : > { %3036 = vmatprep.subr.bf16.mxu1 %v9131_v42 }
 0xadc   : > { %3037 = vmatpush1.bf16.msra.mxu1 %v6626_v5 }
 0xadd   : > { %3157 = vmatprep.subr.bf16.mxu1 %v7804_v56 }
 0xb4e   : > { %v7807_v3 = vpop.f32.mrb[36].mxu1 }
 0xb4f   : > { %9196 = vst [vmem:[#allocation23_spill] sm:$0xff] %v7807_v3  ;;  %v2691_v60 = vpop.f32.mrb[37].mxu1 }
 0xb50   : > { %v2692_v62 = vpop.f32.mrb[38].mxu1  ;;  %v7879_v60 = vld [vmem:[%s8905_s5 + $0x50] ss:$8 sps:$4 sm:$0xff]  }
 0xb51   : > { %v2693_v41 = vpop.f32.mrb[39].mxu1  ;;  %9198 = vst [vmem:[#allocation25_spill] sm:$0xff] %v7879_v60  ;;  %v7885_v62 = vld [vmem:[%s8905_s5 + $0x64] ss:$8 sps:$4 sm:$0xff]  }
 0xb52   : > { %9199 = vst [vmem:[#allocation26_spill] sm:$0xff] %v7885_v62  ;;  %v7891_v41 = vld [vmem:[%s8905_s5 + $0x60] ss:$8 sps:$4 sm:$0xff]  }
 0xb53   : > { %9200 = vst [vmem:[#allocation27_spill] sm:$0xff] %v7891_v41 }
 0xb76   : > { %v7809_v29 = vpop.f32.mrb[40].mxu1 }
 0xb77   : > { %9197 = vst [vmem:[#allocation24_spill] sm:$0xff] %v7809_v29  ;;  %v2731_v25 = vpop.f32.mrb[41].mxu1 }
 0xb78   : > { %v2732_v26 = vpop.f32.mrb[42].mxu1  ;;  %v7897_v25 = vld [vmem:[%s8905_s5 + $0x74] ss:$8 sps:$4 sm:$0xff]  }
 0xb79   : > { %v2733_v59 = vpop.f32.mrb[43].mxu1  ;;  %9201 = vst [vmem:[#allocation28_spill] sm:$0xff] %v7897_v25  ;;  %v7903_v26 = vld [vmem:[%s8905_s5 + $0x70] ss:$8 sps:$4 sm:$0xff]  }
 0xb7a   : > { %9202 = vst [vmem:[#allocation29_spill] sm:$0xff] %v7903_v26  ;;  %v7909_v59 = vld [vmem:[%s8905_s5 + $0x84] ss:$8 sps:$4 sm:$0xff]  }
 0xb7b   : > { %9203 = vst [vmem:[#allocation30_spill] sm:$0xff] %v7909_v59 }
 0xb7e   : > { %v2955_v61 = vpop.f32.mrb[44].mxu1 }
 0xb7f   : > { %v2957_v63 = vpop.f32.mrb[45].mxu1 }
 0xb80   : > { %v2959_v45 = vpop.f32.mrb[46].mxu1 }
 0xb81   : > { %v2961_v43 = vpop.f32.mrb[47].mxu1 }
 0xb86   : > { %v2998_v46 = vpop.f32.mrb[48].mxu1 }
 0xb87   : > { %v3007_v16 = vmax.f32 %v2955_v61, %v2998_v46  ;;  %v3000_v17 = vpop.f32.mrb[49].mxu1  ;;  %v7915_v61 = vld [vmem:[%s8905_s5 + $0x80] ss:$8 sps:$4 sm:$0xff]  }
 0xb88   : > { %v3008_v9 = vmax.f32 %v2957_v63, %v3000_v17  ;;  %v3002_v14 = vpop.f32.mrb[50].mxu1  ;;  %9204 = vst [vmem:[#allocation31_spill] sm:$0xff] %v7915_v61  ;;  %v7921_v63 = vld [vmem:[%s8905_s5 + $0x94] ss:$8 sps:$4 sm:$0xff]   ;;  %v7939_v46 = vld [vmem:[%s8905_s5 + $0xa0] ss:$8 sps:$4 sm:$0xff]  }
 0xb89   : > { %v3009_v15 = vmax.f32 %v2959_v45, %v3002_v14  ;;  %v3004_v2 = vpop.f32.mrb[51].mxu1  ;;  %9205 = vst [vmem:[#allocation32_spill] sm:$0xff] %v7921_v63  ;;  %v7927_v45 = vld [vmem:[%s8905_s5 + $0x90] ss:$8 sps:$4 sm:$0xff]   ;;  %9208 = vst [vmem:[#allocation35_spill] sm:$0xff] %v7939_v46 }
 0xb8a   : > { %v3010_v13 = vmax.f32 %v2961_v43, %v3004_v2  ;;  %9206 = vst [vmem:[#allocation33_spill] sm:$0xff] %v7927_v45  ;;  %v7933_v43 = vld [vmem:[%s8905_s5 + $0xa4] ss:$8 sps:$4 sm:$0xff]   ;;  %v7951_v17 = vld [vmem:[%s8905_s5 + $0xb0] ss:$8 sps:$4 sm:$0xff]  }
 0xb8b   : > { %v3011_v18 = vpack.c.bf16 %v3009_v15, %v3007_v16  ;;  %9207 = vst [vmem:[#allocation34_spill] sm:$0xff] %v7933_v43  ;;  %v7945_v16 = vld [vmem:[%s8905_s5 + $0xb4] ss:$8 sps:$4 sm:$0xff]   ;;  %9210 = vst [vmem:[#allocation38_spill] sm:$0xff] %v7951_v17  ;;  %v7963_v14 = vld [vmem:[%s8905_s5 + $0xc0] ss:$8 sps:$4 sm:$0xff]  }
 0xb8c   : > { %v3012_v7 = vpack.c.bf16 %v3010_v13, %v3008_v9  ;;  %9209 = vst [vmem:[#allocation36_spill] sm:$0xff] %v7945_v16  ;;  %v7957_v9 = vld [vmem:[%s8905_s5 + $0xc4] ss:$8 sps:$4 sm:$0xff]   ;;  %9212 = vst [vmem:[#allocation40_spill] sm:$0xff] %v7963_v14  ;;  %v7969_v15 = vld [vmem:[%s8905_s5 + $0xd4] ss:$8 sps:$4 sm:$0xff]  }
 0xb8d   : > { %9211 = vst [vmem:[#allocation39_spill] sm:$0xff] %v7957_v9  ;;  %9213 = vst [vmem:[#allocation41_spill] sm:$0xff] %v7969_v15  ;;  %v7975_v2 = vld [vmem:[%s8905_s5 + $0xd0] ss:$8 sps:$4 sm:$0xff]   ;;  %v7981_v13 = vld [vmem:[%s8905_s5 + $0xe4] ss:$8 sps:$4 sm:$0xff]  }
 0xb8e   : > { %5040 = vmatprep.mubr.msk.bf16.mxu1 %vm1036_vm8, %v3012_v7  ;;  %5041 = vmatprep.mubr.msk.bf16.mxu0 %vm1036_vm8, %v3012_v7  ;;  %9214 = vst [vmem:[#allocation42_spill] sm:$0xff] %v7975_v2  ;;  %9215 = vst [vmem:[#allocation37_spill] sm:$0xff] %v7981_v13  ;;  %v7993_v7 = vld [vmem:[%s8905_s5 + $0xf4] ss:$8 sps:$4 sm:$0xff]  }
 0xb8f   : > { %3049 = vmatmul.mubr.bf16.vlgmr.msra.gmra.mrb[52].mxu1 %v3011_v18  ;;  %3090 = vmatmul.mubr.bf16.vlgmr.msra.gmra.mrb[52].mxu0 %v3011_v18  ;;  %v7987_v18 = vld [vmem:[%s8905_s5 + $0xe0] ss:$8 sps:$4 sm:$0xff]   ;;  %9217 = vst [vmem:[#allocation44_spill] sm:$0xff] %v7993_v7 }
 0xb90   : > { %3158 = vmatpush1.bf16.msra.mxu1 %v7818_v27  ;;  %3283 = vmatprep.mubr.bf16.mxu0 %v9131_v42  ;;  %9216 = vst [vmem:[#allocation43_spill] sm:$0xff] %v7987_v18 }
 0xb91   : > { %3159 = vmatprep.subr.bf16.mxu1 %v7825_v36 }
 0xb94   : > { %3160 = vmatpush1.bf16.msra.mxu1 %v7831_v1 }
 0xb95   : > { %3161 = vmatprep.subr.bf16.mxu1 %v7837_v37 }
 0xb98   : > { %3162 = vmatpush1.bf16.msra.mxu1 %v7843_v38 }
 0xb99   : > { %3163 = vmatprep.subr.bf16.mxu1 %v7849_v39 }
 0xb9c   : > { %3164 = vmatpush1.bf16.msra.mxu1 %v7855_v35 }
 0xb9d   : > { %3165 = vmatprep.subr.bf16.mxu1 %v7861_v51 }
 0xba0   : > { %3166 = vmatpush1.bf16.msra.mxu1 %v7867_v52 }
 0xba1   : > { %3167 = vmatprep.subr.bf16.mxu1 %v7873_v40 }
 0xba4   : > { %3168 = vmatpush1.bf16.msra.mxu1 %v7879_v60 }
 0xba5   : > { %3169 = vmatprep.subr.bf16.mxu1 %v7885_v62 }
 0xba8   : > { %3170 = vmatpush1.bf16.msra.mxu1 %v7891_v41 }
 0xba9   : > { %3171 = vmatprep.subr.bf16.mxu1 %v7897_v25 }
 0xbac   : > { %3172 = vmatpush1.bf16.msra.mxu1 %v7903_v26 }
 0xbad   : > { %3173 = vmatprep.subr.bf16.mxu1 %v7909_v59 }
 0xbb0   : > { %3174 = vmatpush1.bf16.msra.mxu1 %v7915_v61 }
 0xbb1   : > { %3175 = vmatprep.subr.bf16.mxu1 %v7921_v63 }
 0xbb4   : > { %3176 = vmatpush1.bf16.msra.mxu1 %v7927_v45  ;;  %v8036_v45 = vld [vmem:[%s6332_s16 + $0x68] sm:$0xff] }
 0xbb5   : > { %3177 = vmatprep.subr.bf16.mxu1 %v7933_v43 }
 0xbb8   : > { %3178 = vmatpush1.bf16.msra.mxu1 %v7939_v46 }
 0xbb9   : > { %3179 = vmatprep.subr.bf16.mxu1 %v7945_v16 }
 0xbbc   : > { %3180 = vmatpush1.bf16.msra.mxu1 %v7951_v17 }
 0xbbd   : > { %3181 = vmatprep.subr.bf16.mxu1 %v7957_v9 }
 0xbc0   : > { %3182 = vmatpush1.bf16.msra.mxu1 %v7963_v14 }
 0xbc1   : > { %3183 = vmatprep.subr.bf16.mxu1 %v7969_v15 }
 0xbc4   : > { %3184 = vmatpush1.bf16.msra.mxu1 %v7975_v2  ;;  %v8008_v2 = vld [vmem:[#allocation2] ss:$0 sm:$0xff] }
 0xbc5   : > { %3185 = vmatprep.subr.bf16.mxu1 %v7981_v13  ;;  %9220 = vst [vmem:[#allocation47_spill] sm:$0xff] %v8008_v2 }
 0xbc8   : > { %3186 = vmatpush1.bf16.msra.mxu1 %v7987_v18 }
 0xbc9   : > { %3187 = vmatprep.subr.bf16.mxu1 %v7993_v7 }
 0xbcc   : > { %3188 = vmatpush1.bf16.msra.mxu1 %v7999_v54 }
 0xbcd   : > { %3200 = vmatprep.subr.bf16.mxu1 %v8005_v30 }
 0xc62   : > { %v3050_v53 = vpop.f32.mrb[52].mxu1  ;;  %v3091_v49 = vpop.f32.mrb[52].mxu0 }
 0xc63   : > { %v3098_v29 = vmax.f32 %v3050_v53, %v3091_v49  ;;  %v3052_v3 = vpop.f32.mrb[53].mxu1  ;;  %v3093_v18 = vpop.f32.mrb[53].mxu0 }
 0xc64   : > { %v3053_v7 = vpop.f32.mrb[54].mxu1  ;;  %v3094_v13 = vpop.f32.mrb[54].mxu0 }
 0xc65   : > { %v3100_v15 = vadd.f32 %v8008_v2, %v3098_v29  ;;  %v3099_v14 = vmax.f32 %v3053_v7, %v3094_v13  ;;  %v3055_v54 = vpop.f32.mrb[55].mxu1  ;;  %v3096_v9 = vpop.f32.mrb[55].mxu0 }
 0xc67   : > { %v8011_v17 = vmax.f32 %v3100_v15, 0.0  ;;  %v3101_v16 = vadd.f32 %v8008_v2, %v3099_v14 }
 0xc69   : > { %v8014_v46 = vmax.f32 %v3101_v16, 0.0  ;;  %v3115_v30 = vrot.slane %v8011_v17, 2  ;;  %v3106_v49 = vrot.slane %v8011_v17, 1  ;;  %v3133_v9 = vrot.slane %v8011_v17, 4 }
 0xc6a   : > { %v3124_v14 = vrot.slane %v8011_v17, 3 }
 0xc6b   : > { %v3116_v53 = vrot.slane %v8014_v46, 2  ;;  %v3107_v3 = vrot.slane %v8014_v46, 1  ;;  %v3134_v18 = vrot.slane %v8014_v46, 4  ;;  %v3125_v54 = vrot.slane %v8014_v46, 3 }
 0xc6d   : > { %v3117_v29 = vsel %vm578_vm2, %v3115_v30, %v3116_v53  ;;  %v3108_v16 = vsel %vm558_vm0, %v3106_v49, %v3107_v3  ;;  %v3135_v7 = vsel %vm618_vm3, %v3133_v9, %v3134_v18  ;;  %v3126_v2 = vsel %vm598_vm1, %v3124_v14, %v3125_v54  ;;  %v8033_v49 = vld [vmem:[%s6332_s16 + $0x60] sm:$0xff] }
 0xc6e   : > { %v5436_v15 = vpack.i.bf16 %v3116_v53, %v3117_v29  ;;  %v5431_v13 = vpack.i.bf16 %v3107_v3, %v3108_v16  ;;  %v5446_v43 = vpack.i.bf16 %v3134_v18, %v3135_v7  ;;  %v5441_v30 = vpack.i.bf16 %v3125_v54, %v3126_v2  ;;  %v8039_v53 = vld [vmem:[%s6332_s16 + $0x70] sm:$0xff]  ;;  %v8046_v18 = vld [vmem:[%s6332_s16 + $0x78] sm:$0xff] }
 0xc6f   : > { %v3453_v3 = vrot.slane %v8033_v49, 1  ;;  %v3454_v29 = vrot.slane %v8036_v45, 1  ;;  %v3456_v16 = vrot.slane %v8039_v53, 1  ;;  %v3472_v9 = vrot.slane %v8033_v49, 2 }
 0xc70   : > { %5437 = vrot.lane.b32.xlu1 %v5436_v15, %s6071_s27  ;;  %5432 = vrot.lane.b32.xlu0 %v5431_v13, %s6072_s24  ;;  %v3475_v2 = vrot.slane %v8039_v53, 2  ;;  %v3491_v54 = vrot.slane %v8033_v49, 3  ;;  %v3492_v14 = vrot.slane %v8036_v45, 3  ;;  %v3494_v7 = vrot.slane %v8039_v53, 3 }
 0xc71   : > { %v3455_v15 = vsel %vm558_vm0, %v3453_v3, %v3454_v29  ;;  %v3457_v13 = vsel %vm558_vm0, %v3454_v29, %v3456_v16  ;;  %v3477_v3 = vrot.slane %v8046_v18, 2  ;;  %v3496_v60 = vrot.slane %v8046_v18, 3 }
 0xc72   : > { %v5451_v63 = vpack.i.bf16 %v3457_v13, %v3455_v15  ;;  %v3493_v26 = vsel %vm598_vm1, %v3491_v54, %v3492_v14  ;;  %v3495_v41 = vsel %vm598_vm1, %v3492_v14, %v3494_v7 }
 0xc73   : > { %v5461_v29 = vpack.i.bf16 %v3495_v41, %v3493_v26 }
 0xc74   : > { %5447 = vrot.lane.b32.xlu1 %v5446_v43, %s6073_s18  ;;  %5442 = vrot.lane.b32.xlu0 %v5441_v30, %s6074_s17  ;;  %v3473_v43 = vrot.slane %v8036_v45, 2  ;;  %v3458_v30 = vrot.slane %v8046_v18, 1 }
 0xc76   : > { %v3474_v61 = vsel %vm578_vm2, %v3472_v9, %v3473_v43  ;;  %v3476_v59 = vsel %vm578_vm2, %v3473_v43, %v3475_v2  ;;  %v3459_v62 = vsel %vm558_vm0, %v3456_v16, %v3458_v30  ;;  %v3478_v9 = vsel %vm578_vm2, %v3475_v2, %v3477_v3 }
 0xc77   : > { %v5456_v25 = vpack.i.bf16 %v3476_v59, %v3474_v61  ;;  %v5466_v15 = vpack.i.bf16 %v3458_v30, %v3459_v62  ;;  %v3497_v43 = vsel %vm598_vm1, %v3494_v7, %v3496_v60  ;;  %v5471_v59 = vpack.i.bf16 %v3477_v3, %v3478_v9 }
 0xc78   : > { %5452 = vrot.lane.b32.xlu0 %v5451_v63, %s6067_s20  ;;  %v5476_v61 = vpack.i.bf16 %v3496_v60, %v3497_v43 }
 0xc79   : > { %5457 = vrot.lane.b32.xlu1 %v5456_v25, %s9033_s23 }
 0xc7c   : > { %5462 = vrot.lane.b32.xlu0 %v5461_v29, %s9154_s25 }
 0xc7d   : > { %5467 = vrot.lane.b32.xlu1 %v5466_v15, %s6067_s20 }
 0xc80   : > { %5472 = vrot.lane.b32.xlu0 %v5471_v59, %s9033_s23 }
 0xc81   : > { %5477 = vrot.lane.b32.xlu1 %v5476_v61, %s9154_s25 }
 0xce2   : > { %v5438_v41 = vpop.permute.xlu1 %5437  ;;  %v5433_v26 = vpop.permute.xlu0 %5432 }
 0xce3   : > { %v5440_v63 = vunpack.i.h.bf16 %v5438_v41  ;;  %v5439_v16 = vunpack.i.l.bf16 %v5438_v41  ;;  %v5435_v25 = vunpack.i.h.bf16 %v5433_v26  ;;  %v5434_v62 = vunpack.i.l.bf16 %v5433_v26  ;;  %v8095_v26 = vld [vmem:[%s8905_s5 + $0x110] ss:$8 sps:$4 sm:$0xff]  }
 0xce5   : > { %v3143_v7 = vsel %vm1264_vm9, %v8014_v46, %v5435_v25  ;;  %v3145_v30 = vsel %vm1036_vm8, %v5435_v25, %v5440_v63  ;;  %v3144_v60 = vsel %vm1036_vm8, %v5434_v62, %v5439_v16  ;;  %v3142_v3 = vsel %vm1264_vm9, %v8011_v17, %v5434_v62  ;;  %v8082_v46 = vld [vmem:[%s8905_s5 + $0x100] ss:$8 sps:$4 sm:$0xff]   ;;  %v8089_v17 = vld [vmem:[%s8905_s5 + $0x114] ss:$8 sps:$4 sm:$0xff]   ;;  %v8101_v63 = vld [vmem:[%s8905_s5 + $0x124] ss:$8 sps:$4 sm:$0xff]  }
 0xce6   : > { %v5448_v54 = vpop.permute.xlu1 %5447  ;;  %v5443_v2 = vpop.permute.xlu0 %5442  ;;  %v3150_v61 = vpack.c.bf16 %v3143_v7, %v3142_v3  ;;  %9221 = vst [vmem:[#allocation48_spill] sm:$0xff] %v8101_v63  ;;  %v8107_v16 = vld [vmem:[%s8905_s5 + $0x120] ss:$8 sps:$4 sm:$0xff]   ;;  %v8113_v25 = vld [vmem:[%s8905_s5 + $0x134] ss:$8 sps:$4 sm:$0xff]  }
 0xce7   : > { %v5445_v14 = vunpack.i.h.bf16 %v5443_v2  ;;  %v5444_v13 = vunpack.i.l.bf16 %v5443_v2  ;;  %v5450_v29 = vunpack.i.h.bf16 %v5448_v54  ;;  %v5449_v15 = vunpack.i.l.bf16 %v5448_v54  ;;  %9222 = vst [vmem:[#allocation49_spill] sm:$0xff] %v8107_v16  ;;  %9223 = vst [vmem:[#allocation50_spill] sm:$0xff] %v8113_v25  ;;  %v8119_v62 = vld [vmem:[%s8905_s5 + $0x130] ss:$8 sps:$4 sm:$0xff]   ;;  %v8125_v54 = vld [vmem:[%s8905_s5 + $0x144] ss:$8 sps:$4 sm:$0xff]  }
 0xce8   : > { %9224 = vst [vmem:[#allocation51_spill] sm:$0xff] %v8119_v62  ;;  %9225 = vst [vmem:[#allocation52_spill] sm:$0xff] %v8125_v54  ;;  %v8131_v2 = vld [vmem:[%s8905_s5 + $0x140] ss:$8 sps:$4 sm:$0xff]   ;;  %v8137_v7 = vld [vmem:[%s8905_s5 + $0x154] ss:$8 sps:$4 sm:$0xff]  }
 0xce9   : > { %v3146_v9 = vsel %vm1269_vm10, %v3144_v60, %v5444_v13  ;;  %v3147_v43 = vsel %vm1269_vm10, %v3145_v30, %v5445_v14  ;;  %v3153_v41 = vpack.c.bf16 %v5450_v29, %v5449_v15  ;;  %9226 = vst [vmem:[#allocation53_spill] sm:$0xff] %v8131_v2  ;;  %9227 = vst [vmem:[#allocation54_spill] sm:$0xff] %v8137_v7  ;;  %v8143_v30 = vld [vmem:[%s8905_s5 + $0x150] ss:$8 sps:$4 sm:$0xff]   ;;  %v8149_v60 = vld [vmem:[%s8905_s5 + $0x164] ss:$8 sps:$4 sm:$0xff]  }
 0xcea   : > { %v3151_v59 = vpack.c.bf16 %v3147_v43, %v3146_v9  ;;  %9228 = vst [vmem:[#allocation55_spill] sm:$0xff] %v8143_v30  ;;  %9229 = vst [vmem:[#allocation56_spill] sm:$0xff] %v8149_v60  ;;  %v8155_v3 = vld [vmem:[%s8905_s5 + $0x160] ss:$8 sps:$4 sm:$0xff]   ;;  %v8161_v9 = vld [vmem:[%s8905_s5 + $0x174] ss:$8 sps:$4 sm:$0xff]  }
 0xceb   : > { %9230 = vst [vmem:[#allocation57_spill] sm:$0xff] %v8155_v3  ;;  %9231 = vst [vmem:[#allocation58_spill] sm:$0xff] %v8161_v9  ;;  %v8167_v43 = vld [vmem:[%s8905_s5 + $0x170] ss:$8 sps:$4 sm:$0xff]  }
 0xcec   : > { %3189 = vmatprep.mubr.bf16.mxu1 %v3151_v59  ;;  %9232 = vst [vmem:[#allocation59_spill] sm:$0xff] %v8167_v43  ;;  %v8173_v59 = vld [vmem:[%s8905_s5 + $0x184] ss:$8 sps:$4 sm:$0xff]  }
 0xced   : > { %3190 = vmatmul.mubr.bf16.vlgmr.msra.gmra.mrb[56].mxu1 %v3150_v61  ;;  %9233 = vst [vmem:[#allocation60_spill] sm:$0xff] %v8173_v59  ;;  %v8179_v61 = vld [vmem:[%s8905_s5 + $0x180] ss:$8 sps:$4 sm:$0xff]  }
 0xcee   : > { %3201 = vmatpush1.bf16.msra.mxu1 %v8082_v46  ;;  %5043 = vmatprep.mubr.msk.bf16.mxu1 %vm1597_vm11, %v3153_v41  ;;  %9234 = vst [vmem:[#allocation61_spill] sm:$0xff] %v8179_v61  ;;  %v8185_v41 = vld [vmem:[%s8905_s5 + $0x194] ss:$8 sps:$4 sm:$0xff]  }
 0xcef   : > { %3202 = vmatprep.subr.bf16.mxu1 %v8089_v17  ;;  %9235 = vst [vmem:[#allocation64_spill] sm:$0xff] %v8185_v41 }
 0xcf2   : > { %3203 = vmatpush1.bf16.msra.mxu1 %v8095_v26 }
 0xcf3   : > { %3204 = vmatprep.subr.bf16.mxu1 %v8101_v63 }
 0xcf6   : > { %3205 = vmatpush1.bf16.msra.mxu1 %v8107_v16 }
 0xcf7   : > { %3206 = vmatprep.subr.bf16.mxu1 %v8113_v25 }
 0xcfa   : > { %3207 = vmatpush1.bf16.msra.mxu1 %v8119_v62 }
 0xcfb   : > { %3208 = vmatprep.subr.bf16.mxu1 %v8125_v54 }
 0xcfe   : > { %3209 = vmatpush1.bf16.msra.mxu1 %v8131_v2 }
 0xcff   : > { %3210 = vmatprep.subr.bf16.mxu1 %v8137_v7 }
 0xd02   : > { %3211 = vmatpush1.bf16.msra.mxu1 %v8143_v30 }
 0xd03   : > { %3212 = vmatprep.subr.bf16.mxu1 %v8149_v60 }
 0xd06   : > { %3213 = vmatpush1.bf16.msra.mxu1 %v8155_v3 }
 0xd07   : > { %3214 = vmatprep.subr.bf16.mxu1 %v8161_v9 }
 0xd0a   : > { %3215 = vmatpush1.bf16.msra.mxu1 %v8167_v43  ;;  %v8191_v43 = vld [vmem:[%s8905_s5 + $0x190] ss:$8 sps:$4 sm:$0xff]  }
 0xd0b   : > { %3216 = vmatprep.subr.bf16.mxu1 %v8173_v59  ;;  %9236 = vst [vmem:[#allocation65_spill] sm:$0xff] %v8191_v43  ;;  %v3149_v59 = vsel %vm1272_vm13, %v5445_v14, %v5450_v29  ;;  %v5835_v14 = vld [vmem:[%s8901_s1 + $0x14] ss:$8 sps:$4 sm:$0xff]   ;;  %v5837_v29 = vld [vmem:[%s8901_s1 + $0x24] ss:$8 sps:$4 sm:$0xff]  }
 0xd0e   : > { %3217 = vmatpush1.bf16.msra.mxu1 %v8179_v61  ;;  %v3148_v61 = vsel %vm1272_vm13, %v5444_v13, %v5449_v15  ;;  %v5836_v13 = vld [vmem:[%s8901_s1 + $0x10] ss:$8 sps:$4 sm:$0xff]   ;;  %v5838_v15 = vld [vmem:[%s8901_s1 + $0x20] ss:$8 sps:$4 sm:$0xff]  }
 0xd0f   : > { %3218 = vmatprep.subr.bf16.mxu1 %v8185_v41  ;;  %v3152_v9 = vpack.c.bf16 %v3149_v59, %v3148_v61  ;;  %v5833_v41 = vld [vmem:[%s8901_s1 + $0x4] ss:$8 sps:$4 sm:$0xff]   ;;  %v5842_v61 = vld [vmem:[%s8901_s1 + $0x40] ss:$8 sps:$4 sm:$0xff]  }
 0xd10   : > { %v5841_v59 = vld [vmem:[%s8901_s1 + $0x44] ss:$8 sps:$4 sm:$0xff]  }
 0xd12   : > { %3219 = vmatpush1.bf16.msra.mxu1 %v8191_v43  ;;  %v5834_v43 = vld [vmem:[%s8901_s1] ss:$8 sps:$4 sm:$0xff]  }
 0xd13   : > { %5042 = vmatprep.subr.msk.bf16.mxu1 %vm1601_vm12, %v9174_v48 }
 0xd16   : > { %3221 = vmatpush1.bf16.msra.mxu1 %v9175_v0 }
 0xd17   : > { %3543 = vmatprep.subr.bf16.mxu1 %v5833_v41  ;;  %v5843_v41 = vld [vmem:[%s8901_s1 + $0x54] ss:$8 sps:$4 sm:$0xff]  }
 0xd19   : > { %3233 = vmatmul.mubr.bf16.vlgmr.msra.gmra.mrb[56].mxu1 %v3152_v9  ;;  %v5839_v9 = vld [vmem:[%s8901_s1 + $0x34] ss:$8 sps:$4 sm:$0xff]  }
 0xd1a   : > { %3544 = vmatpush1.bf16.msra.mxu1 %v5834_v43  ;;  %v5840_v43 = vld [vmem:[%s8901_s1 + $0x30] ss:$8 sps:$4 sm:$0xff]  }
 0xd1b   : > { %3545 = vmatprep.subr.bf16.mxu1 %v5835_v14  ;;  %v5844_v14 = vld [vmem:[%s8901_s1 + $0x50] ss:$8 sps:$4 sm:$0xff]  }
 0xd1e   : > { %3546 = vmatpush1.bf16.msra.mxu1 %v5836_v13  ;;  %v5845_v13 = vld [vmem:[%s8901_s1 + $0x64] ss:$8 sps:$4 sm:$0xff]  }
 0xd1f   : > { %3547 = vmatprep.subr.bf16.mxu1 %v5837_v29  ;;  %v5846_v29 = vld [vmem:[%s8901_s1 + $0x60] ss:$8 sps:$4 sm:$0xff]  }
 0xd22   : > { %3548 = vmatpush1.bf16.msra.mxu1 %v5838_v15  ;;  %v5847_v15 = vld [vmem:[%s8901_s1 + $0x74] ss:$8 sps:$4 sm:$0xff]  }
 0xd23   : > { %3549 = vmatprep.subr.bf16.mxu1 %v5839_v9  ;;  %v5848_v9 = vld [vmem:[%s8901_s1 + $0x70] ss:$8 sps:$4 sm:$0xff]  }
 0xd26   : > { %3550 = vmatpush1.bf16.msra.mxu1 %v5840_v43  ;;  %v5849_v43 = vld [vmem:[%s8901_s1 + $0x84] ss:$8 sps:$4 sm:$0xff]  }
 0xd27   : > { %3551 = vmatprep.subr.bf16.mxu1 %v5841_v59  ;;  %v5850_v59 = vld [vmem:[%s8901_s1 + $0x80] ss:$8 sps:$4 sm:$0xff]  }
 0xd2a   : > { %3552 = vmatpush1.bf16.msra.mxu1 %v5842_v61  ;;  %v5851_v61 = vld [vmem:[%s8901_s1 + $0x94] ss:$8 sps:$4 sm:$0xff]  }
 0xd2b   : > { %3553 = vmatprep.subr.bf16.mxu1 %v5843_v41  ;;  %v5852_v41 = vld [vmem:[%s8901_s1 + $0x90] ss:$8 sps:$4 sm:$0xff]  }
 0xd2e   : > { %3554 = vmatpush1.bf16.msra.mxu1 %v5844_v14  ;;  %v5453_v14 = vpop.permute.xlu0 %5452 }
 0xd2f   : > { %3555 = vmatprep.subr.bf16.mxu1 %v5845_v13  ;;  %v5458_v13 = vpop.permute.xlu1 %5457  ;;  %v5454_v0 = vunpack.i.l.bf16 %v5453_v14 }
 0xd30   : > { %v5459_v48 = vunpack.i.l.bf16 %v5458_v13 }
 0xd31   : > { %v3521_v30 = vsel %vm630_vm4, %v8033_v49, %v5454_v0 }
 0xd32   : > { %3556 = vmatpush1.bf16.msra.mxu1 %v5846_v29  ;;  %v3510_v29 = vrot.slane %v8033_v49, 4  ;;  %v3525_v2 = vsel %vm635_vm5, %v3521_v30, %v5459_v48  ;;  %v5463_v62 = vpop.permute.xlu0 %5462 }
 0xd33   : > { %3557 = vmatprep.subr.bf16.mxu1 %v5847_v15  ;;  %v3511_v15 = vrot.slane %v8036_v45, 4  ;;  %v5468_v25 = vpop.permute.xlu1 %5467  ;;  %v5464_v16 = vunpack.i.l.bf16 %v5463_v62 }
 0xd34   : > { %v5469_v63 = vunpack.i.l.bf16 %v5468_v25 }
 0xd35   : > { %v3512_v3 = vsel %vm618_vm3, %v3510_v29, %v3511_v15  ;;  %v5470_v29 = vunpack.i.h.bf16 %v5468_v25 }
 0xd36   : > { %3558 = vmatpush1.bf16.msra.mxu1 %v5848_v9  ;;  %v3513_v9 = vrot.slane %v8039_v53, 4  ;;  %v3523_v30 = vsel %vm630_vm4, %v8039_v53, %v5469_v63  ;;  %v8342_v63 = vld [vmem:[%s8907_s7 + $0x10] sm:$0xff]  }
 0xd37   : > { %3559 = vmatprep.subr.bf16.mxu1 %v5849_v43  ;;  %v3515_v43 = vrot.slane %v8046_v18, 4  ;;  %v3524_v48 = vsel %vm630_vm4, %v8046_v18, %v5470_v29  ;;  %v8391_v29 = vld [vmem:[%s8907_s7 + $0x48] sm:$0xff]  }
 0xd3a   : > { %3560 = vmatpush1.bf16.msra.mxu1 %v5850_v59  ;;  %v5455_v59 = vunpack.i.h.bf16 %v5453_v14  ;;  %v3516_v14 = vsel %vm618_vm3, %v3513_v9, %v3515_v43 }
 0xd3b   : > { %3561 = vmatprep.subr.bf16.mxu1 %v5851_v61  ;;  %v5460_v61 = vunpack.i.h.bf16 %v5458_v13  ;;  %v5465_v13 = vunpack.i.h.bf16 %v5463_v62  ;;  %v3536_v0 = vpack.c.bf16 %v3515_v43, %v3516_v14  ;;  %v8356_v43 = vld [vmem:[%s8907_s7 + $0x20] sm:$0xff]   ;;  %v8377_v14 = vld [vmem:[%s8907_s7 + $0x38] sm:$0xff]  }
 0xd3c   : > { %v3522_v60 = vsel %vm630_vm4, %v8036_v45, %v5455_v59  ;;  %v3529_v45 = vsel %vm640_vm6, %v3525_v2, %v5464_v16  ;;  %v8349_v2 = vld [vmem:[%s8907_s7 + $0x18] sm:$0xff]  }
 0xd3d   : > { %v3526_v54 = vsel %vm635_vm5, %v3522_v60, %v5460_v61  ;;  %v5473_v60 = vpop.permute.xlu0 %5472  ;;  %v8363_v61 = vld [vmem:[%s8907_s7 + $0x28] sm:$0xff]  }
 0xd3e   : > { %3562 = vmatpush1.bf16.msra.mxu1 %v5852_v41  ;;  %v3514_v41 = vsel %vm618_vm3, %v3511_v15, %v3513_v9  ;;  %v3530_v15 = vsel %vm640_vm6, %v3526_v54, %v5465_v13  ;;  %v5475_v9 = vunpack.i.h.bf16 %v5473_v60  ;;  %v5474_v62 = vunpack.i.l.bf16 %v5473_v60  ;;  %v8384_v13 = vld [vmem:[%s8907_s7 + $0x40] sm:$0xff]  }
 0xd3f   : > { %3742 = vmatprep.subr.bf16.mxu1 %v9131_v42  ;;  %v3534_v7 = vpack.c.bf16 %v3514_v41, %v3512_v3  ;;  %v3533_v49 = vpack.c.bf16 %v3530_v15, %v3529_v45  ;;  %v5478_v3 = vpop.permute.xlu1 %5477  ;;  %v8370_v41 = vld [vmem:[%s8907_s7 + $0x30] sm:$0xff]  }
 0xd40   : > { %v5480_v59 = vunpack.i.h.bf16 %v5478_v3  ;;  %v5479_v25 = vunpack.i.l.bf16 %v5478_v3  ;;  %v3527_v16 = vsel %vm635_vm5, %v3523_v30, %v5474_v62 }
 0xd41   : > { %5054 = vmatprep.mubr.msk.bf16.mxu1 %vm630_vm4, %v3534_v7  ;;  %v3528_v7 = vsel %vm635_vm5, %v3524_v48, %v5475_v9 }
 0xd42   : > { %3576 = vmatmul.mubr.bf16.vlgmr.msra.gmra.mrb[60].mxu1 %v3533_v49  ;;  %v3531_v18 = vsel %vm640_vm6, %v3527_v16, %v5479_v25  ;;  %v3532_v54 = vsel %vm640_vm6, %v3528_v7, %v5480_v59 }
 0xd43   : > { %5055 = vmatprep.mubr.msk.bf16.mxu1 %vm630_vm4, %v3536_v0  ;;  %3743 = vmatpush1.bf16.msra.mxu1 %v7590_v57  ;;  %v3535_v53 = vpack.c.bf16 %v3532_v54, %v3531_v18 }
 0xd44   : > { %3744 = vmatprep.subr.bf16.mxu1 %v9131_v42 }
 0xd47   : > { %3745 = vmatpush1.bf16.msra.mxu1 %v7599_v12 }
 0xd48   : > { %3746 = vmatprep.subr.bf16.mxu1 %v9131_v42 }
 0xd4a   : > { %3586 = vmatmul.mubr.bf16.gmra.mrb[64].mxu1 %v3535_v53 }
 0xd4b   : > { %3747 = vmatpush1.bf16.msra.mxu1 %v7606_v31 }
 0xd4c   : > { %3748 = vmatprep.subr.bf16.mxu1 %v9131_v42 }
 0xd4f   : > { %3749 = vmatpush1.bf16.msra.mxu1 %v7613_v33 }
 0xd50   : > { %3750 = vmatprep.subr.bf16.mxu1 %v9131_v42 }
 0xd53   : > { %3751 = vmatpush1.bf16.msra.mxu1 %v7620_v34 }
 0xd54   : > { %3752 = vmatprep.subr.bf16.mxu1 %v9131_v42 }
 0xd57   : > { %3753 = vmatpush1.bf16.msra.mxu1 %v7627_v21 }
 0xd58   : > { %3754 = vmatprep.subr.bf16.mxu1 %v9131_v42 }
 0xd5b   : > { %3755 = vmatpush1.bf16.msra.mxu1 %v7634_v22 }
 0xd5c   : > { %3756 = vmatprep.subr.bf16.mxu1 %v9131_v42 }
 0xd5f   : > { %3757 = vmatpush1.bf16.msra.mxu1 %v7641_v23  ;;  %v8312_v23 = vld [vmem:[%s8906_s6] sm:$0x7] }
 0xd60   : > { %3758 = vmatprep.subr.bf16.mxu1 %v9131_v42 }
 0xd63   : > { %3759 = vmatpush1.bf16.msra.mxu1 %v7648_v32  ;;  %v8328_v32 = vld [vmem:[%s8907_s7] sm:$0xff]  }
 0xd64   : > { %3760 = vmatprep.subr.bf16.mxu1 %v9131_v42 }
 0xd67   : > { %3761 = vmatpush1.bf16.msra.mxu1 %v7655_v24  ;;  %v8335_v24 = vld [vmem:[%s8907_s7 + $0x8] sm:$0xff]  }
 0xd68   : > { %3762 = vmatprep.subr.bf16.mxu1 %v9131_v42 }
 0xd6b   : > { %3763 = vmatpush1.bf16.msra.mxu1 %v6629_v6  ;;  %v8321_v6 = vld [vmem:[%s8906_s6 + $0x4] sm:$0x7] }
 0xdec   : > { %v3234_v57 = vpop.f32.mrb[56].mxu1 }
 0xded   : > { %v3236_v12 = vpop.f32.mrb[57].mxu1 }
 0xdee   : > { %v3238_v31 = vpop.f32.mrb[58].mxu1 }
 0xdef   : > { %v3243_v33 = vpack.c.bf16 %v3238_v31, %v3234_v57  ;;  %v3240_v34 = vpop.f32.mrb[59].mxu1 }
 0xdf0   : > { %v3244_v21 = vpack.c.bf16 %v3240_v34, %v3236_v12 }
 0xdf1   : > { %v3246_v22 = vsel %vm598_vm1, %v3243_v33, 0 }
 0xdf2   : > { %5044 = vmatprep.subr.msk.bf16.mxu0 %vm598_vm1, %v3244_v21 }
 0xdf3   : > { %3252 = vmatpush1.bf16.msra.mxu0 %v3246_v22 }
 0xdf4   : > { %5046 = vmatprep.subr.msk.bf16.mxu0 %vm598_vm1, %v3244_v21 }
 0xdf6   : > { %5045 = vmatmul.mubr.msk.bf16.vlgmr.msra.gmra.mrb[56].mxu0 %vm1697_vm14, %v8312_v23 }
 0xdf7   : > { %3293 = vmatpush1.bf16.msra.mxu0 %v3246_v22  ;;  %3324 = vmatprep.mubr.bf16.mxu0 %v9131_v42 }
 0xdf8   : > { %3340 = vmatprep.subr.bf16.mxu0 %v9131_v42 }
 0xdfe   : > { %5047 = vmatmul.mubr.msk.bf16.vlgmr.msra.gmra.mrb[60].mxu0 %vm1697_vm14, %v8321_v6 }
 0xdff   : > { %3341 = vmatpush1.bf16.msra.mxu0 %v8328_v32 }
 0xe00   : > { %3342 = vmatprep.subr.bf16.mxu0 %v9131_v42 }
 0xe03   : > { %3343 = vmatpush1.bf16.msra.mxu0 %v8335_v24 }
 0xe04   : > { %3344 = vmatprep.subr.bf16.mxu0 %v9131_v42 }
 0xe07   : > { %3345 = vmatpush1.bf16.msra.mxu0 %v8342_v63 }
 0xe08   : > { %3346 = vmatprep.subr.bf16.mxu0 %v9131_v42 }
 0xe0b   : > { %3347 = vmatpush1.bf16.msra.mxu0 %v8349_v2 }
 0xe0c   : > { %3348 = vmatprep.subr.bf16.mxu0 %v9131_v42 }
 0xe0f   : > { %3349 = vmatpush1.bf16.msra.mxu0 %v8356_v43 }
 0xe10   : > { %3350 = vmatprep.subr.bf16.mxu0 %v9131_v42 }
 0xe13   : > { %3351 = vmatpush1.bf16.msra.mxu0 %v8363_v61 }
 0xe14   : > { %3352 = vmatprep.subr.bf16.mxu0 %v9131_v42 }
 0xe15   : > { %v3577_v45 = vpop.f32.mrb[60].mxu1 }
 0xe16   : > { %v3579_v15 = vpop.f32.mrb[61].mxu1 }
 0xe17   : > { %3353 = vmatpush1.bf16.msra.mxu0 %v8370_v41  ;;  %v3581_v0 = vpop.f32.mrb[62].mxu1 }
 0xe18   : > { %3354 = vmatprep.subr.bf16.mxu0 %v9131_v42  ;;  %v3596_v49 = vpack.c.bf16 %v3581_v0, %v3577_v45  ;;  %v3583_v48 = vpop.f32.mrb[63].mxu1  ;;  %v8399_v45 = vld [vmem:[%s8907_s7 + $0x50] sm:$0xff]   ;;  %v8414_v0 = vld [vmem:[%s8907_s7 + $0x60] sm:$0xff]  }
 0xe19   : > { %v3597_v30 = vpack.c.bf16 %v3583_v48, %v3579_v15  ;;  %v8407_v15 = vld [vmem:[%s8907_s7 + $0x58] sm:$0xff]   ;;  %v8421_v48 = vld [vmem:[%s8907_s7 + $0x68] sm:$0xff]  }
 0xe1b   : > { %3355 = vmatpush1.bf16.msra.mxu0 %v8377_v14 }
 0xe1c   : > { %3356 = vmatprep.subr.bf16.mxu0 %v9131_v42 }
 0xe1d   : > { %v3587_v60 = vpop.f32.mrb[64].mxu1 }
 0xe1e   : > { %v3589_v3 = vpop.f32.mrb[65].mxu1 }
 0xe1f   : > { %3357 = vmatpush1.bf16.msra.mxu0 %v8384_v13  ;;  %v3591_v9 = vpop.f32.mrb[66].mxu1 }
 0xe20   : > { %3358 = vmatprep.subr.bf16.mxu0 %v9131_v42  ;;  %v3598_v62 = vpack.c.bf16 %v3591_v9, %v3587_v60  ;;  %v3593_v59 = vpop.f32.mrb[67].mxu1  ;;  %v8428_v60 = vld [vmem:[%s8907_s7 + $0x70] sm:$0xff]   ;;  %v8442_v9 = vld [vmem:[%s8907_s7 + $0x80] sm:$0xff]  }
 0xe21   : > { %v3599_v25 = vpack.c.bf16 %v3593_v59, %v3589_v3  ;;  %v8435_v3 = vld [vmem:[%s8907_s7 + $0x78] sm:$0xff]   ;;  %v8449_v59 = vld [vmem:[%s8907_s7 + $0x88] sm:$0xff]  }
 0xe23   : > { %3359 = vmatpush1.bf16.msra.mxu0 %v8391_v29 }
 0xe24   : > { %3380 = vmatprep.subr.bf16.mxu0 %v9131_v42 }
 0xec9   : > { %v3285_v7 = vpop.f32.mrb[56].mxu0 }
 0xeca   : > { %v3287_v16 = vpop.f32.mrb[57].mxu0 }
 0xecb   : > { %v3289_v18 = vpop.f32.mrb[58].mxu0 }
 0xecc   : > { %v3290_v54 = vpop.f32.mrb[59].mxu0  ;;  %v3601_v18 = vsel %vm578_vm2, %v3598_v62, 0 }
 0xed1   : > { %v3326_v53 = vpop.f32.mrb[60].mxu0 }
 0xed2   : > { %v3333_v57 = vmax.f32 %v3285_v7, %v3326_v53  ;;  %v3328_v12 = vpop.f32.mrb[61].mxu0  ;;  %v8456_v7 = vld [vmem:[%s8907_s7 + $0x90] sm:$0xff]  }
 0xed3   : > { %v3334_v31 = vmax.f32 %v3287_v16, %v3328_v12  ;;  %v3330_v33 = vpop.f32.mrb[62].mxu0  ;;  %v8463_v16 = vld [vmem:[%s8907_s7 + $0x98] sm:$0xff]  }
 0xed4   : > { %v3331_v34 = vpop.f32.mrb[63].mxu0  ;;  %v3335_v22 = vpack.c.bf16 %v3333_v57, %v3333_v57  ;;  %v9238_v33 = vld [vmem:[#allocation26_spill] sm:$0xff] }
 0xed5   : > { %v3336_v21 = vpack.c.bf16 %v3334_v31, %v3334_v31  ;;  %v9248_v34 = vld [vmem:[#allocation36_spill] sm:$0xff] }
 0xed7   : > { %5048 = vmatprep.mubr.msk.bf16.mxu0 %vm630_vm4, %v3336_v21 }
 0xed8   : > { %3373 = vmatmul.mubr.bf16.vlgmr.msra.gmra.mrb[64].mxu0 %v3335_v22 }
 0xed9   : > { %3381 = vmatpush1.bf16.msra.mxu0 %v8399_v45  ;;  %5049 = vmatprep.mubr.msk.bf16.mxu0 %vm630_vm4, %v3336_v21  ;;  %v9249_v21 = vld [vmem:[#allocation38_spill] sm:$0xff] }
 0xeda   : > { %3382 = vmatprep.subr.bf16.mxu0 %v9131_v42 }
 0xedd   : > { %3383 = vmatpush1.bf16.msra.mxu0 %v8407_v15 }
 0xede   : > { %3384 = vmatprep.subr.bf16.mxu0 %v9131_v42 }
 0xee1   : > { %3385 = vmatpush1.bf16.msra.mxu0 %v8414_v0 }
 0xee2   : > { %3386 = vmatprep.subr.bf16.mxu0 %v9131_v42 }
 0xee5   : > { %3387 = vmatpush1.bf16.msra.mxu0 %v8421_v48 }
 0xee6   : > { %3388 = vmatprep.subr.bf16.mxu0 %v9131_v42 }
 0xee9   : > { %3389 = vmatpush1.bf16.msra.mxu0 %v8428_v60 }
 0xeea   : > { %3390 = vmatprep.subr.bf16.mxu0 %v9131_v42 }
 0xeed   : > { %3391 = vmatpush1.bf16.msra.mxu0 %v8435_v3 }
 0xeee   : > { %3392 = vmatprep.subr.bf16.mxu0 %v9131_v42 }
 0xef1   : > { %3393 = vmatpush1.bf16.msra.mxu0 %v8442_v9 }
 0xef2   : > { %3394 = vmatprep.subr.bf16.mxu0 %v9131_v42 }
 0xef5   : > { %3395 = vmatpush1.bf16.msra.mxu0 %v8449_v59 }
 0xef6   : > { %3396 = vmatprep.subr.bf16.mxu0 %v9131_v42 }
 0xef9   : > { %3397 = vmatpush1.bf16.msra.mxu0 %v8456_v7 }
 0xefa   : > { %3398 = vmatprep.subr.bf16.mxu0 %v9131_v42 }
 0xefd   : > { %3399 = vmatpush1.bf16.msra.mxu0 %v8463_v16 }
 0xefe   : > { %3606 = vmatprep.subr.bf16.mxu0 %v3597_v30 }
 0xf00   : > { %3413 = vmatmul.mubr.bf16.vlgmr.msra.gmra.mrb[68].mxu0 %v3335_v22  ;;  %v9250_v22 = vld [vmem:[#allocation39_spill] sm:$0xff] }
 0xf01   : > { %3607 = vmatpush1.bf16.msra.mxu0 %v3596_v49  ;;  %3638 = vmatprep.mubr.bf16.mxu0 %v9131_v42 }
 0xf02   : > { %5056 = vmatprep.subr.msk.bf16.mxu0 %vm578_vm2, %v3599_v25 }
 0xf05   : > { %3609 = vmatpush1.bf16.msra.mxu0 %v3601_v18 }
 0xf06   : > { %3649 = vmatprep.subr.bf16.mxu0 %v3597_v30 }
 0xf08   : > { %5057 = vmatmul.mubr.msk.bf16.vlgmr.msra.gmra.mrb[72].mxu0 %vm839_vm7, %v7716_v20 }
 0xf09   : > { %3650 = vmatpush1.bf16.msra.mxu0 %v3596_v49  ;;  %3681 = vmatprep.mubr.bf16.mxu0 %v9131_v42 }
 0xf0a   : > { %5058 = vmatprep.subr.msk.bf16.mxu0 %vm578_vm2, %v3599_v25 }
 0xf0d   : > { %3652 = vmatpush1.bf16.msra.mxu0 %v3601_v18  ;;  %v9251_v18 = vld [vmem:[#allocation40_spill] sm:$0xff] }
 0xf0e   : > { %3701 = vmatprep.subr.bf16.mxu0 %v9131_v42 }
 0xf10   : > { %5059 = vmatmul.mubr.msk.bf16.vlgmr.msra.gmra.mrb[76].mxu0 %vm839_vm7, %v7726_v19 }
 0xf11   : > { %3702 = vmatpush1.bf16.msra.mxu0 %v7733_v28 }
 0xf12   : > { %3703 = vmatprep.subr.bf16.mxu0 %v9131_v42 }
 0xf15   : > { %3704 = vmatpush1.bf16.msra.mxu0 %v7740_v10 }
 0xf16   : > { %3705 = vmatprep.subr.bf16.mxu0 %v9131_v42 }
 0xf19   : > { %3706 = vmatpush1.bf16.msra.mxu0 %v7747_v47 }
 0xf1a   : > { %3707 = vmatprep.subr.bf16.mxu0 %v9131_v42 }
 0xf1d   : > { %3708 = vmatpush1.bf16.msra.mxu0 %v7754_v44 }
 0xf1e   : > { %3709 = vmatprep.subr.bf16.mxu0 %v9131_v42 }
 0xf21   : > { %3710 = vmatpush1.bf16.msra.mxu0 %v7761_v11 }
 0xf22   : > { %3711 = vmatprep.subr.bf16.mxu0 %v9131_v42 }
 0xf25   : > { %3712 = vmatpush1.bf16.msra.mxu0 %v7768_v4 }
 0xf26   : > { %3713 = vmatprep.subr.bf16.mxu0 %v9131_v42 }
 0xf29   : > { %3714 = vmatpush1.bf16.msra.mxu0 %v7775_v8 }
 0xf2a   : > { %3715 = vmatprep.subr.bf16.mxu0 %v9131_v42 }
 0xf2d   : > { %3716 = vmatpush1.bf16.msra.mxu0 %v7782_v55 }
 0xf2e   : > { %3717 = vmatprep.subr.bf16.mxu0 %v9131_v42 }
 0xf31   : > { %3718 = vmatpush1.bf16.msra.mxu0 %v7789_v58 }
 0xf32   : > { %3719 = vmatprep.subr.bf16.mxu0 %v9131_v42 }
 0xf35   : > { %3720 = vmatpush1.bf16.msra.mxu0 %v7796_v50 }
 0xf36   : > { %3721 = vmatprep.subr.bf16.mxu0 %v9131_v42 }
 0xf39   : > { %3722 = vmatpush1.bf16.msra.mxu0 %v6626_v5 }
 0xf3a   : > { %3842 = vmatprep.subr.bf16.mxu0 %v7804_v56 }
 0xfab   : > { %v8498_v20 = vpop.f32.mrb[64].mxu0 }
 0xfac   : > { %v3376_v19 = vpop.f32.mrb[65].mxu0 }
 0xfad   : > { %v3377_v28 = vpop.f32.mrb[66].mxu0  ;;  %v9252_v19 = vld [vmem:[#allocation41_spill] sm:$0xff] }
 0xfae   : > { %v3378_v10 = vpop.f32.mrb[67].mxu0  ;;  %v9253_v28 = vld [vmem:[#allocation42_spill] sm:$0xff] }
 0xfaf   : > { %v9254_v10 = vld [vmem:[#allocation37_spill] sm:$0xff] }
 0xfd3   : > { %v8500_v47 = vpop.f32.mrb[68].mxu0 }
 0xfd4   : > { %v3420_v44 = vmax.f32 %v8498_v20, %v8500_v47  ;;  %v3416_v11 = vpop.f32.mrb[69].mxu0 }
 0xfd5   : > { %v3417_v4 = vpop.f32.mrb[70].mxu0  ;;  %v9255_v11 = vld [vmem:[#allocation43_spill] sm:$0xff] }
 0xfd6   : > { %v3418_v8 = vpop.f32.mrb[71].mxu0  ;;  %v9256_v4 = vld [vmem:[#allocation44_spill] sm:$0xff] }
 0xfd7   : > { %v9257_v8 = vld [vmem:[#allocation45_spill] sm:$0xff] }
 0xfdb   : > { %v3640_v55 = vpop.f32.mrb[72].mxu0 }
 0xfdc   : > { %v3642_v58 = vpop.f32.mrb[73].mxu0 }
 0xfdd   : > { %v3644_v50 = vpop.f32.mrb[74].mxu0 }
 0xfde   : > { %v3646_v49 = vpop.f32.mrb[75].mxu0 }
 0xfe3   : > { %v3683_v5 = vpop.f32.mrb[76].mxu0 }
 0xfe4   : > { %v3692_v30 = vmax.f32 %v3640_v55, %v3683_v5  ;;  %v3685_v56 = vpop.f32.mrb[77].mxu0  ;;  %v9258_v55 = vld [vmem:[#allocation46_spill] sm:$0xff] }
 0xfe5   : > { %v3693_v62 = vmax.f32 %v3642_v58, %v3685_v56  ;;  %v3687_v25 = vpop.f32.mrb[78].mxu0 }
 0xfe6   : > { %v3694_v54 = vmax.f32 %v3644_v50, %v3687_v25  ;;  %v3689_v53 = vpop.f32.mrb[79].mxu0  ;;  %v9259_v25 = vld [vmem:[#allocation47_spill] sm:$0xff] }
 0xfe7   : > { %v3695_v57 = vmax.f32 %v3646_v49, %v3689_v53 }
 0xfe8   : > { %v3696_v12 = vpack.c.bf16 %v3694_v54, %v3692_v30 }
 0xfe9   : > { %v3697_v31 = vpack.c.bf16 %v3695_v57, %v3693_v62 }
 0xfeb   : > { %5060 = vmatprep.mubr.msk.bf16.mxu0 %vm1036_vm8, %v3697_v31  ;;  %5061 = vmatprep.mubr.msk.bf16.mxu1 %vm1036_vm8, %v3697_v31 }
 0xfec   : > { %3734 = vmatmul.mubr.bf16.vlgmr.msra.gmra.mrb[80].mxu0 %v3696_v12  ;;  %3775 = vmatmul.mubr.bf16.vlgmr.msra.gmra.mrb[68].mxu1 %v3696_v12 }
 0xfed   : > { %3843 = vmatpush1.bf16.msra.mxu0 %v7818_v27  ;;  %3968 = vmatprep.mubr.bf16.mxu1 %v9131_v42  ;;  %v9237_v27 = vld [vmem:[#allocation25_spill] sm:$0xff] }
 0xfee   : > { %3844 = vmatprep.subr.bf16.mxu0 %v7825_v36  ;;  %v9239_v36 = vld [vmem:[#allocation27_spill] sm:$0xff] }
 0xff1   : > { %3845 = vmatpush1.bf16.msra.mxu0 %v7831_v1  ;;  %v9240_v1 = vld [vmem:[#allocation28_spill] sm:$0xff] }
 0xff2   : > { %3846 = vmatprep.subr.bf16.mxu0 %v7837_v37  ;;  %v9241_v37 = vld [vmem:[#allocation29_spill] sm:$0xff] }
 0xff5   : > { %3847 = vmatpush1.bf16.msra.mxu0 %v7843_v38  ;;  %v9242_v38 = vld [vmem:[#allocation30_spill] sm:$0xff] }
 0xff6   : > { %3848 = vmatprep.subr.bf16.mxu0 %v7849_v39  ;;  %v9243_v39 = vld [vmem:[#allocation31_spill] sm:$0xff] }
 0xff9   : > { %3849 = vmatpush1.bf16.msra.mxu0 %v7855_v35  ;;  %v9244_v35 = vld [vmem:[#allocation32_spill] sm:$0xff] }
 0xffa   : > { %3850 = vmatprep.subr.bf16.mxu0 %v7861_v51  ;;  %v9245_v51 = vld [vmem:[#allocation33_spill] sm:$0xff] }
 0xffd   : > { %3851 = vmatpush1.bf16.msra.mxu0 %v7867_v52  ;;  %v9246_v52 = vld [vmem:[#allocation34_spill] sm:$0xff] }
 0xffe   : > { %3852 = vmatprep.subr.bf16.mxu0 %v7873_v40  ;;  %v9247_v40 = vld [vmem:[#allocation35_spill] sm:$0xff] }
0x1001   : > { %3853 = vmatpush1.bf16.msra.mxu0 %v9237_v27 }
0x1002   : > { %3854 = vmatprep.subr.bf16.mxu0 %v9238_v33  ;;  %v8541_v33 = vld [vmem:[#allocation5] ss:$0 sm:$0xff] }
0x1005   : > { %3855 = vmatpush1.bf16.msra.mxu0 %v9239_v36 }
0x1006   : > { %3856 = vmatprep.subr.bf16.mxu0 %v9240_v1  ;;  %v3421_v1 = vadd.f32 %v8541_v33, %v3420_v44 }
0x1008   : > { %v8553_v20 = vmax.f32 %v3421_v1, 0.0 }
0x1009   : > { %3857 = vmatpush1.bf16.msra.mxu0 %v9241_v37 }
0x100a   : > { %3858 = vmatprep.subr.bf16.mxu0 %v9242_v38 }
0x100d   : > { %3859 = vmatpush1.bf16.msra.mxu0 %v9243_v39 }
0x100e   : > { %3860 = vmatprep.subr.bf16.mxu0 %v9244_v35 }
0x1011   : > { %3861 = vmatpush1.bf16.msra.mxu0 %v9245_v51 }
0x1012   : > { %3862 = vmatprep.subr.bf16.mxu0 %v9246_v52 }
0x1015   : > { %3863 = vmatpush1.bf16.msra.mxu0 %v9247_v40  ;;  %v9260_v40 = vld [vmem:[#allocation23_spill] sm:$0xff] }
0x1016   : > { %3864 = vmatprep.subr.bf16.mxu0 %v9248_v34  ;;  %v9261_v34 = vld [vmem:[#allocation24_spill] sm:$0xff] }
0x1019   : > { %3865 = vmatpush1.bf16.msra.mxu0 %v9249_v21  ;;  %v9262_v21 = vmax.f32 %v9260_v40, %v9261_v34 }
0x101a   : > { %3866 = vmatprep.subr.bf16.mxu0 %v9250_v22 }
0x101b   : > { %v2736_v22 = vadd.f32 %v8541_v33, %v9262_v21 }
0x101d   : > { %3867 = vmatpush1.bf16.msra.mxu0 %v9251_v18 }
0x101e   : > { %3868 = vmatprep.subr.bf16.mxu0 %v9252_v19 }
0x1021   : > { %3869 = vmatpush1.bf16.msra.mxu0 %v9253_v28 }
0x1022   : > { %3870 = vmatprep.subr.bf16.mxu0 %v9254_v10 }
0x1025   : > { %3871 = vmatpush1.bf16.msra.mxu0 %v9255_v11 }
0x1026   : > { %3872 = vmatprep.subr.bf16.mxu0 %v9256_v4 }
0x1029   : > { %3873 = vmatpush1.bf16.msra.mxu0 %v9257_v8  ;;  %v8557_v8 = vmax.f32 %v2736_v22, 0.0 }
0x102a   : > { %3885 = vmatprep.subr.bf16.mxu0 %v9258_v55 }
0x10bf   : > { %v3735_v58 = vpop.f32.mrb[80].mxu0  ;;  %v3776_v50 = vpop.f32.mrb[68].mxu1 }
0x10c0   : > { %v3783_v49 = vmax.f32 %v3735_v58, %v3776_v50  ;;  %v3737_v5 = vpop.f32.mrb[81].mxu0  ;;  %v3778_v30 = vpop.f32.mrb[69].mxu1  ;;  %v3428_v50 = vrot.slane %v8553_v20, 2 }
0x10c1   : > { %v3738_v56 = vpop.f32.mrb[82].mxu0  ;;  %v3779_v62 = vpop.f32.mrb[70].mxu1  ;;  %v2743_v5 = vrot.slane %v8557_v8, 2  ;;  %v2739_v30 = vrot.slane %v8557_v8, 1 }
0x10c2   : > { %v3785_v54 = vadd.f32 %v9259_v25, %v3783_v49  ;;  %v3784_v53 = vmax.f32 %v3738_v56, %v3779_v62  ;;  %v3740_v57 = vpop.f32.mrb[83].mxu0  ;;  %v3781_v12 = vpop.f32.mrb[71].mxu1  ;;  %v3424_v49 = vrot.slane %v8553_v20, 1 }
0x10c3   : > { %v5506_v56 = vpack.i.bf16 %v3428_v50, %v2743_v5  ;;  %v9268_v50 = vld [vmem:[#allocation53_spill] sm:$0xff]  ;;  %v9271_v5 = vld [vmem:[#allocation56_spill] sm:$0xff] }
0x10c4   : > { %v3787_v31 = vmax.f32 %v3785_v54, 0.0  ;;  %v3786_v27 = vadd.f32 %v9259_v25, %v3784_v53  ;;  %v5501_v62 = vpack.i.bf16 %v3424_v49, %v2739_v30  ;;  %v3432_v25 = vrot.slane %v8553_v20, 3  ;;  %v9269_v49 = vld [vmem:[#allocation54_spill] sm:$0xff]  ;;  %v9274_v30 = vld [vmem:[#allocation59_spill] sm:$0xff] }
0x10c5   : > { %v2747_v54 = vrot.slane %v8557_v8, 3 }
0x10c6   : > { %v3788_v36 = vmax.f32 %v3786_v27, 0.0  ;;  %v3800_v37 = vrot.slane %v3787_v31, 2  ;;  %v3791_v38 = vrot.slane %v3787_v31, 1  ;;  %v3818_v28 = vrot.slane %v3787_v31, 4 }
0x10c7   : > { %v3809_v10 = vrot.slane %v3787_v31, 3  ;;  %v5511_v53 = vpack.i.bf16 %v3432_v25, %v2747_v54  ;;  %v9277_v25 = vld [vmem:[#allocation64_spill] sm:$0xff]  ;;  %v9278_v54 = vld [vmem:[#allocation65_spill] sm:$0xff] }
0x10c8   : > { %v3801_v39 = vrot.slane %v3788_v36, 2  ;;  %v3792_v35 = vrot.slane %v3788_v36, 1  ;;  %v3819_v51 = vrot.slane %v3788_v36, 4  ;;  %v3810_v52 = vrot.slane %v3788_v36, 3 }
0x10ca   : > { %v3802_v18 = vsel %vm578_vm2, %v3800_v37, %v3801_v39  ;;  %v3793_v19 = vsel %vm558_vm0, %v3791_v38, %v3792_v35  ;;  %v3820_v11 = vsel %vm618_vm3, %v3818_v28, %v3819_v51  ;;  %v3811_v4 = vsel %vm598_vm1, %v3809_v10, %v3810_v52 }
0x10cb   : > { %v5486_v47 = vpack.i.bf16 %v3801_v39, %v3802_v18  ;;  %v5481_v44 = vpack.i.bf16 %v3792_v35, %v3793_v19  ;;  %v5496_v55 = vpack.i.bf16 %v3819_v51, %v3820_v11  ;;  %v5491_v58 = vpack.i.bf16 %v3810_v52, %v3811_v4  ;;  %v9265_v4 = vld [vmem:[#allocation50_spill] sm:$0xff] }
0x10cc   : > { %vm4162_vm0 = vcmask 1040384   ;;  %vm4387_vm2 = vcmask 130048  }
0x10cd   : > { %5487 = vrot.lane.b32.xlu1 %v5486_v47, %s6071_s27  ;;  %5482 = vrot.lane.b32.xlu0 %v5481_v44, %s6072_s24  ;;  %s6075_s27 = smov 112  }
0x10d1   : > { %5497 = vrot.lane.b32.xlu1 %v5496_v55, %s6073_s18  ;;  %5492 = vrot.lane.b32.xlu0 %v5491_v58, %s6074_s17  ;;  %v9266_v55 = vld [vmem:[#allocation51_spill] sm:$0xff]  ;;  %v9267_v58 = vld [vmem:[#allocation52_spill] sm:$0xff]  ;;  %s5991_s17 = sshll.u32 %s6078_s22, 4  ;;  %s5992_s17 = int_to_ptr.vmem [resolvable:$false] %s5991_s17 }
0x10d5   : > { %5507 = vrot.lane.b32.xlu1 %v5506_v56, %s6067_s20  ;;  %5502 = vrot.lane.b32.xlu0 %v5501_v62, %s6073_s18  ;;  %v9275_v56 = vld [vmem:[#allocation60_spill] sm:$0xff]  ;;  %v9276_v62 = vld [vmem:[#allocation61_spill] sm:$0xff] }
0x10d9   : > { %5512 = vrot.lane.b32.xlu0 %v5511_v53, %s6075_s27  ;;  %v9279_v53 = vld [vmem:[#allocation62_spill] sm:$0xff] }
0x113f   : > { %v5488_v57 = vpop.permute.xlu1 %5487  ;;  %v5483_v12 = vpop.permute.xlu0 %5482 }
0x1140   : > { %v5489_v27 = vunpack.i.l.bf16 %v5488_v57  ;;  %v5484_v1 = vunpack.i.l.bf16 %v5483_v12  ;;  %v5490_v37 = vunpack.i.h.bf16 %v5488_v57  ;;  %v5485_v38 = vunpack.i.h.bf16 %v5483_v12 }
0x1142   : > { %v3829_v40 = vsel %vm1036_vm8, %v5484_v1, %v5489_v27  ;;  %v3828_v34 = vsel %vm1264_vm9, %v3788_v36, %v5485_v38  ;;  %v3830_v21 = vsel %vm1036_vm8, %v5485_v38, %v5490_v37  ;;  %v3827_v18 = vsel %vm1264_vm9, %v3787_v31, %v5484_v1  ;;  %v9263_v36 = vld [vmem:[#allocation48_spill] sm:$0xff]  ;;  %v9264_v31 = vld [vmem:[#allocation49_spill] sm:$0xff]  ;;  %v9280_v27 = vld [vmem:[#allocation63_spill] sm:$0xff] }
0x1143   : > { %v5493_v39 = vpop.permute.xlu0 %5492  ;;  %v5498_v35 = vpop.permute.xlu1 %5497  ;;  %v3835_v44 = vpack.c.bf16 %v3828_v34, %v3827_v18  ;;  %v5708_v18 = vld [vmem:[%s8909_s9 + $0xa0] sm:$0xff]  }
0x1144   : > { %v5495_v51 = vunpack.i.h.bf16 %v5493_v39  ;;  %v5494_v52 = vunpack.i.l.bf16 %v5493_v39  ;;  %v5500_v19 = vunpack.i.h.bf16 %v5498_v35  ;;  %v5499_v28 = vunpack.i.l.bf16 %v5498_v35 }
0x1146   : > { %v3831_v22 = vsel %vm1269_vm10, %v3829_v40, %v5494_v52  ;;  %v3832_v10 = vsel %vm1269_vm10, %v3830_v21, %v5495_v51  ;;  %v3838_v11 = vpack.c.bf16 %v5500_v19, %v5499_v28  ;;  %v3834_v57 = vsel %vm1272_vm13, %v5495_v51, %v5500_v19  ;;  %v5709_v19 = vld [vmem:[%s8909_s9 + $0x20] sm:$0xff]  }
0x1147   : > { %v3836_v47 = vpack.c.bf16 %v3832_v10, %v3831_v22  ;;  %v3833_v12 = vsel %vm1272_vm13, %v5494_v52, %v5499_v28  ;;  %v5707_v22 = vld [vmem:[%s8909_s9 + $0x60] sm:$0xff]  }
0x1148   : > { %v3837_v1 = vpack.c.bf16 %v3834_v57, %v3833_v12  ;;  %v5716_v57 = vld [vmem:[%s8909_s9 + $0x78] sm:$0xff]  }
0x1149   : > { %3874 = vmatprep.mubr.bf16.mxu0 %v3836_v47  ;;  %v5717_v12 = vld [vmem:[%s8909_s9 + $0xb8] sm:$0xff]  }
0x114a   : > { %3875 = vmatmul.mubr.bf16.vlgmr.msra.gmra.mrb[84].mxu0 %v3835_v44 }
0x114b   : > { %3886 = vmatpush1.bf16.msra.mxu0 %v8082_v46  ;;  %5063 = vmatprep.mubr.msk.bf16.mxu0 %vm1597_vm11, %v3838_v11  ;;  %v9270_v46 = vld [vmem:[#allocation55_spill] sm:$0xff]  ;;  %v5710_v11 = vld [vmem:[%s8909_s9 + $0x68] sm:$0xff]  }
0x114c   : > { %3887 = vmatprep.subr.bf16.mxu0 %v8089_v17  ;;  %v9272_v17 = vld [vmem:[#allocation57_spill] sm:$0xff] }
0x114f   : > { %3888 = vmatpush1.bf16.msra.mxu0 %v8095_v26  ;;  %v9273_v26 = vld [vmem:[#allocation58_spill] sm:$0xff] }
0x1150   : > { %3889 = vmatprep.subr.bf16.mxu0 %v9263_v36  ;;  %v5711_v36 = vld [vmem:[%s8909_s9 + $0xa8] sm:$0xff]  }
0x1153   : > { %3890 = vmatpush1.bf16.msra.mxu0 %v9264_v31  ;;  %v5712_v31 = vld [vmem:[%s8909_s9 + $0x28] sm:$0xff]  }
0x1154   : > { %3891 = vmatprep.subr.bf16.mxu0 %v9265_v4  ;;  %v9281_v4 = vld [vmem:[#allocation84_spill] sm:$0xff] }
0x1157   : > { %3892 = vmatpush1.bf16.msra.mxu0 %v9266_v55  ;;  %v9282_v55 = vld [vmem:[#allocation85_spill] sm:$0xff] }
0x1158   : > { %3893 = vmatprep.subr.bf16.mxu0 %v9267_v58  ;;  %v9283_v58 = vmax.f32 %v9281_v4, %v9282_v55 }
0x115b   : > { %3894 = vmatpush1.bf16.msra.mxu0 %v9268_v50  ;;  %v2050_v50 = vadd.f32 %v8541_v33, %v9283_v58 }
0x115c   : > { %3895 = vmatprep.subr.bf16.mxu0 %v9269_v49 }
0x115f   : > { %3896 = vmatpush1.bf16.msra.mxu0 %v9270_v46 }
0x1160   : > { %3897 = vmatprep.subr.bf16.mxu0 %v9271_v5 }
0x1163   : > { %3898 = vmatpush1.bf16.msra.mxu0 %v9272_v17 }
0x1164   : > { %3899 = vmatprep.subr.bf16.mxu0 %v9273_v26  ;;  %v5713_v26 = vld [vmem:[%s8909_s9 + $0x70] sm:$0xff]  }
0x1167   : > { %3900 = vmatpush1.bf16.msra.mxu0 %v9274_v30  ;;  %v5714_v30 = vld [vmem:[%s8909_s9 + $0xb0] sm:$0xff]  }
0x1168   : > { %3901 = vmatprep.subr.bf16.mxu0 %v9275_v56  ;;  %v8724_v56 = vmax.f32 %v2050_v50, 0.0 }
0x116b   : > { %3902 = vmatpush1.bf16.msra.mxu0 %v9276_v62 }
0x116c   : > { %3903 = vmatprep.subr.bf16.mxu0 %v9277_v25 }
0x116f   : > { %3904 = vmatpush1.bf16.msra.mxu0 %v9278_v54  ;;  %v5715_v54 = vld [vmem:[%s8909_s9 + $0x30] sm:$0xff]  }
0x1170   : > { %5062 = vmatprep.subr.msk.bf16.mxu0 %vm1601_vm12, %v9279_v53 }
0x1173   : > { %3906 = vmatpush1.bf16.msra.mxu0 %v9280_v27 }
0x1176   : > { %3918 = vmatmul.mubr.bf16.vlgmr.msra.gmra.mrb[84].mxu0 %v3837_v1  ;;  %v2053_v1 = vrot.slane %v8724_v56, 1 }
0x1249   : > { %v3919_v37 = vpop.f32.mrb[84].mxu0 }
0x124a   : > { %v3921_v38 = vpop.f32.mrb[85].mxu0 }
0x124b   : > { %v3923_v39 = vpop.f32.mrb[86].mxu0 }
0x124c   : > { %v3928_v35 = vpack.c.bf16 %v3923_v39, %v3919_v37  ;;  %v3925_v40 = vpop.f32.mrb[87].mxu0 }
0x124d   : > { %v3929_v34 = vpack.c.bf16 %v3925_v40, %v3921_v38  ;;  %v5718_v38 = vld [vmem:[%s8909_s9 + $0x38] sm:$0xff]   ;;  %v3436_v40 = vrot.slane %v8553_v20, 4 }
0x124e   : > { %v3931_v21 = vsel %vm598_vm1, %v3928_v35, 0 }
0x124f   : > { %5064 = vmatprep.subr.msk.bf16.mxu1 %vm598_vm1, %v3929_v34 }
0x1250   : > { %3937 = vmatpush1.bf16.msra.mxu1 %v3931_v21 }
0x1251   : > { %5066 = vmatprep.subr.msk.bf16.mxu1 %vm598_vm1, %v3929_v34  ;;  %vm4171_vm1 = vcmask 1042432  }
0x1253   : > { %5065 = vmatmul.mubr.msk.bf16.vlgmr.msra.gmra.mrb[72].mxu1 %vm1697_vm14, %v8312_v23 }
0x1254   : > { %3978 = vmatpush1.bf16.msra.mxu1 %v3931_v21  ;;  %4009 = vmatprep.mubr.bf16.mxu1 %v9131_v42  ;;  %v2751_v21 = vrot.slane %v8557_v8, 4 }
0x1255   : > { %4025 = vmatprep.subr.bf16.mxu1 %v9131_v42 }
0x125b   : > { %5067 = vmatmul.mubr.msk.bf16.vlgmr.msra.gmra.mrb[76].mxu1 %vm1697_vm14, %v8321_v6 }
0x125c   : > { %4026 = vmatpush1.bf16.msra.mxu1 %v8328_v32 }
0x125d   : > { %4027 = vmatprep.subr.bf16.mxu1 %v9131_v42 }
0x1260   : > { %4028 = vmatpush1.bf16.msra.mxu1 %v8335_v24 }
0x1261   : > { %4029 = vmatprep.subr.bf16.mxu1 %v9131_v42 }
0x1264   : > { %4030 = vmatpush1.bf16.msra.mxu1 %v8342_v63 }
0x1265   : > { %4031 = vmatprep.subr.bf16.mxu1 %v9131_v42 }
0x1268   : > { %4032 = vmatpush1.bf16.msra.mxu1 %v8349_v2 }
0x1269   : > { %4033 = vmatprep.subr.bf16.mxu1 %v9131_v42 }
0x126c   : > { %4034 = vmatpush1.bf16.msra.mxu1 %v8356_v43 }
0x126d   : > { %4035 = vmatprep.subr.bf16.mxu1 %v9131_v42 }
0x1270   : > { %4036 = vmatpush1.bf16.msra.mxu1 %v8363_v61 }
0x1271   : > { %4037 = vmatprep.subr.bf16.mxu1 %v9131_v42 }
0x1274   : > { %4038 = vmatpush1.bf16.msra.mxu1 %v8370_v41 }
0x1275   : > { %4039 = vmatprep.subr.bf16.mxu1 %v9131_v42 }
0x1278   : > { %4040 = vmatpush1.bf16.msra.mxu1 %v8377_v14 }
0x1279   : > { %4041 = vmatprep.subr.bf16.mxu1 %v9131_v42 }
0x127c   : > { %4042 = vmatpush1.bf16.msra.mxu1 %v8384_v13  ;;  %v5695_v13 = vld [vmem:[%s8909_s9 + $0x40] sm:$0xff]  }
0x127d   : > { %4043 = vmatprep.subr.bf16.mxu1 %v9131_v42  ;;  %5120 = vmatprep.subr.bf16.mxu0 %v5695_v13 }
0x1280   : > { %4044 = vmatpush1.bf16.msra.mxu1 %v8391_v29  ;;  %v5696_v29 = vld [vmem:[%s8909_s9 + $0x80] sm:$0xff]  }
0x1281   : > { %4065 = vmatprep.subr.bf16.mxu1 %v9131_v42 }
0x1326   : > { %v3970_v23 = vpop.f32.mrb[72].mxu1 }
0x1327   : > { %v3972_v6 = vpop.f32.mrb[73].mxu1 }
0x1328   : > { %v3974_v32 = vpop.f32.mrb[74].mxu1 }
0x1329   : > { %v3975_v24 = vpop.f32.mrb[75].mxu1 }
0x132e   : > { %v4011_v63 = vpop.f32.mrb[76].mxu1 }
0x132f   : > { %v4018_v2 = vmax.f32 %v3970_v23, %v4011_v63  ;;  %v4013_v43 = vpop.f32.mrb[77].mxu1  ;;  %v2061_v23 = vrot.slane %v8724_v56, 3  ;;  %v5719_v63 = vld [vmem:[%s8909_s9 + $0xc0] sm:$0xff]  }
0x1330   : > { %v4019_v61 = vmax.f32 %v3972_v6, %v4013_v43  ;;  %v4015_v41 = vpop.f32.mrb[78].mxu1  ;;  %v5531_v6 = vpack.i.bf16 %v3436_v40, %v2751_v21 }
0x1331   : > { %v4016_v14 = vpop.f32.mrb[79].mxu1  ;;  %v4020_v52 = vpack.c.bf16 %v4018_v2, %v4018_v2  ;;  %v6076_v2 = vmov 0.0   ;;  %v5508_v41 = vpop.permute.xlu1 %5507 }
0x1332   : > { %v4021_v51 = vpack.c.bf16 %v4019_v61, %v4019_v61  ;;  %v5503_v61 = vpop.permute.xlu0 %5502 }
0x1333   : > { %v5505_v13 = vunpack.i.h.bf16 %v5503_v61 }
0x1334   : > { %5068 = vmatprep.mubr.msk.bf16.mxu1 %vm630_vm4, %v4021_v51 }
0x1335   : > { %4058 = vmatmul.mubr.bf16.vlgmr.msra.gmra.mrb[80].mxu1 %v4020_v52 }
0x1336   : > { %4066 = vmatpush1.bf16.msra.mxu1 %v8399_v45  ;;  %5069 = vmatprep.mubr.msk.bf16.mxu1 %vm630_vm4, %v4021_v51  ;;  %v5697_v45 = vld [vmem:[%s8909_s9] sm:$0xff]   ;;  %v5513_v14 = vpop.permute.xlu0 %5512  ;;  %v5504_v51 = vunpack.i.l.bf16 %v5503_v61 }
0x1337   : > { %4067 = vmatprep.subr.bf16.mxu1 %v9131_v42  ;;  %5121 = vmatpush3.bf16.msra.mxu0 %v5697_v45  ;;  %v5510_v45 = vunpack.i.h.bf16 %v5508_v41 }
0x133a   : > { %4068 = vmatpush1.bf16.msra.mxu1 %v8407_v15  ;;  %v5698_v15 = vld [vmem:[%s8909_s9 + $0x48] sm:$0xff]  }
0x133b   : > { %4069 = vmatprep.subr.bf16.mxu1 %v9131_v42  ;;  %5122 = vmatprep.subr.bf16.mxu0 %v5698_v15  ;;  %v2755_v15 = vsel %vm1272_vm13, %v8557_v8, %v5504_v51 }
0x133e   : > { %4070 = vmatpush1.bf16.msra.mxu1 %v8414_v0  ;;  %v5699_v0 = vld [vmem:[%s8909_s9 + $0x88] sm:$0xff]  }
0x133f   : > { %4071 = vmatprep.subr.bf16.mxu1 %v9131_v42 }
0x1342   : > { %4072 = vmatpush1.bf16.msra.mxu1 %v8421_v48  ;;  %v5700_v48 = vld [vmem:[%s8909_s9 + $0x8] sm:$0xff]  }
0x1343   : > { %4073 = vmatprep.subr.bf16.mxu1 %v9131_v42  ;;  %5123 = vmatpush3.bf16.msra.mxu0 %v5700_v48  ;;  %v3440_v48 = vsel %vm1272_vm13, %v8553_v20, %v5505_v13 }
0x1346   : > { %4074 = vmatpush1.bf16.msra.mxu1 %v8428_v60  ;;  %v5701_v60 = vld [vmem:[%s8909_s9 + $0x50] sm:$0xff]  }
0x1347   : > { %4075 = vmatprep.subr.bf16.mxu1 %v9131_v42  ;;  %5124 = vmatprep.subr.bf16.mxu0 %v5701_v60 }
0x134a   : > { %4076 = vmatpush1.bf16.msra.mxu1 %v8435_v3  ;;  %v5702_v3 = vld [vmem:[%s8909_s9 + $0x90] sm:$0xff]  }
0x134b   : > { %4077 = vmatprep.subr.bf16.mxu1 %v9131_v42 }
0x134e   : > { %4078 = vmatpush1.bf16.msra.mxu1 %v8442_v9  ;;  %v5703_v9 = vld [vmem:[%s8909_s9 + $0x10] sm:$0xff]  }
0x134f   : > { %4079 = vmatprep.subr.bf16.mxu1 %v9131_v42  ;;  %5125 = vmatpush3.bf16.msra.mxu0 %v5703_v9 }
0x1352   : > { %4080 = vmatpush1.bf16.msra.mxu1 %v8449_v59  ;;  %v5704_v59 = vld [vmem:[%s8909_s9 + $0x58] sm:$0xff]  }
0x1353   : > { %4081 = vmatprep.subr.bf16.mxu1 %v9131_v42  ;;  %5126 = vmatprep.subr.bf16.mxu0 %v5704_v59 }
0x1356   : > { %4082 = vmatpush1.bf16.msra.mxu1 %v8456_v7  ;;  %v5705_v7 = vld [vmem:[%s8909_s9 + $0x98] sm:$0xff]  }
0x1357   : > { %4083 = vmatprep.subr.bf16.mxu1 %v9131_v42 }
0x135a   : > { %4084 = vmatpush1.bf16.msra.mxu1 %v8463_v16  ;;  %v5706_v16 = vld [vmem:[%s8909_s9 + $0x18] sm:$0xff]  }
0x135b   : > { %4431 = vmatprep.subr.bf16.mxu1 %v9131_v42  ;;  %5127 = vmatpush3.bf16.msra.mxu0 %v5706_v16 }
0x135c   : > { %5128 = vmatprep.subr.bf16.mxu0 %v5707_v22  ;;  %v3441_v22 = vsel %vm630_vm4, %v5505_v13, %v5510_v45  ;;  %v5722_v45 = vld [vmem:[%s8911_s11 + $0x10] sm:$0xff]  }
0x135d   : > { %4098 = vmatmul.mubr.bf16.vlgmr.msra.gmra.mrb[84].mxu1 %v4020_v52  ;;  %v5509_v52 = vunpack.i.l.bf16 %v5508_v41  ;;  %v5720_v41 = vld [vmem:[%s8911_s11] sm:$0xff]  }
0x135e   : > { %4432 = vmatpush1.bf16.msra.mxu1 %v5696_v29  ;;  %v5514_v29 = vunpack.i.l.bf16 %v5513_v14 }
0x135f   : > { %4433 = vmatprep.subr.bf16.mxu1 %v9131_v42  ;;  %5129 = vmatpush3.bf16.msra.mxu0 %v5709_v19  ;;  %v2756_v60 = vsel %vm630_vm4, %v5504_v51, %v5509_v52 }
0x1360   : > { %5130 = vmatprep.subr.bf16.mxu0 %v5710_v11  ;;  %v2757_v59 = vsel %vm2071_vm15, %v2756_v60, %v5514_v29  ;;  %v5726_v60 = vld [vmem:[%s8911_s11 + $0x30] sm:$0xff]  }
0x1362   : > { %4434 = vmatpush1.bf16.msra.mxu1 %v5699_v0  ;;  %v5515_v0 = vunpack.i.h.bf16 %v5513_v14 }
0x1363   : > { %4435 = vmatprep.subr.bf16.mxu1 %v9131_v42  ;;  %5131 = vmatpush3.bf16.msra.mxu0 %v5712_v31 }
0x1364   : > { %5132 = vmatprep.subr.bf16.mxu0 %v5713_v26 }
0x1366   : > { %4436 = vmatpush1.bf16.msra.mxu1 %v5702_v3 }
0x1367   : > { %4437 = vmatprep.subr.bf16.mxu1 %v9131_v42  ;;  %5133 = vmatpush3.bf16.msra.mxu0 %v5715_v54 }
0x1368   : > { %5134 = vmatprep.subr.bf16.mxu0 %v5716_v57 }
0x136a   : > { %4438 = vmatpush1.bf16.msra.mxu1 %v5705_v7 }
0x136b   : > { %4439 = vmatprep.subr.bf16.mxu1 %v9131_v42  ;;  %5135 = vmatpush3.bf16.msra.mxu0 %v5718_v38 }
0x136c   : > { %5158 = vmatprep.subr.bf16.mxu0 %v6076_v2 }
0x136e   : > { %4440 = vmatpush1.bf16.msra.mxu1 %v5708_v18  ;;  %v4132_v18 = vrot.slane %v2755_v15, 7  ;;  %v5723_v15 = vld [vmem:[%s8911_s11 + $0x18] sm:$0xff]  }
0x136f   : > { %4441 = vmatprep.subr.bf16.mxu1 %v9131_v42 }
0x1372   : > { %4442 = vmatpush1.bf16.msra.mxu1 %v5711_v36 }
0x1373   : > { %4443 = vmatprep.subr.bf16.mxu1 %v9131_v42 }
0x1376   : > { %4444 = vmatpush1.bf16.msra.mxu1 %v5714_v30 }
0x1377   : > { %4445 = vmatprep.subr.bf16.mxu1 %v9131_v42 }
0x137a   : > { %4446 = vmatpush1.bf16.msra.mxu1 %v5717_v12 }
0x137b   : > { %4447 = vmatprep.subr.bf16.mxu1 %v9131_v42  ;;  %v2065_v42 = vrot.slane %v8724_v56, 4 }
0x137e   : > { %4448 = vmatpush1.bf16.msra.mxu1 %v5719_v63 }
0x137f   : > { %5178 = vmatprep.subr.bf16.mxu1 %v6076_v2 }
0x1408   : > { %v4059_v28 = vpop.f32.mrb[80].mxu1 }
0x1409   : > { %v4061_v10 = vpop.f32.mrb[81].mxu1 }
0x140a   : > { %v4062_v47 = vpop.f32.mrb[82].mxu1 }
0x140b   : > { %v4063_v44 = vpop.f32.mrb[83].mxu1  ;;  %v4143_v47 = vrot.slane %v3440_v48, 6  ;;  %v5725_v48 = vld [vmem:[%s8911_s11 + $0x28] sm:$0xff]  }
0x140c   : > { %v4133_v44 = vrot.slane %v2757_v59, 7  ;;  %v5728_v59 = vld [vmem:[%s8913_s13] sm:$0xff]  }
0x1430   : > { %v4099_v49 = vpop.f32.mrb[84].mxu1 }
0x1431   : > { %v4105_v46 = vmax.f32 %v4059_v28, %v4099_v49  ;;  %v4101_v5 = vpop.f32.mrb[85].mxu1  ;;  %v3442_v28 = vsel %vm2071_vm15, %v3441_v22, %v5515_v0  ;;  %v5731_v22 = vld [vmem:[%s8913_s13 + $0x18] sm:$0xff]  }
0x1432   : > { %v4102_v17 = vpop.f32.mrb[86].mxu1  ;;  %v4144_v49 = vrot.slane %v3442_v28, 6  ;;  %v5070_v28 = vld [vmem:[#allocation7] ss:$0 sm:$0xff] }
0x1433   : > { %v4106_v62 = vadd.f32 %v8541_v33, %v4105_v46  ;;  %v4103_v25 = vpop.f32.mrb[87].mxu1  ;;  %v2057_v33 = vrot.slane %v8724_v56, 2 }
0x1435   : > { %v4107_v53 = vmax.f32 %v4106_v62, 0.0 }
0x1437   : > { %v4113_v27 = vrot.slane %v4107_v53, 2  ;;  %v4109_v37 = vrot.slane %v4107_v53, 1  ;;  %v4117_v34 = vrot.slane %v4107_v53, 3  ;;  %v4121_v24 = vrot.slane %v4107_v53, 4 }
0x1439   : > { %v5521_v39 = vpack.i.bf16 %v4113_v27, %v2057_v33  ;;  %v5516_v35 = vpack.i.bf16 %v4109_v37, %v2053_v1  ;;  %v5526_v32 = vpack.i.bf16 %v4117_v34, %v2061_v23  ;;  %v5536_v43 = vpack.i.bf16 %v4121_v24, %v2065_v42 }
0x143b   : > { %5522 = vrot.lane.b32.xlu0 %v5521_v39, %s6067_s20  ;;  %5517 = vrot.lane.b32.xlu1 %v5516_v35, %s6073_s18  ;;  %s9285_s20 = sld [smem:[#allocation16_spill]]  ;;  %s9286_s18 = sld [smem:[#allocation21_spill]] }
0x143f   : > { %5532 = vrot.lane.b32.xlu0 %v5531_v6, %s9284_s21  ;;  %5527 = vrot.lane.b32.xlu1 %v5526_v32, %s6075_s27 }
0x1441   : > { %s539_s27 = sand.u32 1, %s9285_s20   ;;  %p9288_p3 = scmp.ne.s32.totalorder %s9286_s18, 0 }
0x1442   : > { %s4826_s29 = sshll.u32 %s539_s27, 2  ;;  %s4701_s28 = scalar_lea.sflag [#allocation4], %s539_s27 }
0x1443   : > { %5537 = vrot.lane.b32.xlu1 %v5536_v43, %s9284_s21  ;;  %s541_s16 = scalar_lea.vmem [#allocation10], %s4826_s29  ;;  %s5993_s21 = scalar_lea.vmem %s5992_s17, 128 }
0x1444   : > { %s4714_s25 = sshll.u32 %s541_s16, 4  ;;  %s8859_s25 = int_to_ptr.vmem [resolvable:$true] %s4714_s25 }
0x1445   : > { %s5987_s24 = scalar_lea.vmem %s8859_s25, 64  ;;  %p5994_p8 = scmp.lt.s32.totalorder %s8859_s25, %s5992_s17 }
0x1446   : > { %p5988_p2 = scmp.ne.s32.totalorder %s8859_s25, %s5987_s24  ;;  %p5995_p11 = scmp.lt.s32.totalorder %s5993_s21, %s5987_s24 }
0x1448   : > { %p5989_p4 = pnand %p5988_p2, %p9288_p3  ;;  %p5996_p13 = por %p5995_p11, %p5994_p8 }
0x144a   : > { %p5990_p7 = pneg %p5989_p4 }
0x144c   : > { %p5997_p1 = pnand %p5996_p13, %p5990_p7 }
0x14ad   : > { %v5523_v3 = vpop.permute.xlu0 %5522  ;;  %v5518_v9 = vpop.permute.xlu1 %5517 }
0x14ae   : > { %v5520_v7 = vunpack.i.h.bf16 %v5518_v9  ;;  %v5519_v16 = vunpack.i.l.bf16 %v5518_v9  ;;  %v5525_v19 = vunpack.i.h.bf16 %v5523_v3  ;;  %v5524_v8 = vunpack.i.l.bf16 %v5523_v3  ;;  %v5727_v3 = vld [vmem:[%s8911_s11 + $0x38] ss:$0 sps:$4 sm:$0xff]  }
0x14af   : > { %v4545_v9 = vsel %vm618_vm3, %v5727_v3, 0  ;;  %vm4540_vm3 = vcmask 982016  }
0x14b0   : > { %v4125_v10 = vsel %vm1272_vm13, %v4107_v53, %v5520_v7  ;;  %v2069_v20 = vsel %vm1272_vm13, %v8724_v56, %v5519_v16  ;;  %v4126_v46 = vsel %vm630_vm4, %v5520_v7, %v5525_v19  ;;  %v2070_v17 = vsel %vm630_vm4, %v5519_v16, %v5524_v8  ;;  %v5729_v7 = vld [vmem:[%s8913_s13 + $0x8] sm:$0xff]   ;;  %v5730_v16 = vld [vmem:[%s8913_s13 + $0x10] sm:$0xff]  }
0x14b1   : > { %v4163_v11 = vsel %vm4162_vm0, %v2069_v20, %v4132_v18  ;;  %v5533_v36 = vpop.permute.xlu0 %5532  ;;  %v5528_v31 = vpop.permute.xlu1 %5527  ;;  %v4154_v5 = vrot.slane %v4125_v10, 5  ;;  %vm6077_vm4 = vmmov 0  }
0x14b2   : > { %v5535_v4 = vunpack.i.h.bf16 %v5533_v36  ;;  %v5534_v55 = vunpack.i.l.bf16 %v5533_v36  ;;  %v5530_v58 = vunpack.i.h.bf16 %v5528_v31  ;;  %v5529_v50 = vunpack.i.l.bf16 %v5528_v31 }
0x14b3   : > { %v4167_v56 = vsel %vm1601_vm12, %v4163_v11, %v4143_v47 }
0x14b4   : > { %v3443_v26 = vsel %vm635_vm5, %v5515_v0, %v5535_v4  ;;  %v2758_v30 = vsel %vm635_vm5, %v5514_v29, %v5534_v55  ;;  %v4146_v62 = vrot.slane %v5535_v4, 6  ;;  %v4135_v25 = vrot.slane %v5534_v55, 7  ;;  %v5721_v29 = vld [vmem:[%s8911_s11 + $0x8] sm:$0xff]   ;;  %v5724_v0 = vld [vmem:[%s8911_s11 + $0x20] sm:$0xff]  }
0x14b5   : > { %v2072_v54 = vsel %vm2071_vm15, %v2070_v17, %v5529_v50  ;;  %v4127_v53 = vsel %vm2071_vm15, %v4126_v46, %v5530_v58  ;;  %v5538_v57 = vpop.permute.xlu1 %5537  ;;  %v4145_v37 = vrot.slane %v3443_v26, 6  ;;  %v4134_v38 = vrot.slane %v2758_v30, 7 }
0x14b6   : > { %v4155_v12 = vrot.slane %v4127_v53, 5  ;;  %v4164_v33 = vsel %vm4162_vm0, %v2072_v54, %v4133_v44  ;;  %v5540_v27 = vunpack.i.h.bf16 %v5538_v57  ;;  %v5539_v1 = vunpack.i.l.bf16 %v5538_v57 }
0x14b7   : > { %v4168_v39 = vsel %vm1601_vm12, %v4164_v33, %v4144_v49  ;;  %v4172_v35 = vsel %vm4171_vm1, %v4167_v56, %v4154_v5  ;;  %v5733_v49 = vld [vmem:[%s8913_s13 + $0x28] ss:$0 sps:$4 sm:$0x33]   ;;  %v5097_v5 = vld [vmem:[#allocation8] ss:$0 sm:$0xff] }
0x14b8   : > { %v4157_v40 = vrot.slane %v5540_v27, 5  ;;  %v2073_v34 = vsel %vm635_vm5, %v5529_v50, %v5539_v1  ;;  %v4128_v21 = vsel %vm635_vm5, %v5530_v58, %v5540_v27  ;;  %v4166_v23 = vsel %vm4162_vm0, %v5539_v1, %v4135_v25  ;;  %v5732_v50 = vld [vmem:[%s8913_s13 + $0x20] sm:$0xff]  }
0x14b9   : > { %v4156_v6 = vrot.slane %v4128_v21, 5  ;;  %v4165_v32 = vsel %vm4162_vm0, %v2073_v34, %v4134_v38  ;;  %v4170_v24 = vsel %vm1601_vm12, %v4166_v23, %v4146_v62  ;;  %v4173_v63 = vsel %vm4171_vm1, %v4168_v39, %v4155_v12 }
0x14ba   : > { %v4177_v42 = vpack.c.bf16 %v4173_v63, %v4173_v63  ;;  %v4175_v43 = vsel %vm4171_vm1, %v4170_v24, %v4157_v40  ;;  %v4169_v61 = vsel %vm1601_vm12, %v4165_v32, %v4145_v37  ;;  %v4176_v14 = vpack.c.bf16 %v4172_v35, %v4172_v35 }
0x14bb   : > { %v4179_v51 = vpack.c.bf16 %v4175_v43, %v4175_v43  ;;  %v4174_v52 = vsel %vm4171_vm1, %v4169_v61, %v4156_v6  ;;  %v4644_v46 = vsel %vm1601_vm12, %v5733_v49, 0  ;;  %vm4686_vm5 = vcmask 76800  }
0x14bc   : > { %4423 = vmatprep.mubr.bf16.mxu0 %v4177_v42  ;;  %v4178_v13 = vpack.c.bf16 %v4174_v52, %v4174_v52 }
0x14bd   : > { %4424 = vmatmul.mubr.bf16.vlgmr.msra.gmra.mrb[88].mxu0 %v4176_v14  ;;  %5096 = vmatprep.mubr.msk.bf16.mxu1 %vm4387_vm2, %v4179_v51 }
0x14be   : > { %4464 = vmatmul.mubr.bf16.vlgmr.msra.gmra.mrb[88].mxu1 %v4178_v13  ;;  %5159 = vmatpush3.bf16.msra.mxu0 %v5720_v41 }
0x14bf   : > { %5160 = vmatprep.subr.bf16.mxu0 %v6076_v2  ;;  %5174 = vmatprep.mubr.msk.bf16.mxu0 %vm6077_vm4, %v6076_v2 }
0x14c0   : > { %5190 = vmatprep.mubr.msk.bf16.mxu1 %vm6077_vm4, %v6076_v2  ;;  %5179 = vmatpush3.bf16.msra.mxu1 %v5728_v59 }
0x14c1   : > { %5180 = vmatprep.subr.bf16.mxu1 %v6076_v2 }
0x14c2   : > { %5161 = vmatpush3.bf16.msra.mxu0 %v5721_v29 }
0x14c3   : > { %5162 = vmatprep.subr.bf16.mxu0 %v6076_v2 }
0x14c4   : > { %5181 = vmatpush3.bf16.msra.mxu1 %v5729_v7 }
0x14c5   : > { %5182 = vmatprep.subr.bf16.mxu1 %v6076_v2 }
0x14c6   : > { %5163 = vmatpush3.bf16.msra.mxu0 %v5722_v45 }
0x14c7   : > { %5164 = vmatprep.subr.bf16.mxu0 %v6076_v2 }
0x14c8   : > { %5183 = vmatpush3.bf16.msra.mxu1 %v5730_v16 }
0x14c9   : > { %5184 = vmatprep.subr.bf16.mxu1 %v6076_v2 }
0x14ca   : > { %5165 = vmatpush3.bf16.msra.mxu0 %v5723_v15 }
0x14cb   : > { %5166 = vmatprep.subr.bf16.mxu0 %v6076_v2 }
0x14cc   : > { %5185 = vmatpush3.bf16.msra.mxu1 %v5731_v22 }
0x14cd   : > { %5186 = vmatprep.subr.bf16.mxu1 %v6076_v2 }
0x14ce   : > { %5167 = vmatpush3.bf16.msra.mxu0 %v5724_v0 }
0x14cf   : > { %5168 = vmatprep.subr.bf16.mxu0 %v6076_v2 }
0x14d0   : > { %5187 = vmatpush3.bf16.msra.mxu1 %v5732_v50 }
0x14d1   : > { %5188 = vmatprep.subr.bf16.mxu1 %v6076_v2 }
0x14d2   : > { %5169 = vmatpush3.bf16.msra.mxu0 %v5725_v48 }
0x14d3   : > { %5170 = vmatprep.subr.bf16.mxu0 %v6076_v2 }
0x14d4   : > { %5189 = vmatpush3.bf16.msra.mxu1 %v4644_v46 }
0x14d6   : > { %5171 = vmatpush3.bf16.msra.mxu0 %v5726_v60 }
0x14d7   : > { %5172 = vmatprep.subr.bf16.mxu0 %v6076_v2  ;;  %v5107_v2 = vld [vmem:[%s8914_s14] ss:$0 sm:$0xff] }
0x14da   : > { %5173 = vmatpush3.bf16.msra.mxu0 %v4545_v9 }
0x1590   : > { %v5136_v18 = vpop.f32.mrb[88].mxu0 }
0x1591   : > { %v5137_v19 = vpop.f32.mrb[89].mxu0  ;;  %v4465_v8 = vpop.f32.mrb[88].mxu1 }
0x1592   : > { %v5138_v10 = vadd.f32 %v5137_v19, %v5136_v18  ;;  %v5139_v20 = vpop.f32.mrb[90].mxu0  ;;  %v4467_v47 = vpop.f32.mrb[89].mxu1 }
0x1593   : > { %v5140_v44 = vpop.f32.mrb[91].mxu0  ;;  %v4468_v11 = vpop.f32.mrb[90].mxu1 }
0x1594   : > { %v4426_v36 = vadd.f32 %v5138_v10, %v5070_v28  ;;  %v4469_v31 = vpop.f32.mrb[91].mxu1 }
0x1596   : > { %v4466_v4 = vadd.f32 %v4465_v8, %v4426_v36 }
0x1598   : > { %v4471_v55 = vmax.f32 %v4466_v4, 0.0 }
0x159a   : > { %v4472_v58 = vpack.c.bf16 %v4471_v55, %v4471_v55 }
0x159c   : > { %5175 = vmatmul.mubr.msk.bf16.vlgmr.msra.gmra.mrb[92].mxu0 %vm4540_vm3, %v4472_v58 }
0x166f   : > { %v4581_v17 = vpop.f32.mrb[92].mxu0 }
0x1670   : > { %v4582_v26 = vadd.f32 %v5097_v5, %v4581_v17  ;;  %v5176_v30 = vpop.f32.mrb[93].mxu0 }
0x1671   : > { %v4584_v56 = vpop.f32.mrb[94].mxu0 }
0x1672   : > { %v4587_v62 = vmax.f32 %v4582_v26, 0.0  ;;  %v5177_v25 = vpop.f32.mrb[95].mxu0 }
0x1674   : > { %v4588_v54 = vpack.c.bf16 %v4587_v62, %v4587_v62 }
0x1676   : > { %5191 = vmatmul.mubr.msk.bf16.vlgmr.msra.gmra.mrb[92].mxu1 %vm1264_vm9, %v4588_v54 }
0x1749   : > { %v4680_v53 = vpop.f32.mrb[92].mxu1 }
0x174a   : > { %v4681_v57 = vadd.f32 %v5107_v2, %v4680_v53  ;;  %v5192_v12 = vpop.f32.mrb[93].mxu1 }
0x174b   : > { %v4683_v33 = vpop.f32.mrb[94].mxu1 }
0x174c   : > { %v5193_v27 = vpop.f32.mrb[95].mxu1  ;;  %v4687_v1 = vsel %vm4686_vm5, %v4681_v57, -inf }
0x174d   : > { %4688 = vmax.xlane.f32.xlu0 %v4687_v1 }
0x17da   : > { %v4689_v37 = vpop.xlane.xlu0 %4688 }
0x17db   : > { %v4690_v38 = vsub.f32 %v4681_v57, %v4689_v37 }
0x17dd   : > { %v4691_v39 = vmul.f32 1.442695, %v4690_v38 }
0x17df   : > { %5734 = vpow2.f32 %v4691_v39 }
0x17e9   : > { %v5735_v35 = vpop.eup %5734 }
0x17ea   : > { %v4693_v40 = vsel %vm4686_vm5, %v5735_v35, 0.0 }
0x17eb   : > { %4694 = vadd.xlane.f32.xlu1 %v4693_v40 }
0x1878   : > { %v4695_v34 = vpop.xlane.xlu1 %4694 }
0x1879   : > { %5736 = vlog2.f32 %v4695_v34 }
0x1883   : > { %v5737_v21 = vpop.eup %5736 }
0x1884   : > { %v4697_v23 = vmul.f32 0.6931472, %v5737_v21 }
0x1886   : > { %v4698_v6 = vsub.f32 %v4690_v38, %v4697_v23 }
0x1888   : > { %4699 = vst.msk [vmem:[%s541_s16] sm:$0xf] %vm4686_vm5, %v4698_v6 }
0x1889   : > { %6000 = shalt.err (!%p5997_p1)
}
0x188a   : > { %s6001_s20 = scalar_lea.hbm %s8857_s19, 64  ;;  %s6005_s30 = scalar_lea.hbm %s9287_s15, 128 }
0x188b   : > { %p6002_p0 = scmp.ne.s32.totalorder %s8857_s19, %s6001_s20  ;;  %p6006_p9 = scmp.lt.u32.totalorder %s8857_s19, %s9287_s15 }
0x188c   : > { %p6007_p12 = scmp.lt.u32.totalorder %s6005_s30, %s6001_s20  ;;  %p6009_p2 = scmp.lt.u32.totalorder %s6001_s20, %s8857_s19 }
0x188d   : > { %p6003_p6 = pnand %p6002_p0, %p9288_p3 }
0x188e   : > { %p6008_p10 = por %p6007_p12, %p6006_p9 }
0x188f   : > { %p6004_p5 = pneg %p6003_p6 }
0x1890   : > { %p6010_p4 = por %p6009_p2, %p6008_p10 }
0x1892   : > { %p6011_p7 = pnand %p6010_p4, %p6004_p5 }
0x1894   : > { %6014 = shalt.err (!%p6011_p7)
}
0x1895   : > { %5226 = dma.vmem_to_hbm [thread:$0]  (%p9288_p3), %s8859_s25, 64, %s8857_s19, %s4701_s28  }
0x1896 PF: > { %s9289_s23 = sld [smem:[#allocation18_spill]]  ;;  %s9290_s24 = sld [smem:[#allocation15_spill]] }
0x1897   : > { %s9291_s22 = sld [smem:[#allocation22_spill]] }
0x189c   : > { %p5253_p8 = scmp.ge.s32.totalorder %s9289_s23, 2  ;;  %s4726_s17 = sand.u32 1, %s9290_s24  }
0x189d   : > { %p9292_p11 = scmp.ne.s32.totalorder %s9291_s22, 0  ;;  %s4727_s21 = scalar_lea.sflag [#allocation4], %s4726_s17 }
0x189f   : > { %p5242_p13 = pnand %p5253_p8, %p9292_p11 }
0x18a1   : > { %6044 = dma.done.wait (!%p5242_p13), %s4727_s21, 64  }
0x18a2   : > { %6046 = vsyncadd (!%p5242_p13), %s4727_s21, 4294967232  ;;  %s9293_s21 = sld [smem:[#allocation19_spill]]  ;;  %s9294_s18 = sld [smem:[#allocation16_spill]] }
0x18a3   : > { %s9295_s19 = sld [smem:[#allocation17_spill]]  ;;  %s9296_s20 = sld [smem:[#allocation20_spill]] }
0x18a8   : > { %p28_p1 = scmp.ge.s32.totalorder %s9293_s21, 4  }
0x18aa   :  { %30 = sbr.rel (!%p28_p1) target bundleno = 8 (0x8), region = 139 }
0x18b1   :  { %4732 = vsyncpa [#allocation3], 1 }
0x18b2   :  { %4734 = vsyncpa [#allocation3 + $0x1], 1 }
0x18b3   :  { %4735 = vsyncpa [#allocation6], 1 }
0x18b4   :  { %4736 = vsyncpa [#allocation9], 1 }
0x18b5   :  { %4737 = vsyncpa [#allocation4], 1 }
0x18b6   :  { %4739 = vsyncpa [#allocation4 + $0x1], 1 }

</bundles_post_ra>
